<compile_context>
chip_gen: v7x
topology: tpu7x:2x2x1
jax: 0.10.0
libtpu: 0.0.40
codegen_flags: <defaults>
</compile_context>

<pallas_src>
import functools

import jax
import jax.numpy as jnp
from jax import lax
from jax.experimental import pallas as pl
from jax.experimental.pallas import tpu as pltpu

LANE = 128


def _round_up(x, m):
    return (x + m - 1) // m * m


def residual_block_kernel(xpad_ref, w1_ref, wadj_ref, w2_ref,
                          s1_ref, b1_ref, sa_ref, ba_ref, s2_ref, b2_ref,
                          out_ref, midpad_ref):
    """One image per grid step.  All channel dims are padded to a lane multiple.

    xpad_ref : [H+2, W+2, Cin]   spatially zero-padded input (batch squeezed)
    w1_ref   : [9*Cin, Cout]     conv1 3x3 weights, taps fused along K
    wadj_ref : [Cin, Cout]       1x1 shortcut conv weight
    w2_ref   : [9*Cout, Cout]    conv2 3x3 weights, taps fused along K
    s*_ref, b*_ref : [1, Cout]   folded BN scale / shift (conv bias included)
    out_ref  : [H, W, Cout]
    midpad_ref : VMEM scratch [H+2, W+2, Cout] (conv1 -> conv2 halo buffer)
    """
    H, W, Cout = out_ref.shape
    Cin = xpad_ref.shape[-1]
    M = H * W

    xpad = xpad_ref[...]

    # ---- conv1 (3x3, pad 1) as a single fused matmul over K = 9*Cin ----
    patches1 = jnp.concatenate(
        [xpad[dy:dy + H, dx:dx + W, :] for dy in range(3) for dx in range(3)],
        axis=-1).reshape(M, 9 * Cin)
    acc1 = jnp.dot(patches1, w1_ref[...], preferred_element_type=jnp.float32)
    mid = jnp.maximum(acc1 * s1_ref[...] + b1_ref[...], 0.0)      # BN1 + ReLU

    # ---- shortcut: 1x1 conv + BN, reusing the centre tap (dy=dx=1) ----
    center = patches1[:, 4 * Cin:5 * Cin]
    identity = jnp.dot(center, wadj_ref[...],
                       preferred_element_type=jnp.float32)
    identity = identity * sa_ref[...] + ba_ref[...]

    # ---- re-pad conv1 output for conv2: zero only the 1-pixel halo strips,
    #      then write the interior once (no full zero-fill / re-zero) ----
    midpad_ref[0:1, :, :] = jnp.zeros((1, W + 2, Cout), jnp.float32)
    midpad_ref[H + 1:H + 2, :, :] = jnp.zeros((1, W + 2, Cout), jnp.float32)
    midpad_ref[:, 0:1, :] = jnp.zeros((H + 2, 1, Cout), jnp.float32)
    midpad_ref[:, W + 1:W + 2, :] = jnp.zeros((H + 2, 1, Cout), jnp.float32)
    midpad_ref[1:1 + H, 1:1 + W, :] = mid.reshape(H, W, Cout)
    midpad = midpad_ref[...]

    # ---- conv2 (3x3, pad 1) as a single fused matmul over K = 9*Cout ----
    patches2 = jnp.concatenate(
        [midpad[dy:dy + H, dx:dx + W, :] for dy in range(3) for dx in range(3)],
        axis=-1).reshape(M, 9 * Cout)
    acc2 = jnp.dot(patches2, w2_ref[...], preferred_element_type=jnp.float32)

    # ---- BN2 + residual add + ReLU, fused into the single output store ----
    out = jnp.maximum(acc2 * s2_ref[...] + b2_ref[...] + identity, 0.0)
    out_ref[...] = out.reshape(H, W, Cout)


@functools.partial(jax.jit, static_argnames=("out_channels",))
def residual_block_forward(x_nchw, params, *, out_channels):
    """x_nchw: [N, Cin, H, W] float32. Returns [N, out_channels, H, W]."""
    N, Cin, H, W = x_nchw.shape
    Cin_p, Cout_p = params["wadj"].shape

    # NCHW -> NHWC, spatial pad 1, channel pad to lane multiple.
    x_nhwc = jnp.transpose(x_nchw, (0, 2, 3, 1))
    xpad = jnp.pad(x_nhwc, ((0, 0), (1, 1), (1, 1), (0, Cin_p - Cin)))

    flops = 2 * N * H * W * Cout_p * (9 * Cin_p + 9 * Cout_p + Cin_p)
    bytes_accessed = 4 * (xpad.size + N * H * W * Cout_p
                          + params["w1"].size + params["w2"].size
                          + params["wadj"].size + 6 * Cout_p)

    vec_spec = pl.BlockSpec((1, Cout_p), lambda n: (0, 0))

    out_padded = pl.pallas_call(
        residual_block_kernel,
        out_shape=jax.ShapeDtypeStruct((N, H, W, Cout_p), jnp.float32),
        grid_spec=pltpu.PrefetchScalarGridSpec(
            num_scalar_prefetch=0,
            grid=(N,),
            in_specs=[
                pl.BlockSpec((None, H + 2, W + 2, Cin_p),
                             lambda n: (n, 0, 0, 0)),
                pl.BlockSpec((9 * Cin_p, Cout_p), lambda n: (0, 0)),
                pl.BlockSpec((Cin_p, Cout_p), lambda n: (0, 0)),
                pl.BlockSpec((9 * Cout_p, Cout_p), lambda n: (0, 0)),
                vec_spec, vec_spec, vec_spec, vec_spec, vec_spec, vec_spec,
            ],
            out_specs=pl.BlockSpec((None, H, W, Cout_p),
                                   lambda n: (n, 0, 0, 0)),
            scratch_shapes=[pltpu.VMEM((H + 2, W + 2, Cout_p), jnp.float32)],
        ),
        compiler_params=pltpu.CompilerParams(
            dimension_semantics=("parallel",),
            vmem_limit_bytes=32 * 1024 * 1024),
        cost_estimate=pl.CostEstimate(
            flops=flops, transcendentals=0, bytes_accessed=bytes_accessed),
    )(xpad,
      params["w1"], params["wadj"], params["w2"],
      params["s1"], params["b1"], params["sa"], params["ba"],
      params["s2"], params["b2"])

    out_nhwc = out_padded[..., :out_channels]
    return jnp.transpose(out_nhwc, (0, 3, 1, 2))


def fold_bn(gamma, beta, mean, var, conv_bias, eps=1e-5):
    """Fold conv bias + eval-mode BatchNorm into per-channel scale/shift."""
    scale = gamma / jnp.sqrt(var + eps)
    shift = beta + (conv_bias - mean) * scale
    return scale, shift


def make_params(key, in_channels, out_channels):
    """Deterministic synthetic parameters (shapes follow the nn.Module)."""
    ks = jax.random.split(key, 12)
    f32 = jnp.float32
    cin_p = _round_up(in_channels, LANE)
    cout_p = _round_up(out_channels, LANE)

    # conv weights in PyTorch layout [Cout, Cin, kH, kW]
    w1_t = jax.random.normal(ks[0], (out_channels, in_channels, 3, 3), f32) * 0.1
    w2_t = jax.random.normal(ks[1], (out_channels, out_channels, 3, 3), f32) * 0.1
    wadj_t = jax.random.normal(ks[2], (out_channels, in_channels, 1, 1), f32) * 0.1
    b1 = jax.random.normal(ks[3], (out_channels,), f32) * 0.05
    b2 = jax.random.normal(ks[4], (out_channels,), f32) * 0.05
    badj = jax.random.normal(ks[5], (out_channels,), f32) * 0.05

    # BatchNorm params / running stats (eval mode)
    g1 = 1.0 + 0.1 * jax.random.normal(ks[6], (out_channels,), f32)
    g2 = 1.0 + 0.1 * jax.random.normal(ks[7], (out_channels,), f32)
    ga = 1.0 + 0.1 * jax.random.normal(ks[8], (out_channels,), f32)
    be1 = 0.1 * jax.random.normal(ks[9], (out_channels,), f32)
    be2 = 0.1 * jax.random.normal(ks[10], (out_channels,), f32)
    bea = 0.1 * jax.random.normal(ks[11], (out_channels,), f32)
    zeros = jnp.zeros((out_channels,), f32)
    ones = jnp.ones((out_channels,), f32)

    s1, sh1 = fold_bn(g1, be1, zeros, ones, b1)
    s2, sh2 = fold_bn(g2, be2, zeros, ones, b2)
    sa, sha = fold_bn(ga, bea, zeros, ones, badj)

    def pack3x3(w_oihw, ci_p, co_p):
        co, ci = w_oihw.shape[0], w_oihw.shape[1]
        w = jnp.transpose(w_oihw, (2, 3, 1, 0))                    # (3,3,ci,co)
        w = jnp.pad(w, ((0, 0), (0, 0), (0, ci_p - ci), (0, co_p - co)))
        return w.reshape(9 * ci_p, co_p)                           # taps fused on K

    def pack1x1(w_oihw, ci_p, co_p):
        co, ci = w_oihw.shape[0], w_oihw.shape[1]
        w = jnp.transpose(w_oihw[:, :, 0, 0], (1, 0))              # (ci, co)
        return jnp.pad(w, ((0, ci_p - ci), (0, co_p - co)))

    def pack_vec(v, co_p):
        return jnp.pad(v, (0, co_p - v.shape[0])).reshape(1, co_p)

    params = {
        "w1": pack3x3(w1_t, cin_p, cout_p),
        "w2": pack3x3(w2_t, cout_p, cout_p),
        "wadj": pack1x1(wadj_t, cin_p, cout_p),
        "s1": pack_vec(s1, cout_p), "b1": pack_vec(sh1, cout_p),
        "s2": pack_vec(s2, cout_p), "b2": pack_vec(sh2, cout_p),
        "sa": pack_vec(sa, cout_p), "ba": pack_vec(sha, cout_p),
    }
    # keep raw torch-layout weights around for the pure-JAX reference check
    ref = {"w1_t": w1_t, "w2_t": w2_t, "wadj_t": wadj_t,
           "s1": s1, "b1": sh1, "s2": s2, "b2": sh2, "sa": sa, "ba": sha}
    return params, ref


def reference_forward(x_nchw, ref):
    """Pure-JAX reference (lax.conv) for correctness checking."""
    def conv(x, w_oihw, pad):
        return lax.conv_general_dilated(
            x, w_oihw, window_strides=(1, 1),
            padding=[(pad, pad), (pad, pad)],
            dimension_numbers=("NCHW", "OIHW", "NCHW"))

    def affine(y, s, b):
        return y * s.reshape(1, -1, 1, 1) + b.reshape(1, -1, 1, 1)

    identity = affine(conv(x_nchw, ref["wadj_t"], 0), ref["sa"], ref["ba"])
    out = jnp.maximum(affine(conv(x_nchw, ref["w1_t"], 1),
                             ref["s1"], ref["b1"]), 0.0)
    out = affine(conv(out, ref["w2_t"], 1), ref["s2"], ref["b2"])
    return jnp.maximum(out + identity, 0.0)


if __name__ == "__main__":
    # in_channels != out_channels -> the 1x1 adjust path is active
    N, Cin, Cout, H, W = 2, 4, 8, 16, 16

    key = jax.random.PRNGKey(0)
    kx, kp = jax.random.split(key)
    x = jax.random.normal(kx, (N, Cin, H, W), jnp.float32)
    params, ref = make_params(kp, Cin, Cout)

    out = residual_block_forward(x, params, out_channels=Cout)
    out = jax.block_until_ready(out)

    expected = reference_forward(x, ref)
    assert out.shape == (N, Cout, H, W)
    assert jnp.allclose(out, expected, rtol=5e-4, atol=5e-4), (
        float(jnp.max(jnp.abs(out - expected))))

    print("KERNEL_OK")
</pallas_src>

<mosaic_0001>
module attributes {stable_mosaic.version = 11 : i64} {
  func.func @residual_block_kernel(%arg0: i32, %arg1: memref<1x18x18x128xf32, #tpu.memory_space<vmem>>, %arg2: memref<1152x128xf32, #tpu.memory_space<vmem>>, %arg3: memref<128x128xf32, #tpu.memory_space<vmem>>, %arg4: memref<1152x128xf32, #tpu.memory_space<vmem>>, %arg5: memref<1x128xf32, #tpu.memory_space<vmem>>, %arg6: memref<1x128xf32, #tpu.memory_space<vmem>>, %arg7: memref<1x128xf32, #tpu.memory_space<vmem>>, %arg8: memref<1x128xf32, #tpu.memory_space<vmem>>, %arg9: memref<1x128xf32, #tpu.memory_space<vmem>>, %arg10: memref<1x128xf32, #tpu.memory_space<vmem>>, %arg11: memref<1x16x16x128xf32, #tpu.memory_space<vmem>>, %arg12: memref<18x18x128xf32, #tpu.memory_space<vmem>>) attributes {dimension_semantics = [#tpu.dimension_semantics<parallel>], iteration_bounds = array<i64: 2>, scalar_prefetch = 0 : i64, scratch_operands = 1 : i64, tpu.core_type = #tpu.core_type<tc>, window_params = [{transform_indices = @transform_0, window_bounds = array<i64: 1, 18, 18, 128>}, {pipeline_mode = #tpu.pipeline_mode<synchronous>, transform_indices = @transform_1, window_bounds = array<i64: 1152, 128>}, {pipeline_mode = #tpu.pipeline_mode<synchronous>, transform_indices = @transform_2, window_bounds = array<i64: 128, 128>}, {pipeline_mode = #tpu.pipeline_mode<synchronous>, transform_indices = @transform_3, window_bounds = array<i64: 1152, 128>}, {pipeline_mode = #tpu.pipeline_mode<synchronous>, transform_indices = @transform_4, window_bounds = array<i64: 1, 128>}, {pipeline_mode = #tpu.pipeline_mode<synchronous>, transform_indices = @transform_5, window_bounds = array<i64: 1, 128>}, {pipeline_mode = #tpu.pipeline_mode<synchronous>, transform_indices = @transform_6, window_bounds = array<i64: 1, 128>}, {pipeline_mode = #tpu.pipeline_mode<synchronous>, transform_indices = @transform_7, window_bounds = array<i64: 1, 128>}, {pipeline_mode = #tpu.pipeline_mode<synchronous>, transform_indices = @transform_8, window_bounds = array<i64: 1, 128>}, {pipeline_mode = #tpu.pipeline_mode<synchronous>, transform_indices = @transform_9, window_bounds = array<i64: 1, 128>}, {transform_indices = @transform_10, window_bounds = array<i64: 1, 16, 16, 128>}]} {
    %c0 = arith.constant 0 : index
    %c0_0 = arith.constant 0 : index
    %c0_1 = arith.constant 0 : index
    %c0_2 = arith.constant 0 : index
    %0 = vector.load %arg1[%c0, %c0_0, %c0_1, %c0_2] : memref<1x18x18x128xf32, #tpu.memory_space<vmem>>, vector<1x18x18x128xf32>
    %1 = vector.shape_cast %0 : vector<1x18x18x128xf32> to vector<18x18x128xf32>
    %2 = vector.extract_strided_slice %1 {offsets = [0, 0, 0], sizes = [16, 16, 128], strides = [1, 1, 1]} : vector<18x18x128xf32> to vector<16x16x128xf32>
    %3 = vector.extract_strided_slice %1 {offsets = [0, 1, 0], sizes = [16, 16, 128], strides = [1, 1, 1]} : vector<18x18x128xf32> to vector<16x16x128xf32>
    %4 = vector.extract_strided_slice %1 {offsets = [0, 2, 0], sizes = [16, 16, 128], strides = [1, 1, 1]} : vector<18x18x128xf32> to vector<16x16x128xf32>
    %5 = vector.extract_strided_slice %1 {offsets = [1, 0, 0], sizes = [16, 16, 128], strides = [1, 1, 1]} : vector<18x18x128xf32> to vector<16x16x128xf32>
    %6 = vector.extract_strided_slice %1 {offsets = [1, 1, 0], sizes = [16, 16, 128], strides = [1, 1, 1]} : vector<18x18x128xf32> to vector<16x16x128xf32>
    %7 = vector.extract_strided_slice %1 {offsets = [1, 2, 0], sizes = [16, 16, 128], strides = [1, 1, 1]} : vector<18x18x128xf32> to vector<16x16x128xf32>
    %8 = vector.extract_strided_slice %1 {offsets = [2, 0, 0], sizes = [16, 16, 128], strides = [1, 1, 1]} : vector<18x18x128xf32> to vector<16x16x128xf32>
    %9 = vector.extract_strided_slice %1 {offsets = [2, 1, 0], sizes = [16, 16, 128], strides = [1, 1, 1]} : vector<18x18x128xf32> to vector<16x16x128xf32>
    %10 = vector.extract_strided_slice %1 {offsets = [2, 2, 0], sizes = [16, 16, 128], strides = [1, 1, 1]} : vector<18x18x128xf32> to vector<16x16x128xf32>
    %11 = tpu.concatenate %2, %3, %4, %5, %6, %7, %8, %9, %10 in 2 : vector<16x16x128xf32>, vector<16x16x128xf32>, vector<16x16x128xf32>, vector<16x16x128xf32>, vector<16x16x128xf32>, vector<16x16x128xf32>, vector<16x16x128xf32>, vector<16x16x128xf32>, vector<16x16x128xf32> -> vector<16x16x1152xf32>
    %12 = vector.shape_cast %11 : vector<16x16x1152xf32> to vector<256x1152xf32>
    %c0_3 = arith.constant 0 : index
    %c0_4 = arith.constant 0 : index
    %13 = vector.load %arg2[%c0_3, %c0_4] : memref<1152x128xf32, #tpu.memory_space<vmem>>, vector<1152x128xf32>
    %cst = arith.constant dense<0.000000e+00> : vector<256x128xf32>
    %14 = tpu.matmul %12, %13, %cst {dimension_numbers = #tpu.dot_dimension_numbers<[1], [0], [0], [1], [0, 0, 1, 1], [], []>} : vector<256x1152xf32>, vector<1152x128xf32>, vector<256x128xf32> -> vector<256x128xf32>
    %c0_5 = arith.constant 0 : index
    %c0_6 = arith.constant 0 : index
    %15 = vector.load %arg5[%c0_5, %c0_6] : memref<1x128xf32, #tpu.memory_space<vmem>>, vector<1x128xf32>
    %16 = vector.broadcast %15 : vector<1x128xf32> to vector<256x128xf32>
    %17 = arith.mulf %14, %16 : vector<256x128xf32>
    %c0_7 = arith.constant 0 : index
    %c0_8 = arith.constant 0 : index
    %18 = vector.load %arg6[%c0_7, %c0_8] : memref<1x128xf32, #tpu.memory_space<vmem>>, vector<1x128xf32>
    %19 = vector.broadcast %18 : vector<1x128xf32> to vector<256x128xf32>
    %20 = arith.addf %17, %19 : vector<256x128xf32>
    %cst_9 = arith.constant 0.000000e+00 : f32
    %21 = vector.broadcast %cst_9 : f32 to vector<256x128xf32>
    %22 = arith.maximumf %20, %21 : vector<256x128xf32>
    %23 = vector.extract_strided_slice %12 {offsets = [0, 512], sizes = [256, 128], strides = [1, 1]} : vector<256x1152xf32> to vector<256x128xf32>
    %c0_10 = arith.constant 0 : index
    %c0_11 = arith.constant 0 : index
    %24 = vector.load %arg3[%c0_10, %c0_11] : memref<128x128xf32, #tpu.memory_space<vmem>>, vector<128x128xf32>
    %cst_12 = arith.constant dense<0.000000e+00> : vector<256x128xf32>
    %25 = tpu.matmul %23, %24, %cst_12 {dimension_numbers = #tpu.dot_dimension_numbers<[1], [0], [0], [1], [0, 0, 1, 1], [], []>} : vector<256x128xf32>, vector<128x128xf32>, vector<256x128xf32> -> vector<256x128xf32>
    %c0_13 = arith.constant 0 : index
    %c0_14 = arith.constant 0 : index
    %26 = vector.load %arg7[%c0_13, %c0_14] : memref<1x128xf32, #tpu.memory_space<vmem>>, vector<1x128xf32>
    %27 = vector.broadcast %26 : vector<1x128xf32> to vector<256x128xf32>
    %28 = arith.mulf %25, %27 : vector<256x128xf32>
    %c0_15 = arith.constant 0 : index
    %c0_16 = arith.constant 0 : index
    %29 = vector.load %arg8[%c0_15, %c0_16] : memref<1x128xf32, #tpu.memory_space<vmem>>, vector<1x128xf32>
    %30 = vector.broadcast %29 : vector<1x128xf32> to vector<256x128xf32>
    %31 = arith.addf %28, %30 : vector<256x128xf32>
    %cst_17 = arith.constant 0.000000e+00 : f32
    %32 = vector.broadcast %cst_17 : f32 to vector<1x18x128xf32>
    %c0_18 = arith.constant 0 : index
    %c0_19 = arith.constant 0 : index
    %c0_20 = arith.constant 0 : index
    %33 = vector.load %arg12[%c0_18, %c0_19, %c0_20] : memref<18x18x128xf32, #tpu.memory_space<vmem>>, vector<1x18x128xf32>
    tpu.vector_store %arg12[%c0_18, %c0_19, %c0_20], %32 {strides = array<i32>} : memref<18x18x128xf32, #tpu.memory_space<vmem>>, vector<1x18x128xf32>,
    %cst_21 = arith.constant 0.000000e+00 : f32
    %34 = vector.broadcast %cst_21 : f32 to vector<1x18x128xf32>
    %c17 = arith.constant 17 : index
    %c0_22 = arith.constant 0 : index
    %c0_23 = arith.constant 0 : index
    %35 = vector.load %arg12[%c17, %c0_22, %c0_23] : memref<18x18x128xf32, #tpu.memory_space<vmem>>, vector<1x18x128xf32>
    tpu.vector_store %arg12[%c17, %c0_22, %c0_23], %34 {strides = array<i32>} : memref<18x18x128xf32, #tpu.memory_space<vmem>>, vector<1x18x128xf32>,
    %cst_24 = arith.constant 0.000000e+00 : f32
    %36 = vector.broadcast %cst_24 : f32 to vector<18x1x128xf32>
    %c0_25 = arith.constant 0 : index
    %c0_26 = arith.constant 0 : index
    %c0_27 = arith.constant 0 : index
    %37 = vector.load %arg12[%c0_25, %c0_26, %c0_27] : memref<18x18x128xf32, #tpu.memory_space<vmem>>, vector<18x1x128xf32>
    tpu.vector_store %arg12[%c0_25, %c0_26, %c0_27], %36 {strides = array<i32>} : memref<18x18x128xf32, #tpu.memory_space<vmem>>, vector<18x1x128xf32>,
    %cst_28 = arith.constant 0.000000e+00 : f32
    %38 = vector.broadcast %cst_28 : f32 to vector<18x1x128xf32>
    %c0_29 = arith.constant 0 : index
    %c17_30 = arith.constant 17 : index
    %c0_31 = arith.constant 0 : index
    %39 = vector.load %arg12[%c0_29, %c17_30, %c0_31] : memref<18x18x128xf32, #tpu.memory_space<vmem>>, vector<18x1x128xf32>
    tpu.vector_store %arg12[%c0_29, %c17_30, %c0_31], %38 {strides = array<i32>} : memref<18x18x128xf32, #tpu.memory_space<vmem>>, vector<18x1x128xf32>,
    %40 = vector.shape_cast %22 : vector<256x128xf32> to vector<16x16x128xf32>
    %c1 = arith.constant 1 : index
    %c1_32 = arith.constant 1 : index
    %c0_33 = arith.constant 0 : index
    %41 = vector.load %arg12[%c1, %c1_32, %c0_33] : memref<18x18x128xf32, #tpu.memory_space<vmem>>, vector<16x16x128xf32>
    tpu.vector_store %arg12[%c1, %c1_32, %c0_33], %40 {strides = array<i32>} : memref<18x18x128xf32, #tpu.memory_space<vmem>>, vector<16x16x128xf32>,
    %c0_34 = arith.constant 0 : index
    %c0_35 = arith.constant 0 : index
    %c0_36 = arith.constant 0 : index
    %42 = vector.load %arg12[%c0_34, %c0_35, %c0_36] : memref<18x18x128xf32, #tpu.memory_space<vmem>>, vector<18x18x128xf32>
    %43 = vector.extract_strided_slice %42 {offsets = [0, 0, 0], sizes = [16, 16, 128], strides = [1, 1, 1]} : vector<18x18x128xf32> to vector<16x16x128xf32>
    %44 = vector.extract_strided_slice %42 {offsets = [0, 1, 0], sizes = [16, 16, 128], strides = [1, 1, 1]} : vector<18x18x128xf32> to vector<16x16x128xf32>
    %45 = vector.extract_strided_slice %42 {offsets = [0, 2, 0], sizes = [16, 16, 128], strides = [1, 1, 1]} : vector<18x18x128xf32> to vector<16x16x128xf32>
    %46 = vector.extract_strided_slice %42 {offsets = [1, 0, 0], sizes = [16, 16, 128], strides = [1, 1, 1]} : vector<18x18x128xf32> to vector<16x16x128xf32>
    %47 = vector.extract_strided_slice %42 {offsets = [1, 1, 0], sizes = [16, 16, 128], strides = [1, 1, 1]} : vector<18x18x128xf32> to vector<16x16x128xf32>
    %48 = vector.extract_strided_slice %42 {offsets = [1, 2, 0], sizes = [16, 16, 128], strides = [1, 1, 1]} : vector<18x18x128xf32> to vector<16x16x128xf32>
    %49 = vector.extract_strided_slice %42 {offsets = [2, 0, 0], sizes = [16, 16, 128], strides = [1, 1, 1]} : vector<18x18x128xf32> to vector<16x16x128xf32>
    %50 = vector.extract_strided_slice %42 {offsets = [2, 1, 0], sizes = [16, 16, 128], strides = [1, 1, 1]} : vector<18x18x128xf32> to vector<16x16x128xf32>
    %51 = vector.extract_strided_slice %42 {offsets = [2, 2, 0], sizes = [16, 16, 128], strides = [1, 1, 1]} : vector<18x18x128xf32> to vector<16x16x128xf32>
    %52 = tpu.concatenate %43, %44, %45, %46, %47, %48, %49, %50, %51 in 2 : vector<16x16x128xf32>, vector<16x16x128xf32>, vector<16x16x128xf32>, vector<16x16x128xf32>, vector<16x16x128xf32>, vector<16x16x128xf32>, vector<16x16x128xf32>, vector<16x16x128xf32>, vector<16x16x128xf32> -> vector<16x16x1152xf32>
    %53 = vector.shape_cast %52 : vector<16x16x1152xf32> to vector<256x1152xf32>
    %c0_37 = arith.constant 0 : index
    %c0_38 = arith.constant 0 : index
    %54 = vector.load %arg4[%c0_37, %c0_38] : memref<1152x128xf32, #tpu.memory_space<vmem>>, vector<1152x128xf32>
    %cst_39 = arith.constant dense<0.000000e+00> : vector<256x128xf32>
    %55 = tpu.matmul %53, %54, %cst_39 {dimension_numbers = #tpu.dot_dimension_numbers<[1], [0], [0], [1], [0, 0, 1, 1], [], []>} : vector<256x1152xf32>, vector<1152x128xf32>, vector<256x128xf32> -> vector<256x128xf32>
    %c0_40 = arith.constant 0 : index
    %c0_41 = arith.constant 0 : index
    %56 = vector.load %arg9[%c0_40, %c0_41] : memref<1x128xf32, #tpu.memory_space<vmem>>, vector<1x128xf32>
    %57 = vector.broadcast %56 : vector<1x128xf32> to vector<256x128xf32>
    %58 = arith.mulf %55, %57 : vector<256x128xf32>
    %c0_42 = arith.constant 0 : index
    %c0_43 = arith.constant 0 : index
    %59 = vector.load %arg10[%c0_42, %c0_43] : memref<1x128xf32, #tpu.memory_space<vmem>>, vector<1x128xf32>
    %60 = vector.broadcast %59 : vector<1x128xf32> to vector<256x128xf32>
    %61 = arith.addf %58, %60 : vector<256x128xf32>
    %62 = arith.addf %61, %31 : vector<256x128xf32>
    %cst_44 = arith.constant 0.000000e+00 : f32
    %63 = vector.broadcast %cst_44 : f32 to vector<256x128xf32>
    %64 = arith.maximumf %62, %63 : vector<256x128xf32>
    %65 = vector.shape_cast %64 : vector<256x128xf32> to vector<16x16x128xf32>
    %c0_45 = arith.constant 0 : index
    %c0_46 = arith.constant 0 : index
    %c0_47 = arith.constant 0 : index
    %c0_48 = arith.constant 0 : index
    %66 = vector.load %arg11[%c0_45, %c0_46, %c0_47, %c0_48] : memref<1x16x16x128xf32, #tpu.memory_space<vmem>>, vector<1x16x16x128xf32>
    %67 = vector.shape_cast %66 : vector<1x16x16x128xf32> to vector<16x16x128xf32>
    %68 = vector.shape_cast %65 : vector<16x16x128xf32> to vector<1x16x16x128xf32>
    tpu.vector_store %arg11[%c0_45, %c0_46, %c0_47, %c0_48], %68 {strides = array<i32>} : memref<1x16x16x128xf32, #tpu.memory_space<vmem>>, vector<1x16x16x128xf32>,
    return
  }
  func.func @transform_0(%arg0: i32) -> (i32, i32, i32, i32) {
    %c0_i32 = arith.constant 0 : i32
    %c0_i32_0 = arith.constant 0 : i32
    %c0_i32_1 = arith.constant 0 : i32
    %c0_i32_2 = arith.constant 0 : i32
    return %arg0, %c0_i32, %c0_i32_0, %c0_i32_1 : i32, i32, i32, i32
  }
  func.func @transform_1(%arg0: i32) -> (i32, i32) {
    %c0_i32 = arith.constant 0 : i32
    %c0_i32_0 = arith.constant 0 : i32
    %c0_i32_1 = arith.constant 0 : i32
    return %c0_i32, %c0_i32_0 : i32, i32
  }
  func.func @transform_2(%arg0: i32) -> (i32, i32) {
    %c0_i32 = arith.constant 0 : i32
    %c0_i32_0 = arith.constant 0 : i32
    %c0_i32_1 = arith.constant 0 : i32
    return %c0_i32, %c0_i32_0 : i32, i32
  }
  func.func @transform_3(%arg0: i32) -> (i32, i32) {
    %c0_i32 = arith.constant 0 : i32
    %c0_i32_0 = arith.constant 0 : i32
    %c0_i32_1 = arith.constant 0 : i32
    return %c0_i32, %c0_i32_0 : i32, i32
  }
  func.func @transform_4(%arg0: i32) -> (i32, i32) {
    %c0_i32 = arith.constant 0 : i32
    %c0_i32_0 = arith.constant 0 : i32
    %c0_i32_1 = arith.constant 0 : i32
    return %c0_i32, %c0_i32_0 : i32, i32
  }
  func.func @transform_5(%arg0: i32) -> (i32, i32) {
    %c0_i32 = arith.constant 0 : i32
    %c0_i32_0 = arith.constant 0 : i32
    %c0_i32_1 = arith.constant 0 : i32
    return %c0_i32, %c0_i32_0 : i32, i32
  }
  func.func @transform_6(%arg0: i32) -> (i32, i32) {
    %c0_i32 = arith.constant 0 : i32
    %c0_i32_0 = arith.constant 0 : i32
    %c0_i32_1 = arith.constant 0 : i32
    return %c0_i32, %c0_i32_0 : i32, i32
  }
  func.func @transform_7(%arg0: i32) -> (i32, i32) {
    %c0_i32 = arith.constant 0 : i32
    %c0_i32_0 = arith.constant 0 : i32
    %c0_i32_1 = arith.constant 0 : i32
    return %c0_i32, %c0_i32_0 : i32, i32
  }
  func.func @transform_8(%arg0: i32) -> (i32, i32) {
    %c0_i32 = arith.constant 0 : i32
    %c0_i32_0 = arith.constant 0 : i32
    %c0_i32_1 = arith.constant 0 : i32
    return %c0_i32, %c0_i32_0 : i32, i32
  }
  func.func @transform_9(%arg0: i32) -> (i32, i32) {
    %c0_i32 = arith.constant 0 : i32
    %c0_i32_0 = arith.constant 0 : i32
    %c0_i32_1 = arith.constant 0 : i32
    return %c0_i32, %c0_i32_0 : i32, i32
  }
  func.func @transform_10(%arg0: i32) -> (i32, i32, i32, i32) {
    %c0_i32 = arith.constant 0 : i32
    %c0_i32_0 = arith.constant 0 : i32
    %c0_i32_1 = arith.constant 0 : i32
    %c0_i32_2 = arith.constant 0 : i32
    return %arg0, %c0_i32, %c0_i32_0, %c0_i32_1 : i32, i32, i32, i32
  }
}

</mosaic_0001>

<bundles_post_ra>
// kernel: residual_block_forward.1
= control target key start
LH: loop header
LB: loop body
LE: loop exit
PB: predicated region body
PF: predicated region fallthrough
CT: control target
= control target key end

     0   :  { %15 = vsyncpa [#allocation4], 0  ;;  %s5832_s13 = smov 0   ;;  %s8475_s0 = inlined_call_operand.vmem [shape: f32[2,18,18,128], index: 0, kind: input, shape index: {}]   ;;  %s8476_s1 = inlined_call_operand.vmem [shape: f32[1152,128], index: 1, kind: input, shape index: {}]   ;;  %s8477_s2 = inlined_call_operand.vmem [shape: f32[128,128], index: 2, kind: input, shape index: {}]   ;;  %s8478_s3 = inlined_call_operand.hbm [shape: f32[1152,128], index: 3, kind: input, shape index: {}]   ;;  %s8479_s4 = inlined_call_operand.vmem [shape: f32[1,128], index: 4, kind: input, shape index: {}]   ;;  %s8480_s5 = inlined_call_operand.vmem [shape: f32[1,128], index: 5, kind: input, shape index: {}]   ;;  %s8481_s6 = inlined_call_operand.vmem [shape: f32[1,128], index: 6, kind: input, shape index: {}]   ;;  %s8482_s7 = inlined_call_operand.vmem [shape: f32[1,128], index: 7, kind: input, shape index: {}]   ;;  %s8483_s8 = inlined_call_operand.vmem [shape: f32[1,128], index: 8, kind: input, shape index: {}]   ;;  %s8484_s9 = inlined_call_operand.vmem [shape: f32[1,128], index: 9, kind: input, shape index: {}]   ;;  %s8485_s10 = inlined_call_operand.vmem [shape: f32[2,16,16,128], index: 10, kind: output, shape index: {}]  }
   0x1 LB: > { %s5838_s14 = sadd.s32 4294967295, %s5770_s13   ;;  %p4383_p0 = scmp.ge.s32.totalorder %s5770_s13, 1  ;;  %s5770_s13 = sphi %s5832_s13, %s21_s13  }
   0x2   : > { %p267_p1 = scmp.lt.s32.totalorder %s5770_s13, 3  ;;  %s5772_s15 = smov [#allocation3]  }
   0x3   : > { %s285_s16 = sshll.u32 %s5772_s15, 4  ;;  %p8486_p3 = scmp.eq.s32.totalorder %s5838_s14, 0  ;;  %s286_s16 = int_to_ptr.vmem [resolvable:$true] %s285_s16 }
   0x4   : > { %p5842_p2 = pnand %p4383_p0, %p267_p1  ;;  %s5732_s21 = scalar_lea.hbm %s8478_s3, 18432 }
   0x5   : > { %p5733_p6 = scmp.ne.s32.totalorder %s8478_s3, %s5732_s21  ;;  %p5739_p10 = scmp.lt.u32.totalorder %s5732_s21, %s8478_s3 }
   0x6   : > { %s8615_s17 = scalar_select %p5842_p2, 1, 0 }
   0x7   : > { %p5653_p4 = pneg %p5842_p2 }
   0x9   : > { %p5851_p5 = pnand %p8486_p3, %p5653_p4 }
   0xb   : > { %p5734_p7 = pneg %p5851_p5 }
   0xd   : > { %p5735_p8 = pnand %p5734_p7, %p5733_p6 }
   0xf   : > { %p5736_p9 = pneg %p5735_p8 }
  0x11   : > { %p5741_p11 = pnand %p5739_p10, %p5736_p9 }
  0x13   : > { %5744 = shalt.err (!%p5741_p11)
}
  0x14   : > { %s5745_s26 = scalar_lea.vmem %s286_s16, 18432  ;;  %p5753_p1 = scmp.lt.s32.totalorder %s286_s16, %s286_s16 }
  0x15   : > { %p5746_p12 = scmp.ne.s32.totalorder %s286_s16, %s5745_s26  ;;  %p5754_p4 = scmp.lt.s32.totalorder %s5745_s26, %s5745_s26 }
  0x17   : > { %p5748_p13 = pnand %p5746_p12, %p5734_p7  ;;  %p5755_p3 = por %p5754_p4, %p5753_p1 }
  0x19   : > { %p5749_p0 = pneg %p5748_p13 }
  0x1b   : > { %p5756_p2 = pnand %p5755_p3, %p5749_p0 }
  0x1d   : > { %5759 = shalt.err (!%p5756_p2)
}
  0x1e   : > { %s5773_s27 = smov 128   ;;  %s5774_s28 = smov 8  }
  0x1f   : > { %5656 = dma.hbm_to_vmem [thread:$0]  (!%p5851_p5), %s8478_s3, 18432, %s286_s16, [#allocation4], %s5773_s27, %s5773_s27, %s5774_s28  }
  0x20   : > { %p8617_p6 = scmp.ne.s32.totalorder %s8615_s17, 0 }
  0x22   : > { %327 = sbr.rel (%p8617_p6) target bundleno = 1453 (0x5ad), region = 60 }
  0x29   : > { %p8618_p8 = scmp.eq.s32.totalorder %s5838_s14, 0 }
  0x2b   : > { %5765 = dma.done.wait (%p8618_p8), [#allocation4], 18432   ;;  %p8619_p7 = pmov %p8618_p8 }
  0x2c   : > { %v8489_v0 = vmov 0.0|0.0   ;;  %p365_p2 = scmp.lt.s32.totalorder %s5838_s14, 1  ;;  %v737_v1 = vld [vmem:[%s8476_s1] sm:$0xff]  ;;  %v738_v2 = vld [vmem:[%s8476_s1 + $0x8] sm:$0xff]  ;;  %v739_v3 = vld [vmem:[%s8476_s1 + $0x10] sm:$0xff]  ;;  %vm477_vm0 = vcmask 1046528  }
  0x2d   : > { %5767 = vsyncadd (%p8619_p7), [#allocation4], 4294948864  ;;  %4784 = vmatprep.subr.bf16.mxu0 %v8489_v0  ;;  %v4785_v4 = vpack.c.bf16 %v738_v2, %v737_v1  ;;  %v740_v5 = vld [vmem:[%s8476_s1 + $0x18] sm:$0xff]  ;;  %v741_v7 = vld [vmem:[%s8476_s1 + $0x20] sm:$0xff]  ;;  %vm590_vm1 = vcmask 1045504  }
  0x2e   : > { %s8859_s14 = smov (!%p365_p2, %s5838_s14), 1  ;;  %v4788_v6 = vpack.c.bf16 %v740_v5, %v739_v3  ;;  %v742_v8 = vld [vmem:[%s8476_s1 + $0x28] sm:$0xff]  ;;  %v743_v10 = vld [vmem:[%s8476_s1 + $0x30] sm:$0xff]  ;;  %v744_v11 = vld [vmem:[%s8476_s1 + $0x38] sm:$0xff] }
  0x2f   : > { %4786 = vmatpush1.bf16.msra.mxu0 %v4785_v4  ;;  %s5648_s21 = smul.u32 432, %s8859_s14  ;;  %v4791_v9 = vpack.c.bf16 %v742_v8, %v741_v7  ;;  %v4794_v13 = vpack.c.bf16 %v744_v11, %v743_v10  ;;  %v745_v16 = vld [vmem:[%s8476_s1 + $0x40] sm:$0xff]  ;;  %v746_v17 = vld [vmem:[%s8476_s1 + $0x48] sm:$0xff]  ;;  %v747_v21 = vld [vmem:[%s8476_s1 + $0x50] sm:$0xff]  ;;  %s4399_s12 = sshll.u32 %s8859_s14, 8 }
  0x30   : > { %4787 = vmatprep.subr.bf16.mxu0 %v8489_v0  ;;  %v4797_v20 = vpack.c.bf16 %v746_v17, %v745_v16  ;;  %v748_v22 = vld [vmem:[%s8476_s1 + $0x58] sm:$0xff]  ;;  %v749_v24 = vld [vmem:[%s8476_s1 + $0x60] sm:$0xff]  ;;  %v750_v25 = vld [vmem:[%s8476_s1 + $0x68] sm:$0xff]  ;;  %s8289_s17 = scalar_lea.vmem %s8485_s10, %s4399_s12 }
  0x31   : > { %s5905_s28 = scalar_lea.vmem %s8475_s0, %s5648_s21  ;;  %v4800_v23 = vpack.c.bf16 %v748_v22, %v747_v21  ;;  %v4803_v26 = vpack.c.bf16 %v750_v25, %v749_v24  ;;  %v751_v27 = vld [vmem:[%s8476_s1 + $0x70] sm:$0xff]  ;;  %v752_v28 = vld [vmem:[%s8476_s1 + $0x78] sm:$0xff]  ;;  %v753_v30 = vld [vmem:[%s8476_s1 + $0x80] sm:$0xff] }
  0x32   : > { %v5915_v12 = vld [vmem:[%s5905_s28] sm:$0xff]  ;;  %v5918_v14 = vld [vmem:[%s5905_s28 + $0x8] sm:$0xff]  ;;  %v4806_v29 = vpack.c.bf16 %v752_v28, %v751_v27  ;;  %v755_v33 = vld [vmem:[%s8476_s1 + $0x90] sm:$0xff] }
  0x33   : > { %4789 = vmatpush1.bf16.msra.mxu0 %v4788_v6  ;;  %v478_v15 = vrot.slane %v5915_v12, 1  ;;  %v479_v18 = vrot.slane %v5918_v14, 1  ;;  %v754_v31 = vld [vmem:[%s8476_s1 + $0x88] sm:$0xff]  ;;  %v756_v34 = vld [vmem:[%s8476_s1 + $0x98] sm:$0xff]  ;;  %v757_v36 = vld [vmem:[%s8476_s1 + $0xa0] sm:$0xff]  ;;  %v591_v55 = vrot.slane %v5915_v12, 2 }
  0x34   : > { %4790 = vmatprep.subr.bf16.mxu0 %v8489_v0  ;;  %v4809_v32 = vpack.c.bf16 %v754_v31, %v753_v30  ;;  %v4812_v35 = vpack.c.bf16 %v756_v34, %v755_v33  ;;  %v758_v37 = vld [vmem:[%s8476_s1 + $0xa8] sm:$0xff]  ;;  %v759_v39 = vld [vmem:[%s8476_s1 + $0xb0] sm:$0xff]  ;;  %v760_v40 = vld [vmem:[%s8476_s1 + $0xb8] sm:$0xff]  ;;  %v592_v56 = vrot.slane %v5918_v14, 2 }
  0x35   : > { %v480_v19 = vsel %vm477_vm0, %v478_v15, %v479_v18  ;;  %v4815_v38 = vpack.c.bf16 %v758_v37, %v757_v36  ;;  %v4818_v41 = vpack.c.bf16 %v760_v40, %v759_v39  ;;  %v761_v42 = vld [vmem:[%s8476_s1 + $0xc0] sm:$0xff]  ;;  %v762_v43 = vld [vmem:[%s8476_s1 + $0xc8] sm:$0xff]  ;;  %v763_v45 = vld [vmem:[%s8476_s1 + $0xd0] sm:$0xff] }
  0x36   : > { %945 = vmatprep.mubr.f32.mxu0 %v480_v19  ;;  %v4821_v44 = vpack.c.bf16 %v762_v43, %v761_v42  ;;  %v764_v46 = vld [vmem:[%s8476_s1 + $0xd8] sm:$0xff]  ;;  %v765_v48 = vld [vmem:[%s8476_s1 + $0xe0] sm:$0xff]  ;;  %v766_v49 = vld [vmem:[%s8476_s1 + $0xe8] sm:$0xff]  ;;  %v6038_v5 = vsel %vm590_vm1, %v591_v55, %v592_v56 }
  0x37   : > { %4792 = vmatpush1.bf16.msra.mxu0 %v4791_v9  ;;  %v4824_v47 = vpack.c.bf16 %v764_v46, %v763_v45  ;;  %v4827_v50 = vpack.c.bf16 %v766_v49, %v765_v48  ;;  %v767_v51 = vld [vmem:[%s8476_s1 + $0xf0] sm:$0xff]  ;;  %v768_v52 = vld [vmem:[%s8476_s1 + $0xf8] sm:$0xff]  ;;  %v769_v57 = vld [vmem:[%s8476_s1 + $0x100] sm:$0xff] }
  0x38   : > { %4793 = vmatprep.subr.bf16.mxu0 %v8489_v0  ;;  %v377_v53 = vld [vmem:[%s5905_s28 + $0x10] sm:$0x3]  ;;  %v4830_v54 = vpack.c.bf16 %v768_v52, %v767_v51  ;;  %v770_v58 = vld [vmem:[%s8476_s1 + $0x108] sm:$0xff]  ;;  %v6020_v60 = vld [vmem:[%s5905_s28 + $0x18] sm:$0xff] }
  0x39   : > { %v481_v59 = vrot.slane %v377_v53, 1  ;;  %v6023_v61 = vld [vmem:[%s5905_s28 + $0x20] sm:$0xff]  ;;  %v4833_v62 = vpack.c.bf16 %v770_v58, %v769_v57  ;;  %v483_v1 = vrot.slane %v6020_v60, 1  ;;  %v771_v3 = vld [vmem:[%s8476_s1 + $0x110] sm:$0xff]  ;;  %v772_v4 = vld [vmem:[%s8476_s1 + $0x118] sm:$0xff]  ;;  %v594_v8 = vrot.slane %v377_v53, 2 }
  0x3a   : > { %v484_v2 = vrot.slane %v6023_v61, 1  ;;  %v6041_v6 = vld [vmem:[%s5905_s28 + $0x28] sm:$0x3]  ;;  %v4836_v7 = vpack.c.bf16 %v772_v4, %v771_v3  ;;  %v773_v11 = vld [vmem:[%s8476_s1 + $0x120] sm:$0xff]  ;;  %v6059_v15 = vld [vmem:[%s5905_s28 + $0x38] sm:$0xff] }
  0x3b   : > { %4795 = vmatpush1.bf16.msra.mxu0 %v4794_v13  ;;  %v482_v63 = vsel %vm477_vm0, %v479_v18, %v481_v59  ;;  %v486_v10 = vrot.slane %v6041_v6, 1  ;;  %v6056_v13 = vld [vmem:[%s5905_s28 + $0x30] sm:$0xff]  ;;  %v6062_v16 = vsel %vm590_vm1, %v592_v56, %v594_v8  ;;  %v6079_v22 = vld [vmem:[%s5905_s28 + $0x40] sm:$0x3]  ;;  %v778_v27 = vld [vmem:[%s8476_s1 + $0x148] sm:$0xff] }
  0x3c   : > { %4796 = vmatprep.subr.bf16.mxu0 %v8489_v0  ;;  %v6045_v9 = vsel %vm477_vm0, %v483_v1, %v484_v2  ;;  %v488_v19 = vrot.slane %v6056_v13, 1  ;;  %v775_v21 = vld [vmem:[%s8476_s1 + $0x130] sm:$0xff]  ;;  %v491_v25 = vrot.slane %v6079_v22, 1  ;;  %v6095_v28 = vld [vmem:[%s5905_s28 + $0x48] sm:$0xff]  ;;  %v601_v31 = vrot.slane %v6056_v13, 2  ;;  %v780_v37 = vld [vmem:[%s8476_s1 + $0x158] sm:$0xff] }
  0x3d   : > { %v6067_v18 = vsel %vm477_vm0, %v484_v2, %v486_v10  ;;  %v493_v34 = vrot.slane %v6095_v28, 1  ;;  %v779_v36 = vld [vmem:[%s8476_s1 + $0x150] sm:$0xff]  ;;  %v781_v43 = vld [vmem:[%s8476_s1 + $0x160] sm:$0xff]  ;;  %v6142_v46 = vld [vmem:[%s5905_s28 + $0x68] sm:$0xff] }
  0x3e   : > { %v4848_v40 = vpack.c.bf16 %v780_v37, %v779_v36  ;;  %v6139_v45 = vld [vmem:[%s5905_s28 + $0x60] sm:$0xff]  ;;  %v783_v51 = vld [vmem:[%s8476_s1 + $0x170] sm:$0xff]  ;;  %v784_v52 = vld [vmem:[%s8476_s1 + $0x178] sm:$0xff] }
  0x3f   : > { %4798 = vmatpush1.bf16.msra.mxu0 %v4797_v20  ;;  %v489_v20 = vrot.slane %v6059_v15, 1  ;;  %v498_v49 = vrot.slane %v6139_v45, 1  ;;  %v6159_v53 = vld [vmem:[%s5905_s28 + $0x70] sm:$0x3]  ;;  %v785_v57 = vld [vmem:[%s8476_s1 + $0x180] sm:$0xff]  ;;  %v786_v58 = vld [vmem:[%s8476_s1 + $0x188] sm:$0xff] }
  0x40   : > { %4799 = vmatprep.subr.bf16.mxu0 %v8489_v0  ;;  %v501_v56 = vrot.slane %v6159_v53, 1  ;;  %v6175_v59 = vld [vmem:[%s5905_s28 + $0x78] sm:$0xff]  ;;  %v787_v4 = vld [vmem:[%s8476_s1 + $0x190] sm:$0xff]  ;;  %v6195_v8 = vld [vmem:[%s5905_s28 + $0x88] sm:$0x3] }
  0x41   : > { %v6084_v24 = vsel %vm477_vm0, %v488_v19, %v489_v20  ;;  %v6105_v33 = vsel %vm477_vm0, %v489_v20, %v491_v25  ;;  %v503_v2 = vrot.slane %v6175_v59, 1  ;;  %v790_v19 = vld [vmem:[%s8476_s1 + $0x1a8] sm:$0xff]  ;;  %v6211_v20 = vld [vmem:[%s5905_s28 + $0x90] sm:$0xff]  ;;  %v793_v37 = vld [vmem:[%s8476_s1 + $0x1c0] sm:$0xff] }
  0x42   : > { %v508_v25 = vrot.slane %v6211_v20, 1 }
  0x43   : > { %4801 = vmatpush1.bf16.msra.mxu0 %v4800_v23 }
  0x44   : > { %4802 = vmatprep.subr.bf16.mxu0 %v8489_v0 }
  0x47   : > { %4804 = vmatpush1.bf16.msra.mxu0 %v4803_v26  ;;  %v777_v26 = vld [vmem:[%s8476_s1 + $0x140] sm:$0xff] }
  0x48   : > { %4805 = vmatprep.subr.bf16.mxu0 %v8489_v0  ;;  %v4845_v30 = vpack.c.bf16 %v778_v27, %v777_v26  ;;  %v791_v27 = vld [vmem:[%s8476_s1 + $0x1b0] sm:$0xff] }
  0x4b   : > { %4807 = vmatpush1.bf16.msra.mxu0 %v4806_v29  ;;  %v6098_v29 = vld [vmem:[%s5905_s28 + $0x50] sm:$0xff] }
  0x4c   : > { %4808 = vmatprep.subr.bf16.mxu0 %v8489_v0 }
  0x4f   : > { %4810 = vmatpush1.bf16.msra.mxu0 %v4809_v32  ;;  %v8488_v32 = vrot.slane %v6059_v15, 2 }
  0x50   : > { %4811 = vmatprep.subr.bf16.mxu0 %v8489_v0 }
  0x51   : > { %v6122_v39 = vsel %vm590_vm1, %v601_v31, %v8488_v32  ;;  %v6231_v31 = vld [vmem:[%s5905_s28 + $0xa0] sm:$0x3] }
  0x52   : > { %4576 = vmatprep.mubr.f32.mxu1 %v6122_v39  ;;  %v511_v36 = vrot.slane %v6231_v31, 1  ;;  %v6380_v32 = vld [vmem:[%s5905_s28 + $0x120] sm:$0xff] }
  0x53   : > { %4813 = vmatpush1.bf16.msra.mxu0 %v4812_v35  ;;  %v494_v35 = vrot.slane %v6098_v29, 1 }
  0x54   : > { %4814 = vmatprep.subr.bf16.mxu0 %v8489_v0 }
  0x57   : > { %4816 = vmatpush1.bf16.msra.mxu0 %v4815_v38  ;;  %v6117_v38 = vld [vmem:[%s5905_s28 + $0x58] sm:$0x3] }
  0x58   : > { %4817 = vmatprep.subr.bf16.mxu0 %v8489_v0  ;;  %v496_v42 = vrot.slane %v6117_v38, 1 }
  0x5a   : > { %v6147_v48 = vsel %vm477_vm0, %v494_v35, %v496_v42  ;;  %v6247_v42 = vld [vmem:[%s5905_s28 + $0xa8] sm:$0xff] }
  0x5b   : > { %4819 = vmatpush1.bf16.msra.mxu0 %v4818_v41  ;;  %v6128_v41 = vsel %vm477_vm0, %v493_v34, %v494_v35 }
  0x5c   : > { %4820 = vmatprep.subr.bf16.mxu0 %v8489_v0 }
  0x5f   : > { %4822 = vmatpush1.bf16.msra.mxu0 %v4821_v44  ;;  %v782_v44 = vld [vmem:[%s8476_s1 + $0x168] sm:$0xff] }
  0x60   : > { %4823 = vmatprep.subr.bf16.mxu0 %v8489_v0 }
  0x63   : > { %4825 = vmatpush1.bf16.msra.mxu0 %v4824_v47  ;;  %v4851_v47 = vpack.c.bf16 %v782_v44, %v781_v43  ;;  %v6250_v43 = vld [vmem:[%s5905_s28 + $0xb0] sm:$0xff] }
  0x64   : > { %4826 = vmatprep.subr.bf16.mxu0 %v8489_v0 }
  0x67   : > { %4828 = vmatpush1.bf16.msra.mxu0 %v4827_v50  ;;  %v499_v50 = vrot.slane %v6142_v46, 1 }
  0x68   : > { %4829 = vmatprep.subr.bf16.mxu0 %v8489_v0 }
  0x69   : > { %v6164_v55 = vsel %vm477_vm0, %v498_v49, %v499_v50  ;;  %v6183_v1 = vsel %vm477_vm0, %v499_v50, %v501_v56  ;;  %v513_v49 = vrot.slane %v6247_v42, 1  ;;  %v514_v50 = vrot.slane %v6250_v43, 1 }
  0x6a   : > { %8620 = vst [vmem:[#allocation6_spill] sm:$0xff] %v6183_v1 }
  0x6b   : > { %4831 = vmatpush1.bf16.msra.mxu0 %v4830_v54  ;;  %v4854_v54 = vpack.c.bf16 %v784_v52, %v783_v51  ;;  %v795_v51 = vld [vmem:[%s8476_s1 + $0x1d0] sm:$0xff]  ;;  %v796_v52 = vld [vmem:[%s8476_s1 + $0x1d8] sm:$0xff] }
  0x6c   : > { %4832 = vmatprep.subr.bf16.mxu0 %v8489_v0  ;;  %v4872_v56 = vpack.c.bf16 %v796_v52, %v795_v51  ;;  %v6336_v52 = vld [vmem:[%s5905_s28 + $0xf0] sm:$0xff] }
  0x6e   : > { %946 = vmatmul.mubr.f32.vlgmr.msra.gmra.mrb[0].mxu0 %v5915_v12  ;;  %v774_v12 = vld [vmem:[%s8476_s1 + $0x128] sm:$0xff] }
  0x6f   : > { %4834 = vmatpush1.bf16.msra.mxu0 %v4833_v62  ;;  %950 = vmatprep.mubr.f32.mxu0 %v482_v63  ;;  %v4839_v17 = vpack.c.bf16 %v774_v12, %v773_v11  ;;  %v6178_v62 = vld [vmem:[%s5905_s28 + $0x80] sm:$0xff]  ;;  %v4857_v63 = vpack.c.bf16 %v786_v58, %v785_v57  ;;  %v506_v12 = vrot.slane %v6195_v8, 1  ;;  %v6272_v57 = vsel %vm477_vm0, %v513_v49, %v514_v50  ;;  %v6327_v49 = vld [vmem:[%s5905_s28 + $0xe8] sm:$0x3] }
  0x70   : > { %4835 = vmatprep.subr.bf16.mxu0 %v8489_v0  ;;  %v504_v3 = vrot.slane %v6178_v62, 1  ;;  %8625 = vst [vmem:[#allocation11_spill] sm:$0xff] %v6272_v57  ;;  %v526_v51 = vrot.slane %v6327_v49, 1 }
  0x72   : > { %951 = vmatmul.mubr.f32.gmra.mrb[2].mxu0 %v5918_v14  ;;  %v776_v14 = vld [vmem:[%s8476_s1 + $0x138] sm:$0xff]  ;;  %v6200_v11 = vsel %vm477_vm0, %v503_v2, %v504_v3  ;;  %v798_v2 = vld [vmem:[%s8476_s1 + $0x1e8] sm:$0xff] }
  0x73   : > { %955 = vmatprep.mubr.f32.mxu0 %v6045_v9  ;;  %4837 = vmatpush1.bf16.msra.mxu0 %v4836_v7  ;;  %v4842_v23 = vpack.c.bf16 %v776_v14, %v775_v21  ;;  %v788_v7 = vld [vmem:[%s8476_s1 + $0x198] sm:$0xff]  ;;  %8621 = vst [vmem:[#allocation7_spill] sm:$0xff] %v6200_v11 }
  0x74   : > { %4838 = vmatprep.subr.bf16.mxu0 %v8489_v0  ;;  %v4860_v10 = vpack.c.bf16 %v788_v7, %v787_v4  ;;  %v6214_v21 = vld [vmem:[%s5905_s28 + $0x98] sm:$0xff]  ;;  %v6286_v4 = vld [vmem:[%s5905_s28 + $0xc8] sm:$0xff] }
  0x75   : > { %v509_v26 = vrot.slane %v6214_v21, 1 }
  0x76   : > { %956 = vmatmul.mubr.f32.gmra.mrb[4].mxu0 %v6020_v60 }
  0x77   : > { %960 = vmatprep.mubr.f32.mxu0 %v6067_v18  ;;  %4840 = vmatpush1.bf16.msra.mxu0 %v4839_v17  ;;  %v789_v17 = vld [vmem:[%s8476_s1 + $0x1a0] sm:$0xff]  ;;  %v6236_v35 = vsel %vm477_vm0, %v508_v25, %v509_v26  ;;  %v6303_v25 = vld [vmem:[%s5905_s28 + $0xd0] sm:$0x3] }
  0x78   : > { %4841 = vmatprep.subr.bf16.mxu0 %v8489_v0  ;;  %v4863_v14 = vpack.c.bf16 %v790_v19, %v789_v17  ;;  %8623 = vst [vmem:[#allocation9_spill] sm:$0xff] %v6236_v35  ;;  %v519_v17 = vrot.slane %v6286_v4, 1  ;;  %v799_v19 = vld [vmem:[%s8476_s1 + $0x1f0] sm:$0xff] }
  0x7a   : > { %961 = vmatmul.mubr.f32.gmra.mrb[6].mxu0 %v6023_v61 }
  0x7b   : > { %965 = vmatprep.mubr.f32.mxu0 %v6084_v24  ;;  %4843 = vmatpush1.bf16.msra.mxu0 %v4842_v23  ;;  %v6219_v23 = vsel %vm477_vm0, %v504_v3, %v506_v12  ;;  %v6283_v3 = vld [vmem:[%s5905_s28 + $0xc0] sm:$0xff] }
  0x7c   : > { %4844 = vmatprep.subr.bf16.mxu0 %v8489_v0  ;;  %8622 = vst [vmem:[#allocation8_spill] sm:$0xff] %v6219_v23  ;;  %v518_v12 = vrot.slane %v6283_v3, 1 }
  0x7e   : > { %966 = vmatmul.mubr.f32.gmra.mrb[8].mxu0 %v6056_v13 }
  0x7f   : > { %970 = vmatprep.mubr.f32.mxu0 %v6105_v33  ;;  %4846 = vmatpush1.bf16.msra.mxu0 %v4845_v30  ;;  %v792_v30 = vld [vmem:[%s8476_s1 + $0x1b8] sm:$0xff] }
  0x80   : > { %4847 = vmatprep.subr.bf16.mxu0 %v8489_v0  ;;  %v4866_v34 = vpack.c.bf16 %v792_v30, %v791_v27  ;;  %v6308_v27 = vsel %vm477_vm0, %v518_v12, %v519_v17  ;;  %v521_v30 = vrot.slane %v6303_v25, 1 }
  0x81   : > { %8627 = vst [vmem:[#allocation13_spill] sm:$0xff] %v6308_v27 }
  0x82   : > { %971 = vmatmul.mubr.f32.gmra.mrb[10].mxu0 %v6059_v15 }
  0x83   : > { %975 = vmatprep.mubr.f32.mxu0 %v6128_v41  ;;  %4849 = vmatpush1.bf16.msra.mxu0 %v4848_v40  ;;  %v794_v40 = vld [vmem:[%s8476_s1 + $0x1c8] sm:$0xff] }
  0x84   : > { %4850 = vmatprep.subr.bf16.mxu0 %v8489_v0  ;;  %v4869_v44 = vpack.c.bf16 %v794_v40, %v793_v37  ;;  %v6321_v37 = vsel %vm477_vm0, %v519_v17, %v521_v30 }
  0x85   : > { %8628 = vst [vmem:[#allocation14_spill] sm:$0xff] %v6321_v37 }
  0x86   : > { %976 = vmatmul.mubr.f32.gmra.mrb[12].mxu0 %v6095_v28 }
  0x87   : > { %980 = vmatprep.mubr.f32.mxu0 %v6147_v48  ;;  %4852 = vmatpush1.bf16.msra.mxu0 %v4851_v47  ;;  %v6255_v47 = vsel %vm477_vm0, %v509_v26, %v511_v36  ;;  %v6316_v36 = vld [vmem:[%s5905_s28 + $0xe0] sm:$0xff] }
  0x88   : > { %4853 = vmatprep.subr.bf16.mxu0 %v8489_v0  ;;  %8624 = vst [vmem:[#allocation10_spill] sm:$0xff] %v6255_v47 }
  0x8a   : > { %981 = vmatmul.mubr.f32.gmra.mrb[14].mxu0 %v6098_v29 }
  0x8b   : > { %985 = vmatprep.mubr.f32.mxu0 %v6164_v55  ;;  %4855 = vmatpush1.bf16.msra.mxu0 %v4854_v54  ;;  %v6267_v54 = vld [vmem:[%s5905_s28 + $0xb8] sm:$0x3] }
  0x8c   : > { %4856 = vmatprep.subr.bf16.mxu0 %v8489_v0  ;;  %v516_v58 = vrot.slane %v6267_v54, 1 }
  0x8e   : > { %986 = vmatmul.mubr.f32.gmra.mrb[16].mxu0 %v6139_v45 }
  0x8f   : > { %990 = vmatprep.mubr.f32.mxu0 %v6183_v1  ;;  %4858 = vmatpush1.bf16.msra.mxu0 %v4857_v63  ;;  %v797_v63 = vld [vmem:[%s8476_s1 + $0x1e0] sm:$0xff]  ;;  %v8643_v1 = vmov 0.0|0.0  }
  0x90   : > { %4859 = vmatprep.subr.bf16.mxu0 %v8489_v0  ;;  %v4875_v7 = vpack.c.bf16 %v798_v2, %v797_v63  ;;  %v528_v63 = vrot.slane %v6336_v52, 1 }
  0x92   : > { %991 = vmatmul.mubr.f32.gmra.mrb[18].mxu0 %v6142_v46 }
  0x93   : > { %995 = vmatprep.mubr.f32.mxu0 %v6200_v11  ;;  %4861 = vmatpush1.bf16.msra.mxu0 %v4860_v10  ;;  %v6291_v10 = vsel %vm477_vm0, %v514_v50, %v516_v58 }
  0x94   : > { %4862 = vmatprep.subr.bf16.mxu0 %v8489_v0  ;;  %8626 = vst [vmem:[#allocation12_spill] sm:$0xff] %v6291_v10 }
  0x96   : > { %996 = vmatmul.mubr.f32.gmra.mrb[20].mxu0 %v6175_v59 }
  0x97   : > { %1000 = vmatprep.mubr.f32.mxu0 %v6219_v23  ;;  %4864 = vmatpush1.bf16.msra.mxu0 %v4863_v14  ;;  %v800_v14 = vld [vmem:[%s8476_s1 + $0x1f8] sm:$0xff] }
  0x98   : > { %4865 = vmatprep.subr.bf16.mxu0 %v8489_v0  ;;  %v4878_v26 = vpack.c.bf16 %v800_v14, %v799_v19  ;;  %v6358_v19 = vld [vmem:[%s5905_s28 + $0x108] sm:$0xff]  ;;  %v6361_v14 = vld [vmem:[%s5905_s28 + $0x110] sm:$0xff]  ;;  %v6459_v23 = vld [vmem:[%s5905_s28 + $0x178] sm:$0x3] }
  0x99   : > { %v533_v30 = vrot.slane %v6358_v19, 1  ;;  %v556_v11 = vrot.slane %v6459_v23, 1 }
  0x9a   : > { %1001 = vmatmul.mubr.f32.gmra.mrb[22].mxu0 %v6178_v62 }
  0x9b   : > { %1005 = vmatprep.mubr.f32.mxu0 %v6236_v35  ;;  %4867 = vmatpush1.bf16.msra.mxu0 %v4866_v34  ;;  %v6313_v34 = vld [vmem:[%s5905_s28 + $0xd8] sm:$0xff]  ;;  %v6449_v35 = vld [vmem:[%s5905_s28 + $0x170] sm:$0xff] }
  0x9c   : > { %4868 = vmatprep.subr.bf16.mxu0 %v8489_v0  ;;  %v523_v40 = vrot.slane %v6313_v34, 1 }
  0x9e   : > { %1006 = vmatmul.mubr.f32.gmra.mrb[24].mxu0 %v6211_v20 }
  0x9f   : > { %1010 = vmatprep.mubr.f32.mxu0 %v6255_v47  ;;  %4870 = vmatpush1.bf16.msra.mxu0 %v4869_v44  ;;  %v524_v44 = vrot.slane %v6316_v36, 1 }
  0xa0   : > { %4871 = vmatprep.subr.bf16.mxu0 %v8489_v0 }
  0xa1   : > { %v6332_v50 = vsel %vm477_vm0, %v523_v40, %v524_v44  ;;  %v6344_v58 = vsel %vm477_vm0, %v524_v44, %v526_v51  ;;  %v534_v40 = vrot.slane %v6361_v14, 1  ;;  %v6371_v44 = vld [vmem:[%s5905_s28 + $0x118] sm:$0x3] }
  0xa2   : > { %1011 = vmatmul.mubr.f32.gmra.mrb[26].mxu0 %v6214_v21  ;;  %8629 = vst [vmem:[#allocation15_spill] sm:$0xff] %v6332_v50  ;;  %8630 = vst [vmem:[#allocation16_spill] sm:$0xff] %v6344_v58 }
  0xa3   : > { %1015 = vmatprep.mubr.f32.mxu0 %v6272_v57  ;;  %4873 = vmatpush1.bf16.msra.mxu0 %v4872_v56  ;;  %v6339_v56 = vld [vmem:[%s5905_s28 + $0xf8] sm:$0xff]  ;;  %v6376_v51 = vsel %vm477_vm0, %v533_v30, %v534_v40  ;;  %v6393_v30 = vld [vmem:[%s5905_s28 + $0x130] sm:$0x3] }
  0xa4   : > { %4874 = vmatprep.subr.bf16.mxu0 %v8489_v0  ;;  %v529_v2 = vrot.slane %v6339_v56, 1  ;;  %8633 = vst [vmem:[#allocation19_spill] sm:$0xff] %v6376_v51 }
  0xa6   : > { %1016 = vmatmul.mubr.f32.gmra.mrb[28].mxu0 %v6247_v42  ;;  %v6354_v12 = vsel %vm477_vm0, %v528_v63, %v529_v2  ;;  %v536_v63 = vrot.slane %v6371_v44, 1 }
  0xa7   : > { %1020 = vmatprep.mubr.f32.mxu0 %v6291_v10  ;;  %4876 = vmatpush1.bf16.msra.mxu0 %v4875_v7  ;;  %v6349_v7 = vld [vmem:[%s5905_s28 + $0x100] sm:$0x3]  ;;  %8631 = vst [vmem:[#allocation17_spill] sm:$0xff] %v6354_v12 }
  0xa8   : > { %4877 = vmatprep.subr.bf16.mxu0 %v8489_v0  ;;  %v531_v17 = vrot.slane %v6349_v7, 1 }
  0xaa   : > { %1021 = vmatmul.mubr.f32.gmra.mrb[30].mxu0 %v6250_v43 }
  0xab   : > { %1025 = vmatprep.mubr.f32.mxu0 %v6308_v27  ;;  %4879 = vmatpush1.bf16.msra.mxu0 %v4878_v26  ;;  %v6366_v26 = vsel %vm477_vm0, %v529_v2, %v531_v17  ;;  %v6383_v2 = vld [vmem:[%s5905_s28 + $0x128] sm:$0xff]  ;;  %v6388_v17 = vsel %vm477_vm0, %v534_v40, %v536_v63  ;;  %v6405_v40 = vld [vmem:[%s5905_s28 + $0x140] sm:$0xff]  ;;  %v6424_v27 = vld [vmem:[%s5905_s28 + $0x150] sm:$0xff] }
  0xac   : > { %4880 = vmatprep.subr.bf16.mxu0 %v8489_v0  ;;  %8632 = vst [vmem:[#allocation18_spill] sm:$0xff] %v6366_v26  ;;  %8634 = vst [vmem:[#allocation20_spill] sm:$0xff] %v6388_v17  ;;  %v538_v0 = vrot.slane %v6380_v32, 1 }
  0xae   : > { %1026 = vmatmul.mubr.f32.gmra.mrb[32].mxu0 %v6283_v3 }
  0xaf   : > { %1030 = vmatprep.mubr.f32.mxu0 %v6321_v37 }
  0xb2   : > { %1031 = vmatmul.mubr.f32.gmra.mrb[34].mxu0 %v6286_v4 }
  0xb3   : > { %1035 = vmatprep.mubr.f32.mxu0 %v6332_v50  ;;  %v544_v50 = vrot.slane %v6405_v40, 1 }
  0xb6   : > { %1036 = vmatmul.mubr.f32.gmra.mrb[36].mxu0 %v6313_v34 }
  0xb7   : > { %1040 = vmatprep.mubr.f32.mxu0 %v6344_v58  ;;  %v6402_v58 = vld [vmem:[%s5905_s28 + $0x138] sm:$0xff] }
  0xba   : > { %1041 = vmatmul.mubr.f32.gmra.mrb[38].mxu0 %v6316_v36 }
  0xbb   : > { %1045 = vmatprep.mubr.f32.mxu0 %v6354_v12 }
  0xbe   : > { %1046 = vmatmul.mubr.f32.gmra.mrb[40].mxu0 %v6336_v52 }
  0xbf   : > { %1050 = vmatprep.mubr.f32.mxu0 %v6366_v26  ;;  %v539_v26 = vrot.slane %v6383_v2, 1 }
  0xc1   : > { %v6398_v12 = vsel %vm477_vm0, %v538_v0, %v539_v26  ;;  %v6415_v0 = vld [vmem:[%s5905_s28 + $0x148] sm:$0x3] }
  0xc2   : > { %1051 = vmatmul.mubr.f32.gmra.mrb[42].mxu0 %v6339_v56  ;;  %8635 = vst [vmem:[#allocation21_spill] sm:$0xff] %v6398_v12 }
  0xc3   : > { %1055 = vmatprep.mubr.f32.mxu0 %v6376_v51  ;;  %v541_v51 = vrot.slane %v6393_v30, 1 }
  0xc5   : > { %v6410_v63 = vsel %vm477_vm0, %v539_v26, %v541_v51  ;;  %v6427_v26 = vld [vmem:[%s5905_s28 + $0x158] sm:$0xff] }
  0xc6   : > { %1056 = vmatmul.mubr.f32.gmra.mrb[44].mxu0 %v6358_v19  ;;  %8636 = vst [vmem:[#allocation22_spill] sm:$0xff] %v6410_v63  ;;  %v549_v10 = vrot.slane %v6427_v26, 1 }
  0xc7   : > { %1060 = vmatprep.mubr.f32.mxu0 %v6388_v17  ;;  %v543_v17 = vrot.slane %v6402_v58, 1 }
  0xc9   : > { %v6420_v37 = vsel %vm477_vm0, %v543_v17, %v544_v50  ;;  %v6437_v17 = vld [vmem:[%s5905_s28 + $0x160] sm:$0x3] }
  0xca   : > { %1061 = vmatmul.mubr.f32.gmra.mrb[46].mxu0 %v6361_v14  ;;  %8637 = vst [vmem:[#allocation23_spill] sm:$0xff] %v6420_v37  ;;  %v551_v47 = vrot.slane %v6437_v17, 1 }
  0xcb   : > { %1065 = vmatprep.mubr.f32.mxu0 %v6398_v12  ;;  %v546_v12 = vrot.slane %v6415_v0, 1 }
  0xcd   : > { %v6432_v51 = vsel %vm477_vm0, %v544_v50, %v546_v12  ;;  %v6454_v50 = vsel %vm477_vm0, %v549_v10, %v551_v47 }
  0xce   : > { %1066 = vmatmul.mubr.f32.gmra.mrb[48].mxu0 %v6380_v32  ;;  %8638 = vst [vmem:[#allocation24_spill] sm:$0xff] %v6432_v51  ;;  %8640 = vst [vmem:[#allocation26_spill] sm:$0xff] %v6454_v50 }
  0xcf   : > { %1070 = vmatprep.mubr.f32.mxu0 %v6410_v63  ;;  %v548_v63 = vrot.slane %v6424_v27, 1 }
  0xd1   : > { %v6442_v57 = vsel %vm477_vm0, %v548_v63, %v549_v10  ;;  %v801_v10 = vld [vmem:[%s8476_s1 + $0x200] sm:$0xff] }
  0xd2   : > { %1071 = vmatmul.mubr.f32.gmra.mrb[50].mxu0 %v6383_v2  ;;  %8639 = vst [vmem:[#allocation25_spill] sm:$0xff] %v6442_v57 }
  0xd3   : > { %1075 = vmatprep.mubr.f32.mxu0 %v6420_v37  ;;  %v6446_v37 = vld [vmem:[%s5905_s28 + $0x168] sm:$0xff] }
  0xd4   : > { %v553_v12 = vrot.slane %v6446_v37, 1 }
  0xd6   : > { %1076 = vmatmul.mubr.f32.gmra.mrb[52].mxu0 %v6402_v58 }
  0xd7   : > { %1080 = vmatprep.mubr.f32.mxu0 %v6432_v51  ;;  %v554_v51 = vrot.slane %v6449_v35, 1 }
  0xd9   : > { %v6464_v63 = vsel %vm477_vm0, %v553_v12, %v554_v51  ;;  %v6470_v47 = vsel %vm477_vm0, %v554_v51, %v556_v11  ;;  %v802_v12 = vld [vmem:[%s8476_s1 + $0x208] sm:$0xff]  ;;  %v803_v11 = vld [vmem:[%s8476_s1 + $0x210] sm:$0xff]  ;;  %v804_v51 = vld [vmem:[%s8476_s1 + $0x218] sm:$0xff] }
  0xda   : > { %1081 = vmatmul.mubr.f32.gmra.mrb[54].mxu0 %v6405_v40  ;;  %8641 = vst [vmem:[#allocation27_spill] sm:$0xff] %v6464_v63  ;;  %8642 = vst [vmem:[#allocation28_spill] sm:$0xff] %v6470_v47 }
  0xdb   : > { %1085 = vmatprep.mubr.f32.mxu0 %v6442_v57  ;;  %v4884_v57 = vpack.c.bf16 %v804_v51, %v803_v11  ;;  %v808_v11 = vld [vmem:[%s8476_s1 + $0x238] sm:$0xff]  ;;  %v811_v51 = vld [vmem:[%s8476_s1 + $0x250] sm:$0xff] }
  0xde   : > { %1086 = vmatmul.mubr.f32.gmra.mrb[56].mxu0 %v6424_v27 }
  0xdf   : > { %1090 = vmatprep.mubr.f32.mxu0 %v6454_v50  ;;  %v597_v50 = vrot.slane %v6023_v61, 2 }
  0xe2   : > { %1091 = vmatmul.mubr.f32.gmra.mrb[58].mxu0 %v6427_v26 }
  0xe3   : > { %1095 = vmatprep.mubr.f32.mxu0 %v6464_v63  ;;  %v4881_v63 = vpack.c.bf16 %v802_v12, %v801_v10  ;;  %v805_v10 = vld [vmem:[%s8476_s1 + $0x220] sm:$0xff]  ;;  %v806_v12 = vld [vmem:[%s8476_s1 + $0x228] sm:$0xff] }
  0xe6   : > { %1096 = vmatmul.mubr.f32.gmra.mrb[60].mxu0 %v6446_v37 }
  0xe7   : > { %1100 = vmatprep.mubr.f32.mxu0 %v6470_v47  ;;  %v596_v47 = vrot.slane %v6020_v60, 2 }
  0xea   : > { %1101 = vmatmul.mubr.f32.gmra.mrb[62].mxu0 %v6449_v35 }
  0xeb   : > { %1170 = vmatprep.mubr.f32.mxu0 %v6020_v60  ;;  %v599_v60 = vrot.slane %v6041_v6, 2 }
  0xee   : > { %1171 = vmatmul.mubr.f32.vlgmr.msra.gmra.mrb[0].mxu0 %v6038_v5  ;;  %v6502_v5 = vsel %vm590_vm1, %v596_v47, %v597_v50  ;;  %v604_v47 = vrot.slane %v6079_v22, 2 }
  0xef   : > { %4882 = vmatpush1.bf16.msra.mxu0 %v4881_v63  ;;  %1175 = vmatprep.mubr.f32.mxu0 %v6023_v61  ;;  %v4887_v61 = vpack.c.bf16 %v806_v12, %v805_v10  ;;  %v807_v63 = vld [vmem:[%s8476_s1 + $0x230] sm:$0xff]  ;;  %v812_v10 = vld [vmem:[%s8476_s1 + $0x258] sm:$0xff]  ;;  %v8644_v12 = vrot.slane %v6059_v15, 2 }
  0xf0   : > { %4883 = vmatprep.subr.bf16.mxu0 %v8643_v1  ;;  %v4890_v6 = vpack.c.bf16 %v808_v11, %v807_v63  ;;  %v4896_v63 = vpack.c.bf16 %v812_v10, %v811_v51  ;;  %v813_v11 = vld [vmem:[%s8476_s1 + $0x260] sm:$0xff] }
  0xf1   : > { %v6539_v22 = vsel %vm590_vm1, %v8644_v12, %v604_v47  ;;  %v817_v10 = vld [vmem:[%s8476_s1 + $0x280] sm:$0xff]  ;;  %v818_v12 = vld [vmem:[%s8476_s1 + $0x288] sm:$0xff] }
  0xf2   : > { %1176 = vmatmul.mubr.f32.gmra.mrb[2].mxu0 %v6062_v16  ;;  %v809_v16 = vld [vmem:[%s8476_s1 + $0x240] sm:$0xff] }
  0xf3   : > { %1180 = vmatprep.mubr.f32.mxu0 %v6056_v13  ;;  %4885 = vmatpush1.bf16.msra.mxu0 %v4884_v57  ;;  %v6515_v13 = vsel %vm590_vm1, %v597_v50, %v599_v60  ;;  %v810_v57 = vld [vmem:[%s8476_s1 + $0x248] sm:$0xff]  ;;  %v606_v60 = vrot.slane %v6095_v28, 2 }
  0xf4   : > { %4886 = vmatprep.subr.bf16.mxu0 %v8643_v1  ;;  %v4893_v50 = vpack.c.bf16 %v810_v57, %v809_v16  ;;  %v815_v16 = vld [vmem:[%s8476_s1 + $0x270] sm:$0xff]  ;;  %v816_v57 = vld [vmem:[%s8476_s1 + $0x278] sm:$0xff] }
  0xf5   : > { %v4902_v51 = vpack.c.bf16 %v816_v57, %v815_v16  ;;  %v822_v16 = vld [vmem:[%s8476_s1 + $0x2a8] sm:$0xff] }
  0xf6   : > { %1181 = vmatmul.mubr.f32.gmra.mrb[4].mxu0 %v6502_v5 }
  0xf7   : > { %1185 = vmatprep.mubr.f32.mxu0 %v6059_v15  ;;  %4888 = vmatpush1.bf16.msra.mxu0 %v4887_v61  ;;  %v607_v61 = vrot.slane %v6098_v29, 2 }
  0xf8   : > { %4889 = vmatprep.subr.bf16.mxu0 %v8643_v1 }
  0xf9   : > { %v6553_v15 = vsel %vm590_vm1, %v606_v60, %v607_v61  ;;  %v4905_v60 = vpack.c.bf16 %v818_v12, %v817_v10  ;;  %v622_v10 = vrot.slane %v6214_v21, 2 }
  0xfa   : > { %1186 = vmatmul.mubr.f32.gmra.mrb[6].mxu0 %v6515_v13 }
  0xfb   : > { %1190 = vmatprep.mubr.f32.mxu0 %v6095_v28  ;;  %4891 = vmatpush1.bf16.msra.mxu0 %v4890_v6  ;;  %v814_v6 = vld [vmem:[%s8476_s1 + $0x268] sm:$0xff]  ;;  %v609_v28 = vrot.slane %v6117_v38, 2  ;;  %v611_v38 = vrot.slane %v6139_v45, 2 }
  0xfc   : > { %4892 = vmatprep.subr.bf16.mxu0 %v8643_v1 }
  0xfd   : > { %v6566_v47 = vsel %vm590_vm1, %v607_v61, %v609_v28  ;;  %v819_v61 = vld [vmem:[%s8476_s1 + $0x290] sm:$0xff] }
  0xfe   : > { %1191 = vmatmul.mubr.f32.gmra.mrb[8].mxu0 %v6122_v39 }
  0xff   : > { %1195 = vmatprep.mubr.f32.mxu0 %v6098_v29  ;;  %4894 = vmatpush1.bf16.msra.mxu0 %v4893_v50  ;;  %v4899_v29 = vpack.c.bf16 %v814_v6, %v813_v11  ;;  %v612_v50 = vrot.slane %v6142_v46, 2  ;;  %v617_v6 = vrot.slane %v6178_v62, 2 }
 0x100   : > { %4895 = vmatprep.subr.bf16.mxu0 %v8643_v1 }
 0x102   : > { %1196 = vmatmul.mubr.f32.gmra.mrb[10].mxu0 %v6539_v22 }
 0x103   : > { %1200 = vmatprep.mubr.f32.mxu0 %v6139_v45  ;;  %4897 = vmatpush1.bf16.msra.mxu0 %v4896_v63  ;;  %v6580_v45 = vsel %vm590_vm1, %v611_v38, %v612_v50  ;;  %v820_v63 = vld [vmem:[%s8476_s1 + $0x298] sm:$0xff]  ;;  %v823_v38 = vld [vmem:[%s8476_s1 + $0x2b0] sm:$0xff] }
 0x104   : > { %4898 = vmatprep.subr.bf16.mxu0 %v8643_v1  ;;  %v4908_v28 = vpack.c.bf16 %v820_v63, %v819_v61  ;;  %v827_v63 = vld [vmem:[%s8476_s1 + $0x2d0] sm:$0xff] }
 0x106   : > { %1201 = vmatmul.mubr.f32.gmra.mrb[12].mxu0 %v6553_v15 }
 0x107   : > { %1205 = vmatprep.mubr.f32.mxu0 %v6142_v46  ;;  %4900 = vmatpush1.bf16.msra.mxu0 %v4899_v29  ;;  %v614_v46 = vrot.slane %v6159_v53, 2  ;;  %v616_v53 = vrot.slane %v6175_v59, 2  ;;  %v821_v29 = vld [vmem:[%s8476_s1 + $0x2a0] sm:$0xff] }
 0x108   : > { %4901 = vmatprep.subr.bf16.mxu0 %v8643_v1  ;;  %v4911_v57 = vpack.c.bf16 %v822_v16, %v821_v29  ;;  %v829_v16 = vld [vmem:[%s8476_s1 + $0x2e0] sm:$0xff] }
 0x109   : > { %v6593_v11 = vsel %vm590_vm1, %v612_v50, %v614_v46  ;;  %v824_v50 = vld [vmem:[%s8476_s1 + $0x2b8] sm:$0xff]  ;;  %v825_v46 = vld [vmem:[%s8476_s1 + $0x2c0] sm:$0xff] }
 0x10a   : > { %1206 = vmatmul.mubr.f32.gmra.mrb[14].mxu0 %v6566_v47  ;;  %v4914_v12 = vpack.c.bf16 %v824_v50, %v823_v38  ;;  %v831_v38 = vld [vmem:[%s8476_s1 + $0x2f0] sm:$0xff]  ;;  %v832_v50 = vld [vmem:[%s8476_s1 + $0x2f8] sm:$0xff] }
 0x10b   : > { %1210 = vmatprep.mubr.f32.mxu0 %v6175_v59  ;;  %4903 = vmatpush1.bf16.msra.mxu0 %v4902_v51  ;;  %v6607_v59 = vsel %vm590_vm1, %v616_v53, %v617_v6  ;;  %v828_v53 = vld [vmem:[%s8476_s1 + $0x2d8] sm:$0xff] }
 0x10c   : > { %4904 = vmatprep.subr.bf16.mxu0 %v8643_v1  ;;  %v4920_v29 = vpack.c.bf16 %v828_v53, %v827_v63 }
 0x10e   : > { %1211 = vmatmul.mubr.f32.gmra.mrb[16].mxu0 %v6580_v45 }
 0x10f   : > { %1215 = vmatprep.mubr.f32.mxu0 %v6178_v62  ;;  %4906 = vmatpush1.bf16.msra.mxu0 %v4905_v60  ;;  %v619_v62 = vrot.slane %v6195_v8, 2  ;;  %v621_v8 = vrot.slane %v6211_v20, 2  ;;  %v826_v60 = vld [vmem:[%s8476_s1 + $0x2c8] sm:$0xff] }
 0x110   : > { %4907 = vmatprep.subr.bf16.mxu0 %v8643_v1  ;;  %v4917_v61 = vpack.c.bf16 %v826_v60, %v825_v46  ;;  %v634_v60 = vrot.slane %v6303_v25, 2 }
 0x111   : > { %v6620_v51 = vsel %vm590_vm1, %v617_v6, %v619_v62  ;;  %v830_v62 = vld [vmem:[%s8476_s1 + $0x2e8] sm:$0xff] }
 0x112   : > { %1216 = vmatmul.mubr.f32.gmra.mrb[18].mxu0 %v6593_v11 }
 0x113   : > { %1220 = vmatprep.mubr.f32.mxu0 %v6211_v20  ;;  %4909 = vmatpush1.bf16.msra.mxu0 %v4908_v28  ;;  %v6634_v20 = vsel %vm590_vm1, %v621_v8, %v622_v10  ;;  %v627_v28 = vrot.slane %v6250_v43, 2 }
 0x114   : > { %4910 = vmatprep.subr.bf16.mxu0 %v8643_v1 }
 0x116   : > { %1221 = vmatmul.mubr.f32.gmra.mrb[20].mxu0 %v6607_v59 }
 0x117   : > { %1225 = vmatprep.mubr.f32.mxu0 %v6214_v21  ;;  %4912 = vmatpush1.bf16.msra.mxu0 %v4911_v57  ;;  %v624_v21 = vrot.slane %v6231_v31, 2  ;;  %v626_v31 = vrot.slane %v6247_v42, 2  ;;  %v4923_v57 = vpack.c.bf16 %v830_v62, %v829_v16  ;;  %v865_v16 = vld [vmem:[%s8476_s1 + $0x400] sm:$0xff] }
 0x118   : > { %4913 = vmatprep.subr.bf16.mxu0 %v8643_v1 }
 0x119   : > { %v6647_v6 = vsel %vm590_vm1, %v622_v10, %v624_v21  ;;  %v632_v10 = vrot.slane %v6286_v4, 2  ;;  %v637_v21 = vrot.slane %v6316_v36, 2 }
 0x11a   : > { %1226 = vmatmul.mubr.f32.gmra.mrb[22].mxu0 %v6620_v51 }
 0x11b   : > { %1230 = vmatprep.mubr.f32.mxu0 %v6247_v42  ;;  %4915 = vmatpush1.bf16.msra.mxu0 %v4914_v12  ;;  %v6661_v42 = vsel %vm590_vm1, %v626_v31, %v627_v28  ;;  %v4926_v12 = vpack.c.bf16 %v832_v50, %v831_v38  ;;  %v656_v38 = vrot.slane %v6402_v58, 2  ;;  %v657_v50 = vrot.slane %v6405_v40, 2 }
 0x11c   : > { %4916 = vmatprep.subr.bf16.mxu0 %v8643_v1 }
 0x11e   : > { %1231 = vmatmul.mubr.f32.gmra.mrb[24].mxu0 %v6634_v20 }
 0x11f   : > { %1235 = vmatprep.mubr.f32.mxu0 %v6250_v43  ;;  %4918 = vmatpush1.bf16.msra.mxu0 %v4917_v61  ;;  %v629_v43 = vrot.slane %v6267_v54, 2  ;;  %v631_v54 = vrot.slane %v6283_v3, 2  ;;  %v639_v61 = vrot.slane %v6327_v49, 2  ;;  %v644_v49 = vrot.slane %v6349_v7, 2 }
 0x120   : > { %4919 = vmatprep.subr.bf16.mxu0 %v8643_v1  ;;  %v649_v7 = vrot.slane %v6371_v44, 2  ;;  %v866_v44 = vld [vmem:[%s8476_s1 + $0x408] sm:$0xff] }
 0x121   : > { %v6674_v8 = vsel %vm590_vm1, %v627_v28, %v629_v43  ;;  %v6682_v46 = vsel %vm590_vm1, %v631_v54, %v632_v10  ;;  %v6702_v63 = vsel %vm590_vm1, %v637_v21, %v639_v61  ;;  %v654_v43 = vrot.slane %v6393_v30, 2  ;;  %v868_v30 = vld [vmem:[%s8476_s1 + $0x418] sm:$0xff] }
 0x122   : > { %1236 = vmatmul.mubr.f32.gmra.mrb[26].mxu0 %v6647_v6  ;;  %v661_v61 = vrot.slane %v6424_v27, 2 }
 0x123   : > { %1240 = vmatprep.mubr.f32.mxu0 %v6283_v3  ;;  %4921 = vmatpush1.bf16.msra.mxu0 %v4920_v29  ;;  %v6689_v3 = vsel %vm590_vm1, %v632_v10, %v634_v60  ;;  %v869_v10 = vld [vmem:[%s8476_s1 + $0x420] sm:$0xff] }
 0x124   : > { %4922 = vmatprep.subr.bf16.mxu0 %v8643_v1 }
 0x126   : > { %1241 = vmatmul.mubr.f32.gmra.mrb[28].mxu0 %v6661_v42 }
 0x127   : > { %1245 = vmatprep.mubr.f32.mxu0 %v6286_v4  ;;  %4924 = vmatpush1.bf16.msra.mxu0 %v4923_v57  ;;  %v636_v4 = vrot.slane %v6313_v34, 2 }
 0x128   : > { %4925 = vmatprep.subr.bf16.mxu0 %v8643_v1 }
 0x129   : > { %v6696_v25 = vsel %vm590_vm1, %v636_v4, %v637_v21  ;;  %v871_v4 = vld [vmem:[%s8476_s1 + $0x430] sm:$0xff] }
 0x12a   : > { %1246 = vmatmul.mubr.f32.gmra.mrb[30].mxu0 %v6674_v8 }
 0x12b   : > { %1250 = vmatprep.mubr.f32.mxu0 %v6313_v34  ;;  %4927 = vmatpush1.bf16.msra.mxu0 %v4926_v12  ;;  %v641_v34 = vrot.slane %v6336_v52, 2  ;;  %v870_v12 = vld [vmem:[%s8476_s1 + $0x428] sm:$0xff] }
 0x12c   : > { %4928 = vmatprep.subr.bf16.mxu0 %v8643_v1  ;;  %v4984_v60 = vpack.c.bf16 %v870_v12, %v869_v10  ;;  %v833_v10 = vld [vmem:[%s8476_s1 + $0x300] sm:$0xff]  ;;  %v834_v12 = vld [vmem:[%s8476_s1 + $0x308] sm:$0xff] }
 0x12e   : > { %1251 = vmatmul.mubr.f32.gmra.mrb[32].mxu0 %v6682_v46 }
 0x12f   : > { %1255 = vmatprep.mubr.f32.mxu0 %v6316_v36  ;;  %v642_v36 = vrot.slane %v6339_v56, 2 }
 0x131   : > { %v6709_v53 = vsel %vm590_vm1, %v641_v34, %v642_v36  ;;  %v6715_v31 = vsel %vm590_vm1, %v642_v36, %v644_v49  ;;  %v662_v34 = vrot.slane %v6427_v26, 2  ;;  %v873_v49 = vld [vmem:[%s8476_s1 + $0x440] sm:$0xff] }
 0x132   : > { %1256 = vmatmul.mubr.f32.gmra.mrb[34].mxu0 %v6689_v3 }
 0x133   : > { %1260 = vmatprep.mubr.f32.mxu0 %v6336_v52  ;;  %v646_v52 = vrot.slane %v6358_v19, 2 }
 0x136   : > { %1261 = vmatmul.mubr.f32.gmra.mrb[36].mxu0 %v6696_v25 }
 0x137   : > { %1265 = vmatprep.mubr.f32.mxu0 %v6339_v56  ;;  %v647_v56 = vrot.slane %v6361_v14, 2 }
 0x139   : > { %v6722_v28 = vsel %vm590_vm1, %v646_v52, %v647_v56  ;;  %v6728_v29 = vsel %vm590_vm1, %v647_v56, %v649_v7  ;;  %v664_v52 = vrot.slane %v6437_v17, 2  ;;  %v875_v7 = vld [vmem:[%s8476_s1 + $0x450] sm:$0xff]  ;;  %v876_v17 = vld [vmem:[%s8476_s1 + $0x458] sm:$0xff] }
 0x13a   : > { %1266 = vmatmul.mubr.f32.gmra.mrb[38].mxu0 %v6702_v63 }
 0x13b   : > { %1270 = vmatprep.mubr.f32.mxu0 %v6358_v19  ;;  %v651_v19 = vrot.slane %v6380_v32, 2 }
 0x13e   : > { %1271 = vmatmul.mubr.f32.gmra.mrb[40].mxu0 %v6709_v53 }
 0x13f   : > { %1275 = vmatprep.mubr.f32.mxu0 %v6361_v14  ;;  %v652_v14 = vrot.slane %v6383_v2, 2 }
 0x141   : > { %v6741_v62 = vsel %vm590_vm1, %v651_v19, %v652_v14  ;;  %v6750_v57 = vsel %vm590_vm1, %v652_v14, %v654_v43  ;;  %v6800_v19 = vsel %vm590_vm1, %v662_v34, %v664_v52  ;;  %v666_v14 = vrot.slane %v6446_v37, 2  ;;  %v842_v52 = vld [vmem:[%s8476_s1 + $0x348] sm:$0xff] }
 0x142   : > { %1276 = vmatmul.mubr.f32.gmra.mrb[42].mxu0 %v6715_v31  ;;  %v4996_v43 = vpack.c.bf16 %v876_v17, %v875_v7  ;;  %v844_v7 = vld [vmem:[%s8476_s1 + $0x358] sm:$0xff]  ;;  %v847_v17 = vld [vmem:[%s8476_s1 + $0x370] sm:$0xff] }
 0x143   : > { %1280 = vmatprep.mubr.f32.mxu0 %v6380_v32  ;;  %v4976_v32 = vpack.c.bf16 %v866_v44, %v865_v16  ;;  %v667_v16 = vrot.slane %v6449_v35, 2  ;;  %v6808_v44 = vld [vmem:[%s5905_s28 + $0x180] sm:$0xff] }
 0x145   : > { %4977 = vmatprep.subr.bf16.mxu1 %v4976_v32 }
 0x146   : > { %1281 = vmatmul.mubr.f32.gmra.mrb[44].mxu0 %v6722_v28  ;;  %4979 = vmatpush3.bf16.msra.mxu1 %v4976_v32  ;;  %v877_v32 = vld [vmem:[%s8476_s1 + $0x460] sm:$0xff] }
 0x147   : > { %1285 = vmatprep.mubr.f32.mxu0 %v6383_v2  ;;  %v867_v2 = vld [vmem:[%s8476_s1 + $0x410] sm:$0xff] }
 0x148   : > { %v4980_v54 = vpack.c.bf16 %v868_v30, %v867_v2  ;;  %v669_v2 = vrot.slane %v6459_v23, 2  ;;  %v879_v30 = vld [vmem:[%s8476_s1 + $0x470] sm:$0xff]  ;;  %v880_v23 = vld [vmem:[%s8476_s1 + $0x478] sm:$0xff] }
 0x14a   : > { %1286 = vmatmul.mubr.f32.gmra.mrb[46].mxu0 %v6728_v29  ;;  %4981 = vmatprep.subr.bf16.mxu1 %v4980_v54 }
 0x14b   : > { %1290 = vmatprep.mubr.f32.mxu0 %v6402_v58  ;;  %v6766_v58 = vsel %vm590_vm1, %v656_v38, %v657_v50  ;;  %4983 = vmatpush3.bf16.msra.mxu1 %v4980_v54  ;;  %v6831_v54 = vsel %vm590_vm1, %v667_v16, %v669_v2  ;;  %v8645_v2 = vld [vmem:[#allocation6_spill] sm:$0xff] }
 0x14c   : > { %4985 = vmatprep.subr.bf16.mxu1 %v4984_v60 }
 0x14e   : > { %1291 = vmatmul.mubr.f32.gmra.mrb[48].mxu0 %v6741_v62 }
 0x14f   : > { %1295 = vmatprep.mubr.f32.mxu0 %v6405_v40  ;;  %v659_v40 = vrot.slane %v6415_v0, 2  ;;  %4987 = vmatpush3.bf16.msra.mxu1 %v4984_v60  ;;  %v872_v0 = vld [vmem:[%s8476_s1 + $0x438] sm:$0xff]  ;;  %v4929_v60 = vpack.c.bf16 %v834_v12, %v833_v10  ;;  %v853_v10 = vld [vmem:[%s8476_s1 + $0x3a0] sm:$0xff]  ;;  %v854_v12 = vld [vmem:[%s8476_s1 + $0x3a8] sm:$0xff] }
 0x150   : > { %v4988_v36 = vpack.c.bf16 %v872_v0, %v871_v4  ;;  %v835_v4 = vld [vmem:[%s8476_s1 + $0x310] sm:$0xff]  ;;  %v838_v0 = vld [vmem:[%s8476_s1 + $0x328] sm:$0xff] }
 0x151   : > { %v6775_v21 = vsel %vm590_vm1, %v657_v50, %v659_v40  ;;  %v6823_v50 = vld [vmem:[%s5905_s28 + $0x188] sm:$0xff]  ;;  %v5004_v40 = vpack.c.bf16 %v880_v23, %v879_v30  ;;  %v852_v30 = vld [vmem:[%s8476_s1 + $0x398] sm:$0xff] }
 0x152   : > { %1296 = vmatmul.mubr.f32.gmra.mrb[50].mxu0 %v6750_v57  ;;  %4989 = vmatprep.subr.bf16.mxu1 %v4988_v36  ;;  %v8646_v23 = vld [vmem:[#allocation7_spill] sm:$0xff] }
 0x153   : > { %1300 = vmatprep.mubr.f32.mxu0 %v6424_v27  ;;  %v874_v27 = vld [vmem:[%s8476_s1 + $0x448] sm:$0xff]  ;;  %4991 = vmatpush3.bf16.msra.mxu1 %v4988_v36  ;;  %v839_v36 = vld [vmem:[%s8476_s1 + $0x330] sm:$0xff] }
 0x154   : > { %v4992_v56 = vpack.c.bf16 %v874_v27, %v873_v49  ;;  %v840_v49 = vld [vmem:[%s8476_s1 + $0x338] sm:$0xff]  ;;  %v841_v27 = vld [vmem:[%s8476_s1 + $0x340] sm:$0xff] }
 0x156   : > { %1301 = vmatmul.mubr.f32.gmra.mrb[52].mxu0 %v6766_v58  ;;  %4993 = vmatprep.subr.bf16.mxu1 %v4992_v56 }
 0x157   : > { %1305 = vmatprep.mubr.f32.mxu0 %v6427_v26  ;;  %v6791_v26 = vsel %vm590_vm1, %v661_v61, %v662_v34  ;;  %4995 = vmatpush3.bf16.msra.mxu1 %v4992_v56  ;;  %v836_v61 = vld [vmem:[%s8476_s1 + $0x318] sm:$0xff]  ;;  %v843_v56 = vld [vmem:[%s8476_s1 + $0x350] sm:$0xff] }
 0x158   : > { %4997 = vmatprep.subr.bf16.mxu1 %v4996_v43  ;;  %v4932_v34 = vpack.c.bf16 %v836_v61, %v835_v4  ;;  %v856_v4 = vld [vmem:[%s8476_s1 + $0x3b8] sm:$0xff]  ;;  %v8648_v61 = vld [vmem:[#allocation9_spill] sm:$0xff] }
 0x15a   : > { %1306 = vmatmul.mubr.f32.gmra.mrb[54].mxu0 %v6775_v21 }
 0x15b   : > { %1310 = vmatprep.mubr.f32.mxu0 %v6446_v37  ;;  %v878_v37 = vld [vmem:[%s8476_s1 + $0x468] sm:$0xff]  ;;  %4999 = vmatpush3.bf16.msra.mxu1 %v4996_v43  ;;  %v848_v43 = vld [vmem:[%s8476_s1 + $0x378] sm:$0xff] }
 0x15c   : > { %v5000_v38 = vpack.c.bf16 %v878_v37, %v877_v32  ;;  %v849_v32 = vld [vmem:[%s8476_s1 + $0x380] sm:$0xff]  ;;  %v850_v37 = vld [vmem:[%s8476_s1 + $0x388] sm:$0xff] }
 0x15e   : > { %1311 = vmatmul.mubr.f32.gmra.mrb[56].mxu0 %v6791_v26  ;;  %5001 = vmatprep.subr.bf16.mxu1 %v5000_v38 }
 0x15f   : > { %1315 = vmatprep.mubr.f32.mxu0 %v6449_v35  ;;  %v6819_v35 = vsel %vm590_vm1, %v666_v14, %v667_v16  ;;  %5003 = vmatpush3.bf16.msra.mxu1 %v5000_v38  ;;  %v845_v14 = vld [vmem:[%s8476_s1 + $0x360] sm:$0xff]  ;;  %v846_v16 = vld [vmem:[%s8476_s1 + $0x368] sm:$0xff]  ;;  %v851_v38 = vld [vmem:[%s8476_s1 + $0x390] sm:$0xff] }
 0x160   : > { %5005 = vmatprep.subr.bf16.mxu1 %v5004_v40 }
 0x162   : > { %1316 = vmatmul.mubr.f32.gmra.mrb[58].mxu0 %v6800_v19 }
 0x163   : > { %1320 = vmatprep.mubr.f32.mxu0 %v6808_v44  ;;  %5007 = vmatpush3.bf16.msra.mxu1 %v5004_v40  ;;  %v8647_v40 = vld [vmem:[#allocation8_spill] sm:$0xff] }
 0x166   : > { %1321 = vmatmul.mubr.f32.gmra.mrb[60].mxu0 %v6819_v35  ;;  %4577 = vmatmul.mubr.f32.vlgmr.msra.gmra.mrb[0].mxu1 %v6539_v22 }
 0x167   : > { %1325 = vmatprep.mubr.f32.mxu0 %v6823_v50  ;;  %4579 = vmatprep.mubr.f32.mxu1 %v6553_v15 }
 0x16a   : > { %1326 = vmatmul.mubr.f32.gmra.mrb[62].mxu0 %v6831_v54  ;;  %4580 = vmatmul.mubr.f32.gmra.mrb[2].mxu1 %v6566_v47 }
 0x16b   : > { %1395 = vmatprep.mubr.f32.mxu0 %v6502_v5  ;;  %v837_v5 = vld [vmem:[%s8476_s1 + $0x320] sm:$0xff]  ;;  %4582 = vmatprep.mubr.f32.mxu1 %v6580_v45 }
 0x16e   : > { %1396 = vmatmul.mubr.f32.vlgmr.msra.gmra.mrb[0].mxu0 %v6045_v9  ;;  %4583 = vmatmul.mubr.f32.gmra.mrb[4].mxu1 %v6593_v11 }
 0x16f   : > { %4930 = vmatpush1.bf16.msra.mxu0 %v4929_v60  ;;  %1400 = vmatprep.mubr.f32.mxu0 %v6515_v13  ;;  %v4935_v13 = vpack.c.bf16 %v838_v0, %v837_v5  ;;  %v855_v60 = vld [vmem:[%s8476_s1 + $0x3b0] sm:$0xff]  ;;  %v858_v5 = vld [vmem:[%s8476_s1 + $0x3c8] sm:$0xff] }
 0x170   : > { %4931 = vmatprep.subr.bf16.mxu0 %v8643_v1  ;;  %4585 = vmatprep.mubr.f32.mxu1 %v6607_v59  ;;  %v8649_v0 = vld [vmem:[#allocation10_spill] sm:$0xff] }
 0x172   : > { %1401 = vmatmul.mubr.f32.gmra.mrb[2].mxu0 %v6067_v18  ;;  %4586 = vmatmul.mubr.f32.gmra.mrb[6].mxu1 %v6620_v51 }
 0x173   : > { %1405 = vmatprep.mubr.f32.mxu0 %v6122_v39  ;;  %4933 = vmatpush1.bf16.msra.mxu0 %v4932_v34  ;;  %v4938_v39 = vpack.c.bf16 %v840_v49, %v839_v36  ;;  %v857_v34 = vld [vmem:[%s8476_s1 + $0x3c0] sm:$0xff]  ;;  %v860_v36 = vld [vmem:[%s8476_s1 + $0x3d8] sm:$0xff] }
 0x174   : > { %4934 = vmatprep.subr.bf16.mxu0 %v8643_v1  ;;  %4588 = vmatprep.mubr.f32.mxu1 %v6634_v20  ;;  %v8650_v49 = vld [vmem:[#allocation11_spill] sm:$0xff] }
 0x176   : > { %1406 = vmatmul.mubr.f32.gmra.mrb[4].mxu0 %v6084_v24  ;;  %4589 = vmatmul.mubr.f32.gmra.mrb[8].mxu1 %v6647_v6 }
 0x177   : > { %1410 = vmatprep.mubr.f32.mxu0 %v6539_v22  ;;  %4936 = vmatpush1.bf16.msra.mxu0 %v4935_v13  ;;  %v4941_v22 = vpack.c.bf16 %v842_v52, %v841_v27  ;;  %v859_v13 = vld [vmem:[%s8476_s1 + $0x3d0] sm:$0xff]  ;;  %v713_v27 = vrot.slane %v6808_v44, 2  ;;  %v714_v52 = vrot.slane %v6823_v50, 2 }
 0x178   : > { %4937 = vmatprep.subr.bf16.mxu0 %v8643_v1  ;;  %4591 = vmatprep.mubr.f32.mxu1 %v6661_v42 }
 0x17a   : > { %1411 = vmatmul.mubr.f32.gmra.mrb[6].mxu0 %v6105_v33  ;;  %4592 = vmatmul.mubr.f32.gmra.mrb[10].mxu1 %v6674_v8 }
 0x17b   : > { %1415 = vmatprep.mubr.f32.mxu0 %v6553_v15  ;;  %4939 = vmatpush1.bf16.msra.mxu0 %v4938_v39  ;;  %v4944_v15 = vpack.c.bf16 %v844_v7, %v843_v56  ;;  %v6984_v39 = vld [vmem:[%s5905_s28 + $0x190] sm:$0x3]  ;;  %v862_v56 = vld [vmem:[%s8476_s1 + $0x3e8] sm:$0xff]  ;;  %v8651_v7 = vld [vmem:[#allocation12_spill] sm:$0xff] }
 0x17c   : > { %4940 = vmatprep.subr.bf16.mxu0 %v8643_v1  ;;  %4594 = vmatprep.mubr.f32.mxu1 %v6682_v46 }
 0x17e   : > { %1416 = vmatmul.mubr.f32.gmra.mrb[8].mxu0 %v6128_v41  ;;  %4595 = vmatmul.mubr.f32.gmra.mrb[12].mxu1 %v6689_v3 }
 0x17f   : > { %1420 = vmatprep.mubr.f32.mxu0 %v6566_v47  ;;  %4942 = vmatpush1.bf16.msra.mxu0 %v4941_v22  ;;  %v4947_v47 = vpack.c.bf16 %v846_v16, %v845_v14  ;;  %v861_v22 = vld [vmem:[%s8476_s1 + $0x3e0] sm:$0xff]  ;;  %v715_v14 = vsel %vm590_vm1, %v713_v27, %v714_v52  ;;  %v863_v16 = vld [vmem:[%s8476_s1 + $0x3f0] sm:$0xff] }
 0x180   : > { %4943 = vmatprep.subr.bf16.mxu0 %v8643_v1  ;;  %4597 = vmatprep.mubr.f32.mxu1 %v6696_v25 }
 0x182   : > { %1421 = vmatmul.mubr.f32.gmra.mrb[10].mxu0 %v6147_v48  ;;  %4598 = vmatmul.mubr.f32.gmra.mrb[14].mxu1 %v6702_v63 }
 0x183   : > { %1425 = vmatprep.mubr.f32.mxu0 %v6580_v45  ;;  %4945 = vmatpush1.bf16.msra.mxu0 %v4944_v15  ;;  %v4950_v45 = vpack.c.bf16 %v848_v43, %v847_v17  ;;  %v4971_v15 = vpack.c.bf16 %v862_v56, %v861_v22  ;;  %v8652_v43 = vld [vmem:[#allocation13_spill] sm:$0xff]  ;;  %v2124_v22 = vld [vmem:[%s8477_s2 + $0x40] sm:$0xff] }
 0x184   : > { %4946 = vmatprep.subr.bf16.mxu0 %v8643_v1  ;;  %4600 = vmatprep.mubr.f32.mxu1 %v6709_v53 }
 0x186   : > { %1426 = vmatmul.mubr.f32.gmra.mrb[12].mxu0 %v6164_v55  ;;  %4601 = vmatmul.mubr.f32.gmra.mrb[16].mxu1 %v6715_v31 }
 0x187   : > { %1430 = vmatprep.mubr.f32.mxu0 %v6593_v11  ;;  %4948 = vmatpush1.bf16.msra.mxu0 %v4947_v47  ;;  %v4953_v11 = vpack.c.bf16 %v850_v37, %v849_v32  ;;  %v864_v47 = vld [vmem:[%s8476_s1 + $0x3f8] sm:$0xff]  ;;  %v8655_v37 = vld [vmem:[#allocation16_spill] sm:$0xff] }
 0x188   : > { %4949 = vmatprep.subr.bf16.mxu0 %v8643_v1  ;;  %4603 = vmatprep.mubr.f32.mxu1 %v6722_v28  ;;  %v8654_v32 = vld [vmem:[#allocation15_spill] sm:$0xff] }
 0x18a   : > { %1431 = vmatmul.mubr.f32.gmra.mrb[14].mxu0 %v8645_v2  ;;  %4604 = vmatmul.mubr.f32.gmra.mrb[18].mxu1 %v6728_v29 }
 0x18b   : > { %1435 = vmatprep.mubr.f32.mxu0 %v6607_v59  ;;  %4951 = vmatpush1.bf16.msra.mxu0 %v4950_v45  ;;  %v4956_v59 = vpack.c.bf16 %v852_v30, %v851_v38  ;;  %v8653_v45 = vld [vmem:[#allocation14_spill] sm:$0xff]  ;;  %v8658_v38 = vld [vmem:[#allocation19_spill] sm:$0xff] }
 0x18c   : > { %4952 = vmatprep.subr.bf16.mxu0 %v8643_v1  ;;  %4606 = vmatprep.mubr.f32.mxu1 %v6741_v62  ;;  %v2118_v30 = vld [vmem:[%s8477_s2 + $0x10] sm:$0xff] }
 0x18e   : > { %1436 = vmatmul.mubr.f32.gmra.mrb[16].mxu0 %v8646_v23  ;;  %4607 = vmatmul.mubr.f32.gmra.mrb[20].mxu1 %v6750_v57 }
 0x18f   : > { %1440 = vmatprep.mubr.f32.mxu0 %v6620_v51  ;;  %4954 = vmatpush1.bf16.msra.mxu0 %v4953_v11  ;;  %v4959_v51 = vpack.c.bf16 %v854_v12, %v853_v10  ;;  %v8656_v11 = vld [vmem:[#allocation17_spill] sm:$0xff]  ;;  %v8666_v10 = vld [vmem:[#allocation27_spill] sm:$0xff]  ;;  %v707_v12 = vrot.slane %v6823_v50, 1 }
 0x190   : > { %4955 = vmatprep.subr.bf16.mxu0 %v8643_v1  ;;  %4609 = vmatprep.mubr.f32.mxu1 %v6766_v58 }
 0x192   : > { %1441 = vmatmul.mubr.f32.gmra.mrb[18].mxu0 %v8647_v40  ;;  %4610 = vmatmul.mubr.f32.gmra.mrb[22].mxu1 %v6775_v21 }
 0x193   : > { %1445 = vmatprep.mubr.f32.mxu0 %v6634_v20  ;;  %4957 = vmatpush1.bf16.msra.mxu0 %v4956_v59  ;;  %v4962_v20 = vpack.c.bf16 %v856_v4, %v855_v60  ;;  %v7063_v60 = vld [vmem:[%s5905_s28 + $0x1a0] sm:$0xff] }
 0x194   : > { %4958 = vmatprep.subr.bf16.mxu0 %v8643_v1  ;;  %4612 = vmatprep.mubr.f32.mxu1 %v6791_v26 }
 0x196   : > { %1446 = vmatmul.mubr.f32.gmra.mrb[20].mxu0 %v8648_v61  ;;  %4613 = vmatmul.mubr.f32.gmra.mrb[24].mxu1 %v6800_v19 }
 0x197   : > { %1450 = vmatprep.mubr.f32.mxu0 %v6647_v6  ;;  %4960 = vmatpush1.bf16.msra.mxu0 %v4959_v51  ;;  %v4965_v6 = vpack.c.bf16 %v858_v5, %v857_v34  ;;  %v7060_v51 = vld [vmem:[%s5905_s28 + $0x198] sm:$0xff]  ;;  %v8667_v34 = vld [vmem:[#allocation28_spill] sm:$0xff] }
 0x198   : > { %4961 = vmatprep.subr.bf16.mxu0 %v8643_v1  ;;  %4615 = vmatprep.mubr.f32.mxu1 %v6819_v35  ;;  %v730_v4 = vrot.slane %v7060_v51, 2 }
 0x19a   : > { %1451 = vmatmul.mubr.f32.gmra.mrb[22].mxu0 %v8649_v0  ;;  %4616 = vmatmul.mubr.f32.gmra.mrb[26].mxu1 %v6831_v54 }
 0x19b   : > { %1455 = vmatprep.mubr.f32.mxu0 %v6661_v42  ;;  %4963 = vmatpush1.bf16.msra.mxu0 %v4962_v20  ;;  %v4968_v42 = vpack.c.bf16 %v860_v36, %v859_v13  ;;  %v731_v20 = vrot.slane %v7063_v60, 2 }
 0x19c   : > { %4964 = vmatprep.subr.bf16.mxu0 %v8643_v1  ;;  %4618 = vmatprep.mubr.f32.mxu1 %v715_v14 }
 0x19d   : > { %v732_v36 = vsel %vm590_vm1, %v730_v4, %v731_v20  ;;  %v2872_v4 = vld [vmem:[#allocation3 + $0x8] sm:$0xff] }
 0x19e   : > { %1456 = vmatmul.mubr.f32.gmra.mrb[24].mxu0 %v8650_v49 }
 0x19f   : > { %1460 = vmatprep.mubr.f32.mxu0 %v6674_v8  ;;  %4966 = vmatpush1.bf16.msra.mxu0 %v4965_v6  ;;  %v716_v8 = vrot.slane %v6984_v39, 2  ;;  %v709_v6 = vrot.slane %v6984_v39, 1  ;;  %v2122_v39 = vld [vmem:[%s8477_s2 + $0x30] sm:$0xff] }
 0x1a0   : > { %4967 = vmatprep.subr.bf16.mxu0 %v8643_v1 }
 0x1a1   : > { %v7011_v17 = vsel %vm590_vm1, %v714_v52, %v716_v8  ;;  %v7087_v27 = vsel %vm477_vm0, %v707_v12, %v709_v6  ;;  %v2123_v52 = vld [vmem:[%s8477_s2 + $0x38] sm:$0xff]  ;;  %v5677_v6 = vld [vmem:[%s5905_s28 + $0x68] sm:$0xff] }
 0x1a2   : > { %1461 = vmatmul.mubr.f32.gmra.mrb[26].mxu0 %v8651_v7  ;;  %4619 = vmatmul.mubr.f32.gmra.mrb[28].mxu1 %v7011_v17  ;;  %v5020_v56 = vpack.c.bf16 %v2123_v52, %v2122_v39  ;;  %v5678_v39 = vld [vmem:[%s5905_s28 + $0x78] sm:$0xff] }
 0x1a3   : > { %1465 = vmatprep.mubr.f32.mxu0 %v6682_v46  ;;  %4969 = vmatpush1.bf16.msra.mxu0 %v4968_v42  ;;  %v4974_v46 = vpack.c.bf16 %v864_v47, %v863_v16  ;;  %v5672_v16 = vld [vmem:[%s5905_s28 + $0x30] sm:$0xff] }
 0x1a4   : > { %4970 = vmatprep.subr.bf16.mxu0 %v8643_v1  ;;  %4621 = vmatprep.mubr.f32.mxu1 %v732_v36  ;;  %v2875_v36 = vld [vmem:[#allocation3 + $0x20] sm:$0xff] }
 0x1a6   : > { %1466 = vmatmul.mubr.f32.gmra.mrb[28].mxu0 %v8652_v43 }
 0x1a7   : > { %1470 = vmatprep.mubr.f32.mxu0 %v6689_v3  ;;  %4972 = vmatpush1.bf16.msra.mxu0 %v4971_v15  ;;  %v8657_v3 = vld [vmem:[#allocation18_spill] sm:$0xff] }
 0x1a8   : > { %4973 = vmatprep.subr.bf16.mxu0 %v8643_v1  ;;  %v2126_v15 = vld [vmem:[%s8477_s2 + $0x50] sm:$0xff] }
 0x1aa   : > { %1471 = vmatmul.mubr.f32.gmra.mrb[30].mxu0 %v8653_v45 }
 0x1ab   : > { %1475 = vmatprep.mubr.f32.mxu0 %v6696_v25  ;;  %4975 = vmatpush1.bf16.msra.mxu0 %v4974_v46  ;;  %v8659_v25 = vld [vmem:[#allocation20_spill] sm:$0xff]  ;;  %v2129_v46 = vld [vmem:[%s8477_s2 + $0x68] sm:$0xff] }
 0x1ae   : > { %1476 = vmatmul.mubr.f32.gmra.mrb[32].mxu0 %v8654_v32 }
 0x1af   : > { %1480 = vmatprep.mubr.f32.mxu0 %v6702_v63  ;;  %v8660_v63 = vld [vmem:[#allocation21_spill] sm:$0xff] }
 0x1b2   : > { %1481 = vmatmul.mubr.f32.gmra.mrb[34].mxu0 %v8655_v37 }
 0x1b3   : > { %1485 = vmatprep.mubr.f32.mxu0 %v6709_v53  ;;  %v8661_v53 = vld [vmem:[#allocation22_spill] sm:$0xff] }
 0x1b6   : > { %1486 = vmatmul.mubr.f32.gmra.mrb[36].mxu0 %v8656_v11 }
 0x1b7   : > { %1490 = vmatprep.mubr.f32.mxu0 %v6715_v31  ;;  %v8662_v31 = vld [vmem:[#allocation23_spill] sm:$0xff] }
 0x1ba   : > { %1491 = vmatmul.mubr.f32.gmra.mrb[38].mxu0 %v8657_v3 }
 0x1bb   : > { %1495 = vmatprep.mubr.f32.mxu0 %v6722_v28  ;;  %v8663_v28 = vld [vmem:[#allocation24_spill] sm:$0xff] }
 0x1be   : > { %1496 = vmatmul.mubr.f32.gmra.mrb[40].mxu0 %v8658_v38 }
 0x1bf   : > { %1500 = vmatprep.mubr.f32.mxu0 %v6728_v29  ;;  %v2116_v29 = vld [vmem:[%s8477_s2] sm:$0xff] }
 0x1c2   : > { %1501 = vmatmul.mubr.f32.gmra.mrb[42].mxu0 %v8659_v25 }
 0x1c3   : > { %1505 = vmatprep.mubr.f32.mxu0 %v6741_v62  ;;  %v2117_v62 = vld [vmem:[%s8477_s2 + $0x8] sm:$0xff] }
 0x1c6   : > { %1506 = vmatmul.mubr.f32.gmra.mrb[44].mxu0 %v8660_v63 }
 0x1c7   : > { %1510 = vmatprep.mubr.f32.mxu0 %v6750_v57  ;;  %v5008_v57 = vpack.c.bf16 %v2117_v62, %v2116_v29  ;;  %v5673_v29 = vld [vmem:[%s5905_s28 + $0x38] sm:$0xff] }
 0x1c9   : > { %5009 = vmatprep.subr.bf16.mxu1 %v5008_v57 }
 0x1ca   : > { %1511 = vmatmul.mubr.f32.gmra.mrb[46].mxu0 %v8661_v53  ;;  %5011 = vmatpush3.bf16.msra.mxu1 %v5008_v57  ;;  %v2130_v57 = vld [vmem:[%s8477_s2 + $0x70] sm:$0xff] }
 0x1cb   : > { %1515 = vmatprep.mubr.f32.mxu0 %v6766_v58  ;;  %v8664_v58 = vld [vmem:[#allocation25_spill] sm:$0xff] }
 0x1ce   : > { %1516 = vmatmul.mubr.f32.gmra.mrb[48].mxu0 %v8662_v31 }
 0x1cf   : > { %1520 = vmatprep.mubr.f32.mxu0 %v6775_v21  ;;  %v8665_v21 = vld [vmem:[#allocation26_spill] sm:$0xff] }
 0x1d2   : > { %1521 = vmatmul.mubr.f32.gmra.mrb[50].mxu0 %v8663_v28 }
 0x1d3   : > { %1525 = vmatprep.mubr.f32.mxu0 %v6791_v26  ;;  %v2119_v26 = vld [vmem:[%s8477_s2 + $0x18] sm:$0xff] }
 0x1d4   : > { %v5012_v59 = vpack.c.bf16 %v2119_v26, %v2118_v30  ;;  %v2131_v30 = vld [vmem:[%s8477_s2 + $0x78] sm:$0xff]  ;;  %v5674_v26 = vld [vmem:[%s5905_s28 + $0x48] sm:$0xff] }
 0x1d6   : > { %1526 = vmatmul.mubr.f32.gmra.mrb[52].mxu0 %v8664_v58  ;;  %5013 = vmatprep.subr.bf16.mxu1 %v5012_v59 }
 0x1d7   : > { %1530 = vmatprep.mubr.f32.mxu0 %v6800_v19  ;;  %5015 = vmatpush3.bf16.msra.mxu1 %v5012_v59  ;;  %v706_v19 = vrot.slane %v6808_v44, 1  ;;  %v2121_v44 = vld [vmem:[%s8477_s2 + $0x28] sm:$0xff]  ;;  %v5036_v59 = vpack.c.bf16 %v2131_v30, %v2130_v57 }
 0x1d8   : > { %v2890_v57 = vld [vmem:[#allocation3 + $0x98] sm:$0xff] }
 0x1d9   : > { %v7079_v5 = vsel %vm477_vm0, %v706_v19, %v707_v12  ;;  %v5675_v19 = vld [vmem:[%s5905_s28 + $0x50] sm:$0xff] }
 0x1da   : > { %1531 = vmatmul.mubr.f32.gmra.mrb[54].mxu0 %v8665_v21  ;;  %v2871_v12 = vld [vmem:[#allocation3] sm:$0xff] }
 0x1db   : > { %1535 = vmatprep.mubr.f32.mxu0 %v6819_v35  ;;  %v7068_v35 = vld [vmem:[%s5905_s28 + $0x1a8] sm:$0x3] }
 0x1dc   : > { %v733_v50 = vrot.slane %v7068_v35, 2 }
 0x1de   : > { %1536 = vmatmul.mubr.f32.gmra.mrb[56].mxu0 %v8666_v10  ;;  %v734_v42 = vsel %vm590_vm1, %v731_v20, %v733_v50  ;;  %v5676_v20 = vld [vmem:[%s5905_s28 + $0x60] sm:$0xff]  ;;  %v2874_v50 = vld [vmem:[#allocation3 + $0x18] sm:$0xff] }
 0x1df   : > { %1540 = vmatprep.mubr.f32.mxu0 %v6831_v54  ;;  %v2120_v54 = vld [vmem:[%s8477_s2 + $0x20] sm:$0xff]  ;;  %4622 = vmatmul.mubr.f32.gmra.mrb[30].mxu1 %v734_v42  ;;  %v2876_v42 = vld [vmem:[#allocation3 + $0x28] sm:$0xff] }
 0x1e0   : > { %v5016_v13 = vpack.c.bf16 %v2121_v44, %v2120_v54  ;;  %4656 = vmatprep.mubr.f32.mxu1 %v6045_v9  ;;  %v2125_v9 = vld [vmem:[%s8477_s2 + $0x48] sm:$0xff]  ;;  %v5041_v54 = vpack.c.bf16 %v2872_v4, %v2871_v12  ;;  %v2873_v44 = vld [vmem:[#allocation3 + $0x10] sm:$0xff]  ;;  %v5047_v52 = vpack.c.bf16 %v2876_v42, %v2875_v36 }
 0x1e1   : > { %v5024_v8 = vpack.c.bf16 %v2125_v9, %v2124_v22  ;;  %v2878_v22 = vld [vmem:[#allocation3 + $0x38] sm:$0xff]  ;;  %v2880_v9 = vld [vmem:[#allocation3 + $0x48] sm:$0xff]  ;;  %v2893_v12 = vld [vmem:[#allocation3 + $0xb0] sm:$0xff] }
 0x1e2   : > { %1541 = vmatmul.mubr.f32.gmra.mrb[58].mxu0 %v8667_v34  ;;  %5017 = vmatprep.subr.bf16.mxu1 %v5016_v13  ;;  %v5687_v4 = vld [vmem:[%s5905_s28 + $0xe0] sm:$0xff] }
 0x1e3   : > { %1545 = vmatprep.mubr.f32.mxu0 %v715_v14  ;;  %5019 = vmatpush3.bf16.msra.mxu1 %v5016_v13  ;;  %v2127_v14 = vld [vmem:[%s8477_s2 + $0x58] sm:$0xff]  ;;  %v5044_v13 = vpack.c.bf16 %v2874_v50, %v2873_v44  ;;  %v2999_v44 = vld [vmem:[#allocation3 + $0x400] sm:$0xff] }
 0x1e4   : > { %5021 = vmatprep.subr.bf16.mxu1 %v5020_v56  ;;  %v5028_v47 = vpack.c.bf16 %v2127_v14, %v2126_v15  ;;  %v2882_v15 = vld [vmem:[#allocation3 + $0x58] sm:$0xff]  ;;  %v3000_v50 = vld [vmem:[#allocation3 + $0x408] sm:$0xff] }
 0x1e6   : > { %1546 = vmatmul.mubr.f32.gmra.mrb[60].mxu0 %v7079_v5 }
 0x1e7   : > { %1550 = vmatprep.mubr.f32.mxu0 %v7011_v17  ;;  %5023 = vmatpush3.bf16.msra.mxu1 %v5020_v56  ;;  %v2128_v17 = vld [vmem:[%s8477_s2 + $0x60] sm:$0xff] }
 0x1e8   : > { %5025 = vmatprep.subr.bf16.mxu1 %v5024_v8  ;;  %v5032_v62 = vpack.c.bf16 %v2129_v46, %v2128_v17  ;;  %v2886_v17 = vld [vmem:[#allocation3 + $0x78] sm:$0xff] }
 0x1ea   : > { %1551 = vmatmul.mubr.f32.gmra.mrb[62].mxu0 %v7087_v27 }
 0x1eb   : > { %1620 = vmatprep.mubr.f32.mxu0 %v6084_v24  ;;  %5027 = vmatpush3.bf16.msra.mxu1 %v5024_v8 }
 0x1ec   : > { %5029 = vmatprep.subr.bf16.mxu1 %v5028_v47 }
 0x1ee   : > { %1621 = vmatmul.mubr.f32.vlgmr.msra.gmra.mrb[0].mxu0 %v5672_v16  ;;  %v2884_v16 = vld [vmem:[#allocation3 + $0x68] sm:$0xff] }
 0x1ef   : > { %1625 = vmatprep.mubr.f32.mxu0 %v6105_v33  ;;  %5031 = vmatpush3.bf16.msra.mxu1 %v5028_v47 }
 0x1f0   : > { %5033 = vmatprep.subr.bf16.mxu1 %v5032_v62 }
 0x1f2   : > { %1626 = vmatmul.mubr.f32.gmra.mrb[2].mxu0 %v5673_v29  ;;  %v2888_v29 = vld [vmem:[#allocation3 + $0x88] sm:$0xff] }
 0x1f3   : > { %1630 = vmatprep.mubr.f32.mxu0 %v6128_v41  ;;  %5035 = vmatpush3.bf16.msra.mxu1 %v5032_v62 }
 0x1f4   : > { %5037 = vmatprep.subr.bf16.mxu1 %v5036_v59 }
 0x1f6   : > { %1631 = vmatmul.mubr.f32.gmra.mrb[4].mxu0 %v5674_v26  ;;  %v2891_v26 = vld [vmem:[#allocation3 + $0xa0] sm:$0xff] }
 0x1f7   : > { %1635 = vmatprep.mubr.f32.mxu0 %v6147_v48  ;;  %5039 = vmatpush3.bf16.msra.mxu1 %v5036_v59  ;;  %v5686_v59 = vld [vmem:[%s5905_s28 + $0xd8] sm:$0xff] }
 0x1f8   : > { %5040 = vmatprep.subr.bf16.mxu1 %v8643_v1 }
 0x1fa   : > { %1636 = vmatmul.mubr.f32.gmra.mrb[6].mxu0 %v5675_v19  ;;  %4657 = vmatmul.mubr.f32.vlgmr.msra.gmra.mrb[32].mxu1 %v6067_v18  ;;  %v2877_v18 = vld [vmem:[#allocation3 + $0x30] sm:$0xff] }
 0x1fb   : > { %1640 = vmatprep.mubr.f32.mxu0 %v6164_v55  ;;  %5042 = vmatpush1.bf16.msra.mxu1 %v5041_v54  ;;  %v5050_v56 = vpack.c.bf16 %v2878_v22, %v2877_v18  ;;  %v5690_v54 = vld [vmem:[%s5905_s28 + $0x108] sm:$0xff]  ;;  %v2897_v22 = vld [vmem:[#allocation3 + $0xd0] sm:$0xff] }
 0x1fc   : > { %4659 = vmatprep.mubr.f32.mxu1 %v6084_v24  ;;  %5043 = vmatprep.subr.bf16.mxu1 %v8643_v1  ;;  %v5679_v24 = vld [vmem:[%s5905_s28 + $0x80] sm:$0xff]  ;;  %v3002_v18 = vld [vmem:[#allocation3 + $0x418] sm:$0xff] }
 0x1fe   : > { %1641 = vmatmul.mubr.f32.gmra.mrb[8].mxu0 %v5676_v20  ;;  %4660 = vmatmul.mubr.f32.gmra.mrb[34].mxu1 %v6105_v33  ;;  %v2879_v33 = vld [vmem:[#allocation3 + $0x40] sm:$0xff] }
 0x1ff   : > { %1645 = vmatprep.mubr.f32.mxu0 %v8645_v2  ;;  %5045 = vmatpush1.bf16.msra.mxu1 %v5044_v13  ;;  %v5053_v8 = vpack.c.bf16 %v2880_v9, %v2879_v33  ;;  %v2895_v13 = vld [vmem:[#allocation3 + $0xc0] sm:$0xff]  ;;  %v5776_v33 = vmov 0.0  }
 0x200   : > { %4662 = vmatprep.mubr.f32.mxu1 %v6128_v41  ;;  %5046 = vmatprep.subr.bf16.mxu1 %v8643_v1  ;;  %v5680_v41 = vld [vmem:[%s5905_s28 + $0x90] sm:$0xff]  ;;  %2435 = vst [vmem:[#allocation2] sm:$0xff] %v5776_v33  ;;  %2436 = vst [vmem:[#allocation2 + $0x8] sm:$0xff] %v5776_v33 }
 0x201   : > { %2437 = vst [vmem:[#allocation2 + $0x10] sm:$0x3] %v5776_v33  ;;  %2439 = vst [vmem:[#allocation2 + $0x198] sm:$0xff] %v5776_v33  ;;  %v3003_v9 = vld [vmem:[#allocation3 + $0x420] sm:$0xff] }
 0x202   : > { %1646 = vmatmul.mubr.f32.gmra.mrb[10].mxu0 %v5677_v6  ;;  %4663 = vmatmul.mubr.f32.gmra.mrb[36].mxu1 %v6147_v48  ;;  %v2881_v48 = vld [vmem:[#allocation3 + $0x50] sm:$0xff]  ;;  %v5232_v6 = vpack.c.bf16 %v3000_v50, %v2999_v44  ;;  %2441 = vst [vmem:[#allocation2 + $0x1a8] sm:$0x3] %v5776_v33  ;;  %2443 = vst [vmem:[#allocation2 + $0x18] sm:$0x1] %v5776_v33  ;;  %v2904_v44 = vld [vmem:[#allocation3 + $0x108] sm:$0xff] }
 0x203   : > { %1650 = vmatprep.mubr.f32.mxu0 %v8646_v23  ;;  %5048 = vmatpush1.bf16.msra.mxu1 %v5047_v52  ;;  %v5056_v14 = vpack.c.bf16 %v2882_v15, %v2881_v48  ;;  %2444 = vst [vmem:[#allocation2 + $0x30] sm:$0x1] %v5776_v33  ;;  %2445 = vst [vmem:[#allocation2 + $0x48] sm:$0x1] %v5776_v33  ;;  %v2899_v15 = vld [vmem:[#allocation3 + $0xe0] sm:$0xff] }
 0x204   : > { %4665 = vmatprep.mubr.f32.mxu1 %v6164_v55  ;;  %5049 = vmatprep.subr.bf16.mxu1 %v8643_v1  ;;  %v5681_v55 = vld [vmem:[%s5905_s28 + $0x98] sm:$0xff]  ;;  %2446 = vst [vmem:[#allocation2 + $0x60] sm:$0x1] %v5776_v33  ;;  %2447 = vst [vmem:[#allocation2 + $0x78] sm:$0x1] %v5776_v33 }
 0x205   : > { %5233 = vmatprep.subr.bf16.mxu0 %v5232_v6  ;;  %2448 = vst [vmem:[#allocation2 + $0x90] sm:$0x1] %v5776_v33  ;;  %2449 = vst [vmem:[#allocation2 + $0xa8] sm:$0x1] %v5776_v33 }
 0x206   : > { %1651 = vmatmul.mubr.f32.gmra.mrb[12].mxu0 %v5678_v39  ;;  %4666 = vmatmul.mubr.f32.gmra.mrb[38].mxu1 %v8645_v2  ;;  %v2883_v2 = vld [vmem:[#allocation3 + $0x60] sm:$0xff]  ;;  %v5693_v39 = vld [vmem:[%s5905_s28 + $0x128] sm:$0xff]  ;;  %2450 = vst [vmem:[#allocation2 + $0xc0] sm:$0x1] %v5776_v33  ;;  %2451 = vst [vmem:[#allocation2 + $0xd8] sm:$0x1] %v5776_v33 }
 0x207   : > { %1655 = vmatprep.mubr.f32.mxu0 %v8647_v40  ;;  %5051 = vmatpush1.bf16.msra.mxu1 %v5050_v56  ;;  %v5059_v47 = vpack.c.bf16 %v2884_v16, %v2883_v2  ;;  %2452 = vst [vmem:[#allocation2 + $0xf0] sm:$0x1] %v5776_v33  ;;  %2453 = vst [vmem:[#allocation2 + $0x108] sm:$0x1] %v5776_v33  ;;  %v5695_v16 = vld [vmem:[%s5905_s28 + $0x140] sm:$0xff] }
 0x208   : > { %4668 = vmatprep.mubr.f32.mxu1 %v8646_v23  ;;  %5052 = vmatprep.subr.bf16.mxu1 %v8643_v1  ;;  %v5682_v23 = vld [vmem:[%s5905_s28 + $0xa8] sm:$0xff]  ;;  %2454 = vst [vmem:[#allocation2 + $0x120] sm:$0x1] %v5776_v33  ;;  %2455 = vst [vmem:[#allocation2 + $0x138] sm:$0x1] %v5776_v33 }
 0x209   : > { %5235 = vmatpush3.bf16.msra.mxu0 %v5232_v6  ;;  %2456 = vst [vmem:[#allocation2 + $0x150] sm:$0x1] %v5776_v33  ;;  %2457 = vst [vmem:[#allocation2 + $0x168] sm:$0x1] %v5776_v33  ;;  %v3013_v6 = vld [vmem:[#allocation3 + $0x470] sm:$0xff] }
 0x20a   : > { %1656 = vmatmul.mubr.f32.gmra.mrb[14].mxu0 %v5679_v24  ;;  %4669 = vmatmul.mubr.f32.gmra.mrb[40].mxu1 %v8647_v40  ;;  %v2885_v40 = vld [vmem:[#allocation3 + $0x70] sm:$0xff]  ;;  %v2898_v24 = vld [vmem:[#allocation3 + $0xd8] sm:$0xff]  ;;  %2458 = vst [vmem:[#allocation2 + $0x180] sm:$0x1] %v5776_v33  ;;  %2461 = vst [vmem:[#allocation2 + $0x29] sm:$0x1] %v5776_v33 }
 0x20b   : > { %1660 = vmatprep.mubr.f32.mxu0 %v8648_v61  ;;  %5054 = vmatpush1.bf16.msra.mxu1 %v5053_v8  ;;  %v5062_v46 = vpack.c.bf16 %v2886_v17, %v2885_v40  ;;  %v5080_v56 = vpack.c.bf16 %v2898_v24, %v2897_v22  ;;  %2462 = vst [vmem:[#allocation2 + $0x41] sm:$0x1] %v5776_v33  ;;  %2463 = vst [vmem:[#allocation2 + $0x59] sm:$0x1] %v5776_v33  ;;  %v2901_v40 = vld [vmem:[#allocation3 + $0xf0] sm:$0xff]  ;;  %v2902_v17 = vld [vmem:[#allocation3 + $0xf8] sm:$0xff] }
 0x20c   : > { %4671 = vmatprep.mubr.f32.mxu1 %v8648_v61  ;;  %5055 = vmatprep.subr.bf16.mxu1 %v8643_v1  ;;  %v5683_v61 = vld [vmem:[%s5905_s28 + $0xb0] sm:$0xff]  ;;  %2464 = vst [vmem:[#allocation2 + $0x71] sm:$0x1] %v5776_v33  ;;  %2465 = vst [vmem:[#allocation2 + $0x89] sm:$0x1] %v5776_v33  ;;  %v5701_v22 = vld [vmem:[%s5905_s28 + $0x188] sm:$0xff] }
 0x20d   : > { %2466 = vst [vmem:[#allocation2 + $0xa1] sm:$0x1] %v5776_v33  ;;  %2467 = vst [vmem:[#allocation2 + $0xb9] sm:$0x1] %v5776_v33  ;;  %v2905_v24 = vld [vmem:[#allocation3 + $0x110] sm:$0xff] }
 0x20e   : > { %1661 = vmatmul.mubr.f32.gmra.mrb[16].mxu0 %v5680_v41  ;;  %4672 = vmatmul.mubr.f32.gmra.mrb[42].mxu1 %v8649_v0  ;;  %2468 = vst [vmem:[#allocation2 + $0xd1] sm:$0x1] %v5776_v33  ;;  %2469 = vst [vmem:[#allocation2 + $0xe9] sm:$0x1] %v5776_v33  ;;  %v3004_v41 = vld [vmem:[#allocation3 + $0x428] sm:$0xff] }
 0x20f   : > { %1665 = vmatprep.mubr.f32.mxu0 %v8649_v0  ;;  %5057 = vmatpush1.bf16.msra.mxu1 %v5056_v14  ;;  %v2887_v0 = vld [vmem:[#allocation3 + $0x80] sm:$0xff]  ;;  %2470 = vst [vmem:[#allocation2 + $0x101] sm:$0x1] %v5776_v33  ;;  %2471 = vst [vmem:[#allocation2 + $0x119] sm:$0x1] %v5776_v33  ;;  %v5240_v48 = vpack.c.bf16 %v3004_v41, %v3003_v9  ;;  %v2908_v9 = vld [vmem:[#allocation3 + $0x128] sm:$0xff] }
 0x210   : > { %4674 = vmatprep.mubr.f32.mxu1 %v8650_v49  ;;  %5058 = vmatprep.subr.bf16.mxu1 %v8643_v1  ;;  %v5065_v62 = vpack.c.bf16 %v2888_v29, %v2887_v0  ;;  %2472 = vst [vmem:[#allocation2 + $0x131] sm:$0x1] %v5776_v33  ;;  %2473 = vst [vmem:[#allocation2 + $0x149] sm:$0x1] %v5776_v33  ;;  %v5696_v0 = vld [vmem:[%s5905_s28 + $0x150] sm:$0xff] }
 0x211   : > { %2474 = vst [vmem:[#allocation2 + $0x161] sm:$0x1] %v5776_v33  ;;  %2475 = vst [vmem:[#allocation2 + $0x179] sm:$0x1] %v5776_v33 }
 0x212   : > { %1666 = vmatmul.mubr.f32.gmra.mrb[18].mxu0 %v5681_v55  ;;  %4675 = vmatmul.mubr.f32.gmra.mrb[44].mxu1 %v8651_v7  ;;  %2476 = vst [vmem:[#allocation2 + $0x191] sm:$0x1] %v5776_v33  ;;  %2442 = vst [vmem:[#allocation2] sm:$0x1] %v5776_v33  ;;  %v2900_v55 = vld [vmem:[#allocation3 + $0xe8] sm:$0xff] }
 0x213   : > { %1670 = vmatprep.mubr.f32.mxu0 %v8650_v49  ;;  %5060 = vmatpush1.bf16.msra.mxu1 %v5059_v47  ;;  %v5684_v49 = vld [vmem:[%s5905_s28 + $0xc0] sm:$0xff]  ;;  %2459 = vst [vmem:[#allocation2 + $0x198] sm:$0x1] %v5776_v33  ;;  %2460 = vst [vmem:[#allocation2 + $0x11] sm:$0x1] %v5776_v33  ;;  %v5083_v2 = vpack.c.bf16 %v2900_v55, %v2899_v15 }
 0x214   : > { %4677 = vmatprep.mubr.f32.mxu1 %v8652_v43  ;;  %5061 = vmatprep.subr.bf16.mxu1 %v8643_v1  ;;  %2477 = vst [vmem:[#allocation2 + $0x1a9] sm:$0x1] %v5776_v33  ;;  %v2909_v55 = vld [vmem:[#allocation3 + $0x130] sm:$0xff] }
 0x216   : > { %1671 = vmatmul.mubr.f32.gmra.mrb[20].mxu0 %v5682_v23  ;;  %4678 = vmatmul.mubr.f32.gmra.mrb[46].mxu1 %v8653_v45  ;;  %v3006_v23 = vld [vmem:[#allocation3 + $0x438] sm:$0xff] }
 0x217   : > { %1675 = vmatprep.mubr.f32.mxu0 %v8651_v7  ;;  %5063 = vmatpush1.bf16.msra.mxu1 %v5062_v46  ;;  %v2889_v7 = vld [vmem:[#allocation3 + $0x90] sm:$0xff] }
 0x218   : > { %4680 = vmatprep.mubr.f32.mxu1 %v8654_v32  ;;  %5064 = vmatprep.subr.bf16.mxu1 %v8643_v1  ;;  %v5068_v30 = vpack.c.bf16 %v2890_v57, %v2889_v7 }
 0x219   : > { %v2511_v46 = vld [vmem:[#allocation2] sm:$0xff] }
 0x21a   : > { %1676 = vmatmul.mubr.f32.gmra.mrb[22].mxu0 %v5683_v61  ;;  %4681 = vmatmul.mubr.f32.gmra.mrb[48].mxu1 %v8655_v37  ;;  %v5086_v61 = vpack.c.bf16 %v2902_v17, %v2901_v40  ;;  %v2613_v29 = vrot.slane %v2511_v46, 1 }
 0x21b   : > { %1680 = vmatprep.mubr.f32.mxu0 %v8652_v43  ;;  %v5685_v43 = vld [vmem:[%s5905_s28 + $0xc8] sm:$0xff]  ;;  %5066 = vmatpush1.bf16.msra.mxu1 %v5065_v62  ;;  %v3008_v62 = vld [vmem:[#allocation3 + $0x448] sm:$0xff] }
 0x21c   : > { %4683 = vmatprep.mubr.f32.mxu1 %v8656_v11  ;;  %5067 = vmatprep.subr.bf16.mxu1 %v8643_v1 }
 0x21e   : > { %1681 = vmatmul.mubr.f32.gmra.mrb[24].mxu0 %v5684_v49  ;;  %4684 = vmatmul.mubr.f32.gmra.mrb[50].mxu1 %v8657_v3  ;;  %v2614_v49 = vrot.slane %v5776_v33, 1 }
 0x21f   : > { %1685 = vmatprep.mubr.f32.mxu0 %v8653_v45  ;;  %v2892_v45 = vld [vmem:[#allocation3 + $0xa8] sm:$0xff]  ;;  %5069 = vmatpush1.bf16.msra.mxu1 %v5068_v30 }
 0x220   : > { %v5071_v19 = vpack.c.bf16 %v2892_v45, %v2891_v26  ;;  %4686 = vmatprep.mubr.f32.mxu1 %v8658_v38  ;;  %5070 = vmatprep.subr.bf16.mxu1 %v8643_v1  ;;  %v2615_v57 = vsel %vm477_vm0, %v2613_v29, %v2614_v49  ;;  %v2513_v26 = vld [vmem:[#allocation2 + $0x10] sm:$0x3]  ;;  %v5697_v45 = vld [vmem:[%s5905_s28 + $0x158] sm:$0xff] }
 0x222   : > { %1686 = vmatmul.mubr.f32.gmra.mrb[26].mxu0 %v5685_v43  ;;  %4687 = vmatmul.mubr.f32.gmra.mrb[52].mxu1 %v8659_v25 }
 0x223   : > { %1690 = vmatprep.mubr.f32.mxu0 %v8654_v32  ;;  %v2894_v32 = vld [vmem:[#allocation3 + $0xb8] sm:$0xff]  ;;  %5072 = vmatpush1.bf16.msra.mxu1 %v5071_v19 }
 0x224   : > { %v5074_v20 = vpack.c.bf16 %v2894_v32, %v2893_v12  ;;  %4689 = vmatprep.mubr.f32.mxu1 %v8660_v63  ;;  %5073 = vmatprep.subr.bf16.mxu1 %v8643_v1  ;;  %v3010_v19 = vld [vmem:[#allocation3 + $0x458] sm:$0xff] }
 0x226   : > { %1691 = vmatmul.mubr.f32.gmra.mrb[28].mxu0 %v5686_v59  ;;  %4690 = vmatmul.mubr.f32.gmra.mrb[54].mxu1 %v8661_v53  ;;  %v3009_v59 = vld [vmem:[#allocation3 + $0x450] sm:$0xff] }
 0x227   : > { %1695 = vmatprep.mubr.f32.mxu0 %v8655_v37  ;;  %v5688_v37 = vld [vmem:[%s5905_s28 + $0xf0] sm:$0xff]  ;;  %5075 = vmatpush1.bf16.msra.mxu1 %v5074_v20  ;;  %v5252_v32 = vpack.c.bf16 %v3010_v19, %v3009_v59 }
 0x228   : > { %4692 = vmatprep.mubr.f32.mxu1 %v8662_v31  ;;  %5076 = vmatprep.subr.bf16.mxu1 %v8643_v1  ;;  %v3011_v20 = vld [vmem:[#allocation3 + $0x460] sm:$0xff] }
 0x22a   : > { %1696 = vmatmul.mubr.f32.gmra.mrb[30].mxu0 %v5687_v4  ;;  %4693 = vmatmul.mubr.f32.gmra.mrb[56].mxu1 %v8663_v28  ;;  %v5698_v4 = vld [vmem:[%s5905_s28 + $0x168] sm:$0xff] }
 0x22b   : > { %1700 = vmatprep.mubr.f32.mxu0 %v8656_v11  ;;  %v5689_v11 = vld [vmem:[%s5905_s28 + $0xf8] sm:$0xff]  ;;  %4695 = vmatprep.mubr.f32.mxu1 %v8664_v58 }
 0x22e   : > { %1701 = vmatmul.mubr.f32.gmra.mrb[32].mxu0 %v5688_v37  ;;  %4696 = vmatmul.mubr.f32.gmra.mrb[58].mxu1 %v8665_v21  ;;  %v3012_v37 = vld [vmem:[#allocation3 + $0x468] sm:$0xff] }
 0x22f   : > { %1705 = vmatprep.mubr.f32.mxu0 %v8657_v3  ;;  %4698 = vmatprep.mubr.f32.mxu1 %v8666_v10  ;;  %v5691_v3 = vld [vmem:[%s5905_s28 + $0x110] sm:$0xff] }
 0x232   : > { %1706 = vmatmul.mubr.f32.gmra.mrb[34].mxu0 %v5689_v11  ;;  %4699 = vmatmul.mubr.f32.gmra.mrb[60].mxu1 %v8667_v34  ;;  %v5256_v11 = vpack.c.bf16 %v3012_v37, %v3011_v20 }
 0x233   : > { %1710 = vmatprep.mubr.f32.mxu0 %v8658_v38  ;;  %4701 = vmatprep.mubr.f32.mxu1 %v7079_v5  ;;  %v5692_v38 = vld [vmem:[%s5905_s28 + $0x120] sm:$0xff] }
 0x236   : > { %1711 = vmatmul.mubr.f32.gmra.mrb[36].mxu0 %v5690_v54  ;;  %4702 = vmatmul.mubr.f32.gmra.mrb[62].mxu1 %v7087_v27 }
 0x237   : > { %1715 = vmatprep.mubr.f32.mxu0 %v8659_v25  ;;  %v2896_v25 = vld [vmem:[#allocation3 + $0xc8] sm:$0xff]  ;;  %3079 = vmatprep.mubr.f32.mxu1 %v2615_v57 }
 0x238   : > { %v5077_v42 = vpack.c.bf16 %v2896_v25, %v2895_v13  ;;  %v723_v13 = vrot.slane %v7060_v51, 1  ;;  %v724_v25 = vrot.slane %v7063_v60, 1 }
 0x239   : > { %v7208_v36 = vpop.f32.mrb[0].mxu1 }
 0x23a   : > { %1716 = vmatmul.mubr.f32.gmra.mrb[38].mxu0 %v5691_v3  ;;  %v7211_v52 = vpop.f32.mrb[1].mxu1  ;;  %5078 = vmatpush1.bf16.msra.mxu1 %v5077_v42  ;;  %v5699_v3 = vld [vmem:[%s5905_s28 + $0x170] sm:$0xff] }
 0x23b   : > { %1720 = vmatprep.mubr.f32.mxu0 %v8660_v63  ;;  %v3001_v63 = vld [vmem:[#allocation3 + $0x410] sm:$0xff]  ;;  %5079 = vmatprep.subr.bf16.mxu1 %v8643_v1 }
 0x23d   : > { %v7258_v8 = vpop.f32.mrb[2].mxu1 }
 0x23e   : > { %1721 = vmatmul.mubr.f32.gmra.mrb[40].mxu0 %v5692_v38  ;;  %5081 = vmatpush1.bf16.msra.mxu1 %v5080_v56  ;;  %v7261_v14 = vpop.f32.mrb[3].mxu1  ;;  %v2903_v38 = vld [vmem:[#allocation3 + $0x100] sm:$0xff]  ;;  %v2906_v56 = vld [vmem:[#allocation3 + $0x118] sm:$0xff] }
 0x23f   : > { %1725 = vmatprep.mubr.f32.mxu0 %v8661_v53  ;;  %v5236_v53 = vpack.c.bf16 %v3002_v18, %v3001_v63  ;;  %5082 = vmatprep.subr.bf16.mxu1 %v8643_v1  ;;  %v5089_v50 = vpack.c.bf16 %v2904_v44, %v2903_v38  ;;  %v726_v63 = vrot.slane %v7068_v35, 1  ;;  %v2922_v38 = vld [vmem:[#allocation3 + $0x198] sm:$0xff] }
 0x241   : > { %5237 = vmatprep.subr.bf16.mxu0 %v5236_v53  ;;  %v7269_v7 = vpop.f32.mrb[4].mxu1 }
 0x242   : > { %1726 = vmatmul.mubr.f32.gmra.mrb[42].mxu0 %v5693_v39  ;;  %5084 = vmatpush1.bf16.msra.mxu1 %v5083_v2  ;;  %v7273_v30 = vpop.f32.mrb[5].mxu1  ;;  %v5700_v39 = vld [vmem:[%s5905_s28 + $0x180] sm:$0xff]  ;;  %v2910_v2 = vld [vmem:[#allocation3 + $0x138] sm:$0xff] }
 0x243   : > { %1730 = vmatprep.mubr.f32.mxu0 %v8662_v31  ;;  %v5694_v31 = vld [vmem:[%s5905_s28 + $0x138] sm:$0xff]  ;;  %5239 = vmatpush3.bf16.msra.mxu0 %v5236_v53 }
 0x244   : > { %5241 = vmatprep.subr.bf16.mxu0 %v5240_v48  ;;  %5085 = vmatprep.subr.bf16.mxu1 %v8643_v1 }
 0x246   : > { %1731 = vmatmul.mubr.f32.gmra.mrb[44].mxu0 %v5694_v31  ;;  %5087 = vmatpush1.bf16.msra.mxu1 %v5086_v61  ;;  %v727_v31 = vsel %vm477_vm0, %v724_v25, %v726_v63  ;;  %v2913_v61 = vld [vmem:[#allocation3 + $0x150] sm:$0xff]  ;;  %v2926_v63 = vld [vmem:[#allocation3 + $0x1b8] sm:$0xff] }
 0x247   : > { %1735 = vmatprep.mubr.f32.mxu0 %v8663_v28  ;;  %v3005_v28 = vld [vmem:[#allocation3 + $0x430] sm:$0xff]  ;;  %5243 = vmatpush3.bf16.msra.mxu0 %v5240_v48 }
 0x248   : > { %v5244_v47 = vpack.c.bf16 %v3006_v23, %v3005_v28  ;;  %5088 = vmatprep.subr.bf16.mxu1 %v8643_v1  ;;  %v2912_v23 = vld [vmem:[#allocation3 + $0x148] sm:$0xff] }
 0x249   : > { %3080 = vmatmul.mubr.f32.vlgmr.msra.gmra.mrb[64].mxu1 %v2511_v46  ;;  %v2914_v46 = vld [vmem:[#allocation3 + $0x158] sm:$0xff] }
 0x24a   : > { %1736 = vmatmul.mubr.f32.gmra.mrb[46].mxu0 %v5695_v16  ;;  %5245 = vmatprep.subr.bf16.mxu0 %v5244_v47  ;;  %v5098_v16 = vpack.c.bf16 %v2910_v2, %v2909_v55  ;;  %v5104_v29 = vpack.c.bf16 %v2914_v46, %v2913_v61  ;;  %v7361_v55 = vld [vmem:[%s8479_s4] ss:$0 sm:$0xff] }
 0x24b   : > { %1740 = vmatprep.mubr.f32.mxu0 %v8664_v58  ;;  %v3007_v58 = vld [vmem:[#allocation3 + $0x440] sm:$0xff]  ;;  %5247 = vmatpush3.bf16.msra.mxu0 %v5244_v47 }
 0x24c   : > { %v5248_v43 = vpack.c.bf16 %v3008_v62, %v3007_v58  ;;  %5090 = vmatpush1.bf16.msra.mxu1 %v5089_v50  ;;  %v2915_v58 = vld [vmem:[#allocation3 + $0x160] sm:$0xff]  ;;  %v2916_v62 = vld [vmem:[#allocation3 + $0x168] sm:$0xff] }
 0x24d   : > { %5091 = vmatprep.subr.bf16.mxu1 %v8643_v1 }
 0x24e   : > { %1741 = vmatmul.mubr.f32.gmra.mrb[48].mxu0 %v5696_v0  ;;  %5249 = vmatprep.subr.bf16.mxu0 %v5248_v43 }
 0x24f   : > { %1745 = vmatprep.mubr.f32.mxu0 %v8665_v21  ;;  %v2616_v21 = vrot.slane %v2513_v26, 1  ;;  %5251 = vmatpush3.bf16.msra.mxu0 %v5248_v43  ;;  %v5107_v43 = vpack.c.bf16 %v2916_v62, %v2915_v58 }
 0x250   : > { %5253 = vmatprep.subr.bf16.mxu0 %v5252_v32 }
 0x251   : > { %v2617_v12 = vsel %vm477_vm0, %v2614_v49, %v2616_v21  ;;  %v2918_v21 = vld [vmem:[#allocation3 + $0x178] sm:$0xff] }
 0x252   : > { %1746 = vmatmul.mubr.f32.gmra.mrb[50].mxu0 %v5697_v45  ;;  %3084 = vmatprep.mubr.f32.mxu1 %v2617_v12  ;;  %v2917_v45 = vld [vmem:[#allocation3 + $0x170] sm:$0xff] }
 0x253   : > { %1750 = vmatprep.mubr.f32.mxu0 %v8666_v10  ;;  %3085 = vmatmul.mubr.f32.gmra.mrb[66].mxu1 %v5776_v33  ;;  %v7281_v10 = vpop.f32.mrb[6].mxu1  ;;  %v5092_v33 = vpack.c.bf16 %v2906_v56, %v2905_v24  ;;  %v5110_v19 = vpack.c.bf16 %v2918_v21, %v2917_v45  ;;  %v2932_v45 = vld [vmem:[#allocation3 + $0x1e8] sm:$0xff] }
 0x254   : > { %5255 = vmatpush3.bf16.msra.mxu0 %v5252_v32  ;;  %v7283_v54 = vpop.f32.mrb[7].mxu1  ;;  %v2919_v32 = vld [vmem:[#allocation3 + $0x180] sm:$0xff] }
 0x255   : > { %5257 = vmatprep.subr.bf16.mxu0 %v5256_v11  ;;  %v7294_v18 = vpop.f32.mrb[8].mxu1  ;;  %5093 = vmatpush1.bf16.msra.mxu1 %v5092_v33  ;;  %v2927_v33 = vld [vmem:[#allocation3 + $0x1c0] sm:$0xff] }
 0x256   : > { %1751 = vmatmul.mubr.f32.gmra.mrb[52].mxu0 %v5698_v4  ;;  %v7296_v53 = vpop.f32.mrb[9].mxu1  ;;  %5094 = vmatprep.subr.bf16.mxu1 %v8643_v1  ;;  %v2920_v4 = vld [vmem:[#allocation3 + $0x188] sm:$0xff] }
 0x257   : > { %1755 = vmatprep.mubr.f32.mxu0 %v8667_v34  ;;  %v3014_v34 = vld [vmem:[#allocation3 + $0x478] sm:$0xff]  ;;  %v7302_v35 = vpop.f32.mrb[10].mxu1  ;;  %v5113_v37 = vpack.c.bf16 %v2920_v4, %v2919_v32 }
 0x258   : > { %5259 = vmatpush3.bf16.msra.mxu0 %v5256_v11  ;;  %v5260_v42 = vpack.c.bf16 %v3014_v34, %v3013_v6  ;;  %v7305_v41 = vpop.f32.mrb[11].mxu1  ;;  %v2923_v34 = vld [vmem:[#allocation3 + $0x1a0] sm:$0xff] }
 0x259   : > { %v7308_v15 = vpop.f32.mrb[12].mxu1 }
 0x25a   : > { %1756 = vmatmul.mubr.f32.gmra.mrb[54].mxu0 %v5699_v3  ;;  %5261 = vmatprep.subr.bf16.mxu0 %v5260_v42  ;;  %v2921_v3 = vld [vmem:[#allocation3 + $0x190] sm:$0xff] }
 0x25b   : > { %1760 = vmatprep.mubr.f32.mxu0 %v7079_v5  ;;  %v725_v5 = vsel %vm477_vm0, %v723_v13, %v724_v25  ;;  %v5116_v50 = vpack.c.bf16 %v2922_v38, %v2921_v3  ;;  %v2924_v13 = vld [vmem:[#allocation3 + $0x1a8] sm:$0xff] }
 0x25c   : > { %5263 = vmatpush3.bf16.msra.mxu0 %v5260_v42  ;;  %v5119_v42 = vpack.c.bf16 %v2924_v13, %v2923_v34 }
 0x25e   : > { %1761 = vmatmul.mubr.f32.gmra.mrb[56].mxu0 %v5700_v39 }
 0x25f   : > { %1765 = vmatprep.mubr.f32.mxu0 %v7087_v27  ;;  %v2907_v27 = vld [vmem:[#allocation3 + $0x120] sm:$0xff] }
 0x260   : > { %v5095_v48 = vpack.c.bf16 %v2908_v9, %v2907_v27 }
 0x262   : > { %1766 = vmatmul.mubr.f32.gmra.mrb[58].mxu0 %v5701_v22  ;;  %5096 = vmatpush1.bf16.msra.mxu1 %v5095_v48 }
 0x263   : > { %1770 = vmatprep.mubr.f32.mxu0 %v725_v5  ;;  %5097 = vmatprep.subr.bf16.mxu1 %v8643_v1  ;;  %v2925_v5 = vld [vmem:[#allocation3 + $0x1b0] sm:$0xff] }
 0x264   : > { %v5122_v24 = vpack.c.bf16 %v2926_v63, %v2925_v5 }
 0x266   : > { %1771 = vmatmul.mubr.f32.gmra.mrb[60].mxu0 %v7060_v51  ;;  %v7310_v51 = vpop.f32.mrb[13].mxu1  ;;  %5099 = vmatpush1.bf16.msra.mxu1 %v5098_v16 }
 0x267   : > { %1775 = vmatprep.mubr.f32.mxu0 %v727_v31  ;;  %5100 = vmatprep.subr.bf16.mxu1 %v8643_v1  ;;  %v7313_v28 = vpop.f32.mrb[14].mxu1  ;;  %v2928_v31 = vld [vmem:[#allocation3 + $0x1c8] sm:$0xff] }
 0x268   : > { %v7315_v47 = vpop.f32.mrb[15].mxu1  ;;  %v5125_v9 = vpack.c.bf16 %v2928_v31, %v2927_v33 }
 0x269   : > { %v7318_v17 = vpop.f32.mrb[16].mxu1 }
 0x26a   : > { %1776 = vmatmul.mubr.f32.gmra.mrb[62].mxu0 %v7063_v60  ;;  %v2911_v60 = vld [vmem:[#allocation3 + $0x140] sm:$0xff]  ;;  %v7320_v0 = vpop.f32.mrb[17].mxu1 }
 0x26b   : > { %v5101_v40 = vpack.c.bf16 %v2912_v23, %v2911_v60  ;;  %v7323_v49 = vpop.f32.mrb[18].mxu1  ;;  %v2929_v60 = vld [vmem:[#allocation3 + $0x1d0] sm:$0xff]  ;;  %v2930_v23 = vld [vmem:[#allocation3 + $0x1d8] sm:$0xff] }
 0x26c   : > { %v7325_v57 = vpop.f32.mrb[19].mxu1  ;;  %v5128_v61 = vpack.c.bf16 %v2930_v23, %v2929_v60 }
 0x26d   : > { %5102 = vmatpush1.bf16.msra.mxu1 %v5101_v40  ;;  %v7328_v26 = vpop.f32.mrb[20].mxu1  ;;  %v7367_v40 = vld [vmem:[%s8480_s5] ss:$0 sm:$0xff] }
 0x26e   : > { %5103 = vmatprep.subr.bf16.mxu1 %v8643_v1  ;;  %v7330_v59 = vpop.f32.mrb[21].mxu1 }
 0x26f   : > { %v7333_v12 = vpop.f32.mrb[22].mxu1 }
 0x270   : > { %v7335_v20 = vpop.f32.mrb[23].mxu1 }
 0x271   : > { %5105 = vmatpush1.bf16.msra.mxu1 %v5104_v29  ;;  %v7338_v11 = vpop.f32.mrb[24].mxu1 }
 0x272   : > { %5106 = vmatprep.subr.bf16.mxu1 %v8643_v1  ;;  %v7340_v44 = vpop.f32.mrb[25].mxu1 }
 0x273   : > { %v7343_v6 = vpop.f32.mrb[26].mxu1 }
 0x274   : > { %v7345_v25 = vpop.f32.mrb[27].mxu1 }
 0x275   : > { %5108 = vmatpush1.bf16.msra.mxu1 %v5107_v43  ;;  %v7348_v39 = vpop.f32.mrb[28].mxu1 }
 0x276   : > { %5109 = vmatprep.subr.bf16.mxu1 %v8643_v1  ;;  %v7350_v22 = vpop.f32.mrb[29].mxu1 }
 0x279   : > { %5111 = vmatpush1.bf16.msra.mxu1 %v5110_v19 }
 0x27a   : > { %5112 = vmatprep.subr.bf16.mxu1 %v8643_v1 }
 0x27d   : > { %5114 = vmatpush1.bf16.msra.mxu1 %v5113_v37 }
 0x27e   : > { %5115 = vmatprep.subr.bf16.mxu1 %v8643_v1 }
 0x281   : > { %5117 = vmatpush1.bf16.msra.mxu1 %v5116_v50  ;;  %v2934_v50 = vld [vmem:[#allocation3 + $0x1f8] sm:$0xff] }
 0x282   : > { %5118 = vmatprep.subr.bf16.mxu1 %v8643_v1 }
 0x285   : > { %5120 = vmatpush1.bf16.msra.mxu1 %v5119_v42 }
 0x286   : > { %5121 = vmatprep.subr.bf16.mxu1 %v8643_v1 }
 0x289   : > { %5123 = vmatpush1.bf16.msra.mxu1 %v5122_v24 }
 0x28a   : > { %5124 = vmatprep.subr.bf16.mxu1 %v8643_v1 }
 0x28d   : > { %5126 = vmatpush1.bf16.msra.mxu1 %v5125_v9 }
 0x28e   : > { %5127 = vmatprep.subr.bf16.mxu1 %v8643_v1 }
 0x291   : > { %5129 = vmatpush1.bf16.msra.mxu1 %v5128_v61 }
 0x292   : > { %5130 = vmatprep.subr.bf16.mxu1 %v8643_v1 }
 0x2b2   : > { %v7353_v56 = vpop.f32.mrb[30].mxu1 }
 0x2b3   : > { %v7355_v27 = vpop.f32.mrb[31].mxu1 }
 0x2c1   : > { %v1622_v48 = vpop.f32.mrb[0].mxu0 }
 0x2c2   : > { %v1848_v2 = vadd.f32 %v7211_v52, %v1622_v48  ;;  %v1624_v16 = vpop.f32.mrb[1].mxu0  ;;  %v2931_v52 = vld [vmem:[#allocation3 + $0x1e0] sm:$0xff] }
 0x2c3   : > { %v5131_v21 = vpack.c.bf16 %v2932_v45, %v2931_v52 }
 0x2c4   : > { %v2013_v46 = vmul.f32 %v7361_v55, %v1848_v2 }
 0x2c5   : > { %v1627_v29 = vpop.f32.mrb[2].mxu0  ;;  %5132 = vmatpush1.bf16.msra.mxu1 %v5131_v21 }
 0x2c6   : > { %v2052_v58 = vadd.f32 %v7367_v40, %v2013_v46  ;;  %v1853_v62 = vadd.f32 %v7208_v36, %v1627_v29  ;;  %v1629_v43 = vpop.f32.mrb[3].mxu0  ;;  %5133 = vmatprep.subr.bf16.mxu1 %v8643_v1  ;;  %v2933_v36 = vld [vmem:[#allocation3 + $0x1f0] sm:$0xff] }
 0x2c7   : > { %v5134_v42 = vpack.c.bf16 %v2934_v50, %v2933_v36 }
 0x2c8   : > { %v2084_v19 = vmax.f32 %v2052_v58, 0.0  ;;  %v2014_v32 = vmul.f32 %v7361_v55, %v1853_v62 }
 0x2c9   : > { %v1632_v4 = vpop.f32.mrb[4].mxu0  ;;  %5135 = vmatpush1.bf16.msra.mxu1 %v5134_v42 }
 0x2ca   : > { %2479 = vst [vmem:[#allocation2 + $0x19] sm:$0xff] %v2084_v19  ;;  %v2053_v37 = vadd.f32 %v7367_v40, %v2014_v32  ;;  %v1858_v3 = vadd.f32 %v7261_v14, %v1632_v4  ;;  %v1634_v38 = vpop.f32.mrb[5].mxu0  ;;  %5136 = vmatprep.subr.bf16.mxu1 %v8643_v1 }
 0x2cc   : > { %v2085_v34 = vmax.f32 %v2053_v37, 0.0  ;;  %v2015_v13 = vmul.f32 %v7361_v55, %v1858_v3 }
 0x2cd   : > { %v1637_v5 = vpop.f32.mrb[6].mxu0 }
 0x2ce   : > { %2480 = vst [vmem:[#allocation2 + $0x21] sm:$0xff] %v2085_v34  ;;  %v2054_v63 = vadd.f32 %v7367_v40, %v2015_v13  ;;  %v1863_v24 = vadd.f32 %v7258_v8, %v1637_v5  ;;  %v1639_v33 = vpop.f32.mrb[7].mxu0 }
 0x2d0   : > { %v2086_v14 = vmax.f32 %v2054_v63, 0.0  ;;  %v2016_v31 = vmul.f32 %v7361_v55, %v1863_v24 }
 0x2d1   : > { %v1642_v9 = vpop.f32.mrb[8].mxu0  ;;  %v2514_v60 = vld [vmem:[#allocation2 + $0x18] sm:$0xff] }
 0x2d2   : > { %2481 = vst [vmem:[#allocation2 + $0x31] sm:$0xff] %v2086_v14  ;;  %v2055_v48 = vadd.f32 %v7367_v40, %v2016_v31  ;;  %v1868_v2 = vadd.f32 %v7273_v30, %v1642_v9  ;;  %v1644_v16 = vpop.f32.mrb[9].mxu0  ;;  %v2618_v29 = vrot.slane %v2514_v60, 1 }
 0x2d4   : > { %v2087_v23 = vmax.f32 %v2055_v48, 0.0  ;;  %v2017_v61 = vmul.f32 %v7361_v55, %v1868_v2 }
 0x2d5   : > { %v1647_v46 = vpop.f32.mrb[10].mxu0  ;;  %v2515_v8 = vld [vmem:[#allocation2 + $0x20] sm:$0xff]  ;;  %v2516_v58 = vld [vmem:[#allocation2 + $0x28] sm:$0x3] }
 0x2d6   : > { %2482 = vst [vmem:[#allocation2 + $0x39] sm:$0xff] %v2087_v23  ;;  %v2056_v62 = vadd.f32 %v7367_v40, %v2017_v61  ;;  %v1873_v43 = vadd.f32 %v7269_v7, %v1647_v46  ;;  %v1649_v52 = vpop.f32.mrb[11].mxu0  ;;  %v2619_v45 = vrot.slane %v2515_v8, 1  ;;  %v2621_v21 = vrot.slane %v2516_v58, 1 }
 0x2d7   : > { %v7420_v52 = vpop.f32.mrb[32].mxu1 }
 0x2d8   : > { %v2088_v19 = vmax.f32 %v2056_v62, 0.0  ;;  %v2018_v30 = vmul.f32 %v7361_v55, %v1873_v43  ;;  %v7389_v32 = vsel %vm477_vm0, %v2618_v29, %v2619_v45  ;;  %v7395_v7 = vsel %vm477_vm0, %v2619_v45, %v2621_v21  ;;  %8672 = vst [vmem:[#allocation10_spill] sm:$0xff] %v7420_v52 }
 0x2d9   : > { %8668 = vst [vmem:[#allocation6_spill] sm:$0xff] %v7389_v32  ;;  %v1652_v4 = vpop.f32.mrb[12].mxu0  ;;  %3089 = vmatprep.mubr.f32.mxu1 %v7389_v32  ;;  %8669 = vst [vmem:[#allocation7_spill] sm:$0xff] %v7395_v7  ;;  %v2517_v36 = vld [vmem:[#allocation2 + $0x30] sm:$0xff] }
 0x2da   : > { %2483 = vst [vmem:[#allocation2 + $0x49] sm:$0xff] %v2088_v19  ;;  %v2057_v37 = vadd.f32 %v7367_v40, %v2018_v30  ;;  %v1878_v3 = vadd.f32 %v7283_v54, %v1652_v4  ;;  %v1654_v38 = vpop.f32.mrb[13].mxu0  ;;  %3090 = vmatmul.mubr.f32.gmra.mrb[68].mxu1 %v2514_v60  ;;  %v2623_v5 = vrot.slane %v2517_v36, 1  ;;  %v2735_v63 = vrot.slane %v2517_v36, 2  ;;  %v7423_v19 = vpop.f32.mrb[33].mxu1 }
 0x2db   : > { %3094 = vmatprep.mubr.f32.mxu1 %v7395_v7  ;;  %8673 = vst [vmem:[#allocation11_spill] sm:$0xff] %v7423_v19  ;;  %v7591_v19 = vld [vmem:[%s8482_s7] ss:$0 sm:$0xff] }
 0x2dc   : > { %v2089_v50 = vmax.f32 %v2057_v37, 0.0  ;;  %v2019_v34 = vmul.f32 %v7361_v55, %v1878_v3 }
 0x2dd   : > { %v1657_v13 = vpop.f32.mrb[14].mxu0  ;;  %v2518_v42 = vld [vmem:[#allocation2 + $0x38] sm:$0xff]  ;;  %v2519_v24 = vld [vmem:[#allocation2 + $0x40] sm:$0x3] }
 0x2de   : > { %2484 = vst [vmem:[#allocation2 + $0x51] sm:$0xff] %v2089_v50  ;;  %v2058_v33 = vadd.f32 %v7367_v40, %v2019_v34  ;;  %v1883_v54 = vadd.f32 %v7281_v10, %v1657_v13  ;;  %v1659_v14 = vpop.f32.mrb[15].mxu0  ;;  %3095 = vmatmul.mubr.f32.gmra.mrb[70].mxu1 %v2515_v8  ;;  %v2624_v31 = vrot.slane %v2518_v42, 1  ;;  %v2736_v9 = vrot.slane %v2518_v42, 2 }
 0x2df   : > { %v2738_v48 = vrot.slane %v2519_v24, 2  ;;  %v2626_v2 = vrot.slane %v2519_v24, 1  ;;  %v7427_v24 = vpop.f32.mrb[34].mxu1 }
 0x2e0   : > { %v2090_v16 = vmax.f32 %v2058_v33, 0.0  ;;  %v2020_v60 = vmul.f32 %v7361_v55, %v1883_v54  ;;  %v7403_v23 = vsel %vm477_vm0, %v2623_v5, %v2624_v31  ;;  %v7406_v61 = vsel %vm590_vm1, %v2735_v63, %v2736_v9  ;;  %8674 = vst [vmem:[#allocation12_spill] sm:$0xff] %v7427_v24 }
 0x2e1   : > { %8670 = vst [vmem:[#allocation8_spill] sm:$0xff] %v7403_v23  ;;  %v1662_v46 = vpop.f32.mrb[16].mxu0  ;;  %3099 = vmatprep.mubr.f32.mxu1 %v7403_v23  ;;  %4736 = vmatprep.mubr.f32.mxu0 %v7406_v61  ;;  %v7411_v10 = vsel %vm590_vm1, %v2736_v9, %v2738_v48  ;;  %v7417_v62 = vsel %vm477_vm0, %v2624_v31, %v2626_v2  ;;  %v2520_v43 = vld [vmem:[#allocation2 + $0x48] sm:$0xff]  ;;  %v7436_v9 = vpop.f32.mrb[35].mxu1 }
 0x2e2   : > { %2485 = vst [vmem:[#allocation2 + $0x61] sm:$0xff] %v2090_v16  ;;  %v2059_v8 = vadd.f32 %v7367_v40, %v2020_v60  ;;  %v1888_v29 = vadd.f32 %v7296_v53, %v1662_v46  ;;  %v1664_v58 = vpop.f32.mrb[17].mxu0  ;;  %3100 = vmatmul.mubr.f32.gmra.mrb[72].mxu1 %v2517_v36  ;;  %4737 = vmatmul.mubr.f32.vlgmr.msra.gmra.mrb[64].mxu0 %v7411_v10  ;;  %8671 = vst [vmem:[#allocation9_spill] sm:$0xff] %v7417_v62  ;;  %v2628_v53 = vrot.slane %v2520_v43, 1 }
 0x2e3   : > { %3104 = vmatprep.mubr.f32.mxu1 %v7417_v62  ;;  %v2740_v37 = vrot.slane %v2520_v43, 2  ;;  %8676 = vst [vmem:[#allocation14_spill] sm:$0xff] %v7436_v9 }
 0x2e4   : > { %v2091_v45 = vmax.f32 %v2059_v8, 0.0  ;;  %v2021_v21 = vmul.f32 %v7361_v55, %v1888_v29  ;;  %v7452_v8 = vpop.f32.mrb[36].mxu1 }
 0x2e5   : > { %v1667_v30 = vpop.f32.mrb[18].mxu0  ;;  %v2521_v4 = vld [vmem:[#allocation2 + $0x50] sm:$0xff]  ;;  %v2522_v3 = vld [vmem:[#allocation2 + $0x58] sm:$0x3]  ;;  %8678 = vst [vmem:[#allocation16_spill] sm:$0xff] %v7452_v8 }
 0x2e6   : > { %2486 = vst [vmem:[#allocation2 + $0x69] sm:$0xff] %v2091_v45  ;;  %v2060_v38 = vadd.f32 %v7367_v40, %v2021_v21  ;;  %v1893_v36 = vadd.f32 %v7294_v18, %v1667_v30  ;;  %v1669_v50 = vpop.f32.mrb[19].mxu0  ;;  %3105 = vmatmul.mubr.f32.gmra.mrb[74].mxu1 %v2518_v42  ;;  %v2629_v34 = vrot.slane %v2521_v4, 1  ;;  %v2741_v13 = vrot.slane %v2521_v4, 2  ;;  %v7455_v45 = vpop.f32.mrb[37].mxu1 }
 0x2e7   : > { %v2743_v5 = vrot.slane %v2522_v3, 2  ;;  %v2631_v63 = vrot.slane %v2522_v3, 1  ;;  %8679 = vst [vmem:[#allocation17_spill] sm:$0xff] %v7455_v45 }
 0x2e8   : > { %v2092_v33 = vmax.f32 %v2060_v38, 0.0  ;;  %v2022_v54 = vmul.f32 %v7361_v55, %v1893_v36  ;;  %v7431_v14 = vsel %vm477_vm0, %v2628_v53, %v2629_v34  ;;  %v7434_v31 = vsel %vm590_vm1, %v2740_v37, %v2741_v13 }
 0x2e9   : > { %8675 = vst [vmem:[#allocation13_spill] sm:$0xff] %v7431_v14  ;;  %v1672_v18 = vpop.f32.mrb[20].mxu0  ;;  %3109 = vmatprep.mubr.f32.mxu1 %v7431_v14  ;;  %4739 = vmatprep.mubr.f32.mxu0 %v7434_v31  ;;  %v7441_v42 = vsel %vm590_vm1, %v2741_v13, %v2743_v5  ;;  %v7447_v60 = vsel %vm477_vm0, %v2629_v34, %v2631_v63  ;;  %v7449_v46 = vld [vmem:[#allocation2 + $0x60] sm:$0xff]  ;;  %v7465_v5 = vpop.f32.mrb[38].mxu1 }
 0x2ea   : > { %2487 = vst [vmem:[#allocation2 + $0x79] sm:$0xff] %v2092_v33  ;;  %v2061_v48 = vadd.f32 %v7367_v40, %v2022_v54  ;;  %v1898_v2 = vadd.f32 %v7305_v41, %v1672_v18  ;;  %v1674_v16 = vpop.f32.mrb[21].mxu0  ;;  %3110 = vmatmul.mubr.f32.gmra.mrb[76].mxu1 %v2520_v43  ;;  %4740 = vmatmul.mubr.f32.gmra.mrb[66].mxu0 %v7441_v42  ;;  %8677 = vst [vmem:[#allocation15_spill] sm:$0xff] %v7447_v60  ;;  %v2633_v43 = vrot.slane %v7449_v46, 1 }
 0x2eb   : > { %3114 = vmatprep.mubr.f32.mxu1 %v7447_v60  ;;  %v2745_v30 = vrot.slane %v7449_v46, 2  ;;  %8680 = vst [vmem:[#allocation18_spill] sm:$0xff] %v7465_v5 }
 0x2ec   : > { %v2093_v29 = vmax.f32 %v2061_v48, 0.0  ;;  %v2023_v58 = vmul.f32 %v7361_v55, %v1898_v2 }
 0x2ed   : > { %v1677_v21 = vpop.f32.mrb[22].mxu0  ;;  %v7457_v41 = vld [vmem:[#allocation2 + $0x68] sm:$0xff]  ;;  %v2525_v53 = vld [vmem:[#allocation2 + $0x70] sm:$0x3] }
 0x2ee   : > { %2488 = vst [vmem:[#allocation2 + $0x81] sm:$0xff] %v2093_v29  ;;  %v2062_v37 = vadd.f32 %v7367_v40, %v2023_v58  ;;  %v1903_v3 = vadd.f32 %v7302_v35, %v1677_v21  ;;  %v1679_v38 = vpop.f32.mrb[23].mxu0  ;;  %3115 = vmatmul.mubr.f32.gmra.mrb[78].mxu1 %v2521_v4  ;;  %v2634_v36 = vrot.slane %v7457_v41, 1  ;;  %v2746_v50 = vrot.slane %v7457_v41, 2  ;;  %v7474_v35 = vpop.f32.mrb[39].mxu1 }
 0x2ef   : > { %v2748_v34 = vrot.slane %v2525_v53, 2  ;;  %v2636_v13 = vrot.slane %v2525_v53, 1  ;;  %8682 = vst [vmem:[#allocation20_spill] sm:$0xff] %v7474_v35 }
 0x2f0   : > { %v2094_v63 = vmax.f32 %v2062_v37, 0.0  ;;  %v2024_v33 = vmul.f32 %v7361_v55, %v1903_v3  ;;  %v7469_v54 = vsel %vm477_vm0, %v2633_v43, %v2634_v36  ;;  %v7472_v18 = vsel %vm590_vm1, %v2745_v30, %v2746_v50  ;;  %v7491_v43 = vpop.f32.mrb[40].mxu1 }
 0x2f1   : > { %8681 = vst [vmem:[#allocation19_spill] sm:$0xff] %v7469_v54  ;;  %v1682_v4 = vpop.f32.mrb[24].mxu0  ;;  %3119 = vmatprep.mubr.f32.mxu1 %v7469_v54  ;;  %4742 = vmatprep.mubr.f32.mxu0 %v7472_v18  ;;  %v7479_v48 = vsel %vm590_vm1, %v2746_v50, %v2748_v34  ;;  %v7486_v58 = vsel %vm477_vm0, %v2634_v36, %v2636_v13  ;;  %v7488_v21 = vld [vmem:[#allocation2 + $0x78] sm:$0xff]  ;;  %8684 = vst [vmem:[#allocation22_spill] sm:$0xff] %v7491_v43  ;;  %v7494_v37 = vpop.f32.mrb[41].mxu1 }
 0x2f2   : > { %2489 = vst [vmem:[#allocation2 + $0x91] sm:$0xff] %v2094_v63  ;;  %v2063_v2 = vadd.f32 %v7367_v40, %v2024_v33  ;;  %v1908_v16 = vadd.f32 %v7310_v51, %v1682_v4  ;;  %v1684_v29 = vpop.f32.mrb[25].mxu0  ;;  %3120 = vmatmul.mubr.f32.gmra.mrb[80].mxu1 %v7449_v46  ;;  %4743 = vmatmul.mubr.f32.gmra.mrb[68].mxu0 %v7479_v48  ;;  %8683 = vst [vmem:[#allocation21_spill] sm:$0xff] %v7486_v58  ;;  %v2638_v38 = vrot.slane %v7488_v21, 1 }
 0x2f3   : > { %3124 = vmatprep.mubr.f32.mxu1 %v7486_v58  ;;  %8685 = vst [vmem:[#allocation23_spill] sm:$0xff] %v7494_v37  ;;  %v2750_v50 = vrot.slane %v7488_v21, 2  ;;  %v7505_v29 = vpop.f32.mrb[42].mxu1 }
 0x2f4   : > { %v2095_v30 = vmax.f32 %v2063_v2, 0.0  ;;  %v2025_v53 = vmul.f32 %v7361_v55, %v1908_v16  ;;  %8686 = vst [vmem:[#allocation24_spill] sm:$0xff] %v7505_v29 }
 0x2f5   : > { %v1687_v51 = vpop.f32.mrb[26].mxu0  ;;  %v7496_v3 = vld [vmem:[#allocation2 + $0x80] sm:$0xff]  ;;  %v2528_v36 = vld [vmem:[#allocation2 + $0x88] sm:$0x3] }
 0x2f6   : > { %2490 = vst [vmem:[#allocation2 + $0x99] sm:$0xff] %v2095_v30  ;;  %v2064_v34 = vadd.f32 %v7367_v40, %v2025_v53  ;;  %v1913_v13 = vadd.f32 %v7308_v15, %v1687_v51  ;;  %v1689_v63 = vpop.f32.mrb[27].mxu0  ;;  %3125 = vmatmul.mubr.f32.gmra.mrb[82].mxu1 %v7457_v41  ;;  %v2639_v33 = vrot.slane %v7496_v3, 1  ;;  %v2751_v4 = vrot.slane %v7496_v3, 2  ;;  %v7514_v15 = vpop.f32.mrb[43].mxu1 }
 0x2f7   : > { %v2753_v2 = vrot.slane %v2528_v36, 2  ;;  %v2641_v16 = vrot.slane %v2528_v36, 1  ;;  %8688 = vst [vmem:[#allocation26_spill] sm:$0xff] %v7514_v15  ;;  %v7531_v29 = vpop.f32.mrb[44].mxu1 }
 0x2f8   : > { %v2096_v43 = vmax.f32 %v2064_v34, 0.0  ;;  %v2026_v37 = vmul.f32 %v7361_v55, %v1913_v13  ;;  %v7509_v30 = vsel %vm477_vm0, %v2638_v38, %v2639_v33  ;;  %v7512_v53 = vsel %vm590_vm1, %v2750_v50, %v2751_v4  ;;  %8690 = vst [vmem:[#allocation28_spill] sm:$0xff] %v7531_v29 }
 0x2f9   : > { %8687 = vst [vmem:[#allocation25_spill] sm:$0xff] %v7509_v30  ;;  %v1692_v51 = vpop.f32.mrb[28].mxu0  ;;  %3129 = vmatprep.mubr.f32.mxu1 %v7509_v30  ;;  %4745 = vmatprep.mubr.f32.mxu0 %v7512_v53  ;;  %v7519_v36 = vsel %vm590_vm1, %v2751_v4, %v2753_v2  ;;  %v7526_v50 = vsel %vm477_vm0, %v2639_v33, %v2641_v16  ;;  %v7528_v63 = vld [vmem:[#allocation2 + $0x90] sm:$0xff] }
 0x2fa   : > { %2491 = vst [vmem:[#allocation2 + $0xa9] sm:$0xff] %v2096_v43  ;;  %v2065_v34 = vadd.f32 %v7367_v40, %v2026_v37  ;;  %v1918_v13 = vadd.f32 %v7315_v47, %v1692_v51  ;;  %v1694_v38 = vpop.f32.mrb[29].mxu0  ;;  %3130 = vmatmul.mubr.f32.gmra.mrb[84].mxu1 %v7488_v21  ;;  %4746 = vmatmul.mubr.f32.gmra.mrb[70].mxu0 %v7519_v36  ;;  %8689 = vst [vmem:[#allocation27_spill] sm:$0xff] %v7526_v50  ;;  %v7534_v37 = vpop.f32.mrb[45].mxu1  ;;  %v2643_v51 = vrot.slane %v7528_v63, 1 }
 0x2fb   : > { %3134 = vmatprep.mubr.f32.mxu1 %v7526_v50  ;;  %8691 = vst [vmem:[#allocation29_spill] sm:$0xff] %v7534_v37  ;;  %v2755_v38 = vrot.slane %v7528_v63, 2  ;;  %v7545_v35 = vpop.f32.mrb[46].mxu1 }
 0x2fc   : > { %v2097_v4 = vmax.f32 %v2065_v34, 0.0  ;;  %v2027_v43 = vmul.f32 %v7361_v55, %v1918_v13  ;;  %8692 = vst [vmem:[#allocation30_spill] sm:$0xff] %v7545_v35 }
 0x2fd   : > { %v1697_v47 = vpop.f32.mrb[30].mxu0  ;;  %v7536_v2 = vld [vmem:[#allocation2 + $0x98] sm:$0xff]  ;;  %v2531_v33 = vld [vmem:[#allocation2 + $0xa0] sm:$0x3] }
 0x2fe   : > { %2492 = vst [vmem:[#allocation2 + $0xb1] sm:$0xff] %v2097_v4  ;;  %v2066_v16 = vadd.f32 %v7367_v40, %v2027_v43  ;;  %v1923_v15 = vadd.f32 %v7313_v28, %v1697_v47  ;;  %v1699_v5 = vpop.f32.mrb[31].mxu0  ;;  %3135 = vmatmul.mubr.f32.gmra.mrb[86].mxu1 %v7496_v3  ;;  %v2644_v34 = vrot.slane %v7536_v2, 1  ;;  %v2756_v13 = vrot.slane %v7536_v2, 2  ;;  %v7554_v28 = vpop.f32.mrb[47].mxu1 }
 0x2ff   : > { %v2758_v29 = vrot.slane %v2531_v33, 2  ;;  %v2646_v37 = vrot.slane %v2531_v33, 1  ;;  %8694 = vst [vmem:[#allocation32_spill] sm:$0xff] %v7554_v28 }
 0x300   : > { %v2098_v8 = vmax.f32 %v2066_v16, 0.0  ;;  %v2028_v45 = vmul.f32 %v7361_v55, %v1923_v15  ;;  %v7549_v4 = vsel %vm477_vm0, %v2643_v51, %v2644_v34  ;;  %v7552_v43 = vsel %vm590_vm1, %v2755_v38, %v2756_v13 }
 0x301   : > { %8693 = vst [vmem:[#allocation31_spill] sm:$0xff] %v7549_v4  ;;  %v1702_v5 = vpop.f32.mrb[32].mxu0  ;;  %3139 = vmatprep.mubr.f32.mxu1 %v7549_v4  ;;  %4748 = vmatprep.mubr.f32.mxu0 %v7552_v43  ;;  %v7559_v47 = vsel %vm590_vm1, %v2756_v13, %v2758_v29  ;;  %v7566_v38 = vsel %vm477_vm0, %v2644_v34, %v2646_v37  ;;  %v7568_v16 = vld [vmem:[#allocation2 + $0xa8] sm:$0xff] }
 0x302   : > { %2493 = vst [vmem:[#allocation2 + $0xc1] sm:$0xff] %v2098_v8  ;;  %v2067_v33 = vadd.f32 %v7367_v40, %v2028_v45  ;;  %v1928_v15 = vadd.f32 %v7320_v0, %v1702_v5  ;;  %v1704_v51 = vpop.f32.mrb[33].mxu0  ;;  %3140 = vmatmul.mubr.f32.gmra.mrb[88].mxu1 %v7528_v63  ;;  %4749 = vmatmul.mubr.f32.gmra.mrb[72].mxu0 %v7559_v47  ;;  %8695 = vst [vmem:[#allocation33_spill] sm:$0xff] %v7566_v38  ;;  %v7574_v8 = vld [vmem:[%s8481_s6] ss:$0 sm:$0xff]  ;;  %v4682_v45 = vpop.f32.mrb[48].mxu1 }
 0x303   : > { %3144 = vmatprep.mubr.f32.mxu1 %v7566_v38  ;;  %v2381_v13 = vmul.f32 %v4682_v45, %v7574_v8  ;;  %v2278_v5 = vpop.f32.mrb[49].mxu1  ;;  %v2648_v37 = vrot.slane %v7568_v16, 1  ;;  %v2760_v34 = vrot.slane %v7568_v16, 2 }
 0x304   : > { %v2099_v29 = vmax.f32 %v2067_v33, 0.0  ;;  %v2029_v0 = vmul.f32 %v7361_v55, %v1928_v15  ;;  %v2380_v24 = vmul.f32 %v7574_v8, %v2278_v5 }
 0x305   : > { %v1707_v51 = vpop.f32.mrb[34].mxu0  ;;  %v7578_v35 = vld [vmem:[#allocation2 + $0xb0] sm:$0xff]  ;;  %v2534_v28 = vld [vmem:[#allocation2 + $0xb8] sm:$0x3] }
 0x306   : > { %2494 = vst [vmem:[#allocation2 + $0xc9] sm:$0xff] %v2099_v29  ;;  %v2068_v9 = vadd.f32 %v7367_v40, %v2029_v0  ;;  %v1933_v33 = vadd.f32 %v7318_v17, %v1707_v51  ;;  %v1709_v52 = vpop.f32.mrb[35].mxu0  ;;  %3145 = vmatmul.mubr.f32.gmra.mrb[90].mxu1 %v7536_v2  ;;  %v2649_v15 = vrot.slane %v7578_v35, 1  ;;  %v2761_v45 = vrot.slane %v7578_v35, 2  ;;  %v4685_v17 = vpop.f32.mrb[50].mxu1 }
 0x307   : > { %v2763_v38 = vrot.slane %v2534_v28, 2  ;;  %v2651_v4 = vrot.slane %v2534_v28, 1  ;;  %v7594_v29 = vadd.f32 %v7591_v19, %v2381_v13  ;;  %v7597_v0 = vadd.f32 %v7591_v19, %v2380_v24  ;;  %v2288_v30 = vpop.f32.mrb[51].mxu1 }
 0x308   : > { %v2100_v52 = vmax.f32 %v2068_v9, 0.0  ;;  %v2030_v5 = vmul.f32 %v7361_v55, %v1933_v33  ;;  %v7601_v51 = vsel %vm477_vm0, %v2648_v37, %v2649_v15  ;;  %v7604_v50 = vsel %vm590_vm1, %v2760_v34, %v2761_v45 }
 0x309   : > { %8696 = vst [vmem:[#allocation34_spill] sm:$0xff] %v7594_v29  ;;  %8697 = vst [vmem:[#allocation35_spill] sm:$0xff] %v7597_v0  ;;  %v1712_v58 = vpop.f32.mrb[36].mxu0  ;;  %3149 = vmatprep.mubr.f32.mxu1 %v7601_v51  ;;  %4751 = vmatprep.mubr.f32.mxu0 %v7604_v50  ;;  %v7609_v28 = vsel %vm590_vm1, %v2761_v45, %v2763_v38  ;;  %v2383_v24 = vmul.f32 %v4685_v17, %v7574_v8  ;;  %v7619_v33 = vld [vmem:[#allocation2 + $0xc0] sm:$0xff]  ;;  %v4688_v17 = vpop.f32.mrb[52].mxu1 }
 0x30a   : > { %8698 = vst [vmem:[#allocation36_spill] sm:$0xff] %v7601_v51  ;;  %2495 = vst [vmem:[#allocation2 + $0xd9] sm:$0xff] %v2100_v52  ;;  %v2069_v9 = vadd.f32 %v7367_v40, %v2030_v5  ;;  %v1938_v13 = vadd.f32 %v7325_v57, %v1712_v58  ;;  %v1714_v37 = vpop.f32.mrb[37].mxu0  ;;  %3150 = vmatmul.mubr.f32.gmra.mrb[92].mxu1 %v7568_v16  ;;  %4752 = vmatmul.mubr.f32.gmra.mrb[74].mxu0 %v7609_v28  ;;  %v2298_v5 = vpop.f32.mrb[53].mxu1 }
 0x30b   : > { %v7617_v34 = vsel %vm477_vm0, %v2649_v15, %v2651_v4  ;;  %v7623_v38 = vadd.f32 %v7591_v19, %v2383_v24  ;;  %v2382_v45 = vmul.f32 %v7574_v8, %v2288_v30  ;;  %v2385_v58 = vmul.f32 %v4688_v17, %v7574_v8 }
 0x30c   : > { %8699 = vst [vmem:[#allocation37_spill] sm:$0xff] %v7617_v34  ;;  %3154 = vmatprep.mubr.f32.mxu1 %v7617_v34  ;;  %v2101_v52 = vmax.f32 %v2069_v9, 0.0  ;;  %v2031_v57 = vmul.f32 %v7361_v55, %v1938_v13  ;;  %v2653_v4 = vrot.slane %v7619_v33, 1  ;;  %v2765_v15 = vrot.slane %v7619_v33, 2 }
 0x30d   : > { %8700 = vst [vmem:[#allocation38_spill] sm:$0xff] %v7623_v38  ;;  %v1717_v37 = vpop.f32.mrb[38].mxu0  ;;  %v7628_v29 = vld [vmem:[#allocation2 + $0xc8] sm:$0xff]  ;;  %v2537_v0 = vld [vmem:[#allocation2 + $0xd0] sm:$0x3]  ;;  %v7633_v24 = vadd.f32 %v7591_v19, %v2382_v45  ;;  %v2384_v30 = vmul.f32 %v7574_v8, %v2298_v5  ;;  %v7642_v60 = vadd.f32 %v7591_v19, %v2385_v58 }
 0x30e   : > { %2496 = vst [vmem:[#allocation2 + $0xe1] sm:$0xff] %v2101_v52  ;;  %v2070_v9 = vadd.f32 %v7367_v40, %v2031_v57  ;;  %v1943_v13 = vadd.f32 %v7323_v49, %v1717_v37  ;;  %v1719_v17 = vpop.f32.mrb[39].mxu0  ;;  %3155 = vmatmul.mubr.f32.gmra.mrb[94].mxu1 %v7578_v35  ;;  %v2654_v38 = vrot.slane %v7628_v29, 1  ;;  %v2766_v34 = vrot.slane %v7628_v29, 2  ;;  %v4691_v52 = vpop.f32.mrb[54].mxu1 }
 0x30f   : > { %8701 = vst [vmem:[#allocation39_spill] sm:$0xff] %v7633_v24  ;;  %v2768_v51 = vrot.slane %v2537_v0, 2  ;;  %v2656_v54 = vrot.slane %v2537_v0, 1  ;;  %8702 = vst [vmem:[#allocation40_spill] sm:$0xff] %v7642_v60  ;;  %v7645_v45 = vadd.f32 %v7591_v19, %v2384_v30  ;;  %v2308_v17 = vpop.f32.mrb[55].mxu1  ;;  %v2387_v58 = vmul.f32 %v4691_v52, %v7574_v8 }
 0x310   : > { %v2102_v5 = vmax.f32 %v2070_v9, 0.0  ;;  %v2032_v57 = vmul.f32 %v7361_v55, %v1943_v13  ;;  %v7649_v49 = vsel %vm477_vm0, %v2653_v4, %v2654_v38  ;;  %v7652_v37 = vsel %vm590_vm1, %v2765_v15, %v2766_v34  ;;  %v4694_v52 = vpop.f32.mrb[56].mxu1 }
 0x311   : > { %8703 = vst [vmem:[#allocation41_spill] sm:$0xff] %v7645_v45  ;;  %8704 = vst [vmem:[#allocation42_spill] sm:$0xff] %v7649_v49  ;;  %v1722_v24 = vpop.f32.mrb[40].mxu0  ;;  %3159 = vmatprep.mubr.f32.mxu1 %v7649_v49  ;;  %4754 = vmatprep.mubr.f32.mxu0 %v7652_v37  ;;  %v7657_v0 = vsel %vm590_vm1, %v2766_v34, %v2768_v51  ;;  %v7665_v15 = vsel %vm477_vm0, %v2654_v38, %v2656_v54  ;;  %v7667_v13 = vld [vmem:[#allocation2 + $0xd8] sm:$0xff] }
 0x312   : > { %2497 = vst [vmem:[#allocation2 + $0xf1] sm:$0xff] %v2102_v5  ;;  %v2071_v30 = vadd.f32 %v7367_v40, %v2032_v57  ;;  %v1948_v4 = vadd.f32 %v7330_v59, %v1722_v24  ;;  %v1724_v9 = vpop.f32.mrb[41].mxu0  ;;  %3160 = vmatmul.mubr.f32.gmra.mrb[96].mxu1 %v7619_v33  ;;  %4755 = vmatmul.mubr.f32.gmra.mrb[76].mxu0 %v7657_v0  ;;  %8705 = vst [vmem:[#allocation43_spill] sm:$0xff] %v7665_v15  ;;  %v2318_v57 = vpop.f32.mrb[57].mxu1  ;;  %v2658_v54 = vrot.slane %v7667_v13, 1 }
 0x313   : > { %3164 = vmatprep.mubr.f32.mxu1 %v7665_v15  ;;  %v7671_v51 = vadd.f32 %v7591_v19, %v2387_v58  ;;  %v2386_v34 = vmul.f32 %v7574_v8, %v2308_v17  ;;  %v2389_v24 = vmul.f32 %v4694_v52, %v7574_v8  ;;  %v2770_v38 = vrot.slane %v7667_v13, 2 }
 0x314   : > { %v2103_v5 = vmax.f32 %v2071_v30, 0.0  ;;  %v2033_v59 = vmul.f32 %v7361_v55, %v1948_v4  ;;  %v2388_v17 = vmul.f32 %v7574_v8, %v2318_v57 }
 0x315   : > { %8706 = vst [vmem:[#allocation44_spill] sm:$0xff] %v7671_v51  ;;  %v1727_v9 = vpop.f32.mrb[42].mxu0  ;;  %v7676_v60 = vld [vmem:[#allocation2 + $0xe0] sm:$0xff]  ;;  %v2540_v45 = vld [vmem:[#allocation2 + $0xe8] sm:$0x3]  ;;  %v7681_v58 = vadd.f32 %v7591_v19, %v2386_v34  ;;  %v7690_v62 = vadd.f32 %v7591_v19, %v2389_v24 }
 0x316   : > { %2498 = vst [vmem:[#allocation2 + $0xf9] sm:$0xff] %v2103_v5  ;;  %v2072_v30 = vadd.f32 %v7367_v40, %v2033_v59  ;;  %v1953_v4 = vadd.f32 %v7328_v26, %v1727_v9  ;;  %v1729_v52 = vpop.f32.mrb[43].mxu0  ;;  %3165 = vmatmul.mubr.f32.gmra.mrb[98].mxu1 %v7628_v29  ;;  %v2659_v51 = vrot.slane %v7676_v60, 1  ;;  %v2771_v15 = vrot.slane %v7676_v60, 2  ;;  %v4697_v5 = vpop.f32.mrb[58].mxu1 }
 0x317   : > { %8707 = vst [vmem:[#allocation45_spill] sm:$0xff] %v7681_v58  ;;  %v2773_v49 = vrot.slane %v2540_v45, 2  ;;  %v2661_v14 = vrot.slane %v2540_v45, 1  ;;  %8708 = vst [vmem:[#allocation46_spill] sm:$0xff] %v7690_v62  ;;  %v7693_v34 = vadd.f32 %v7591_v19, %v2388_v17  ;;  %v2328_v52 = vpop.f32.mrb[59].mxu1  ;;  %v2391_v24 = vmul.f32 %v4697_v5, %v7574_v8 }
 0x318   : > { %v2104_v57 = vmax.f32 %v2072_v30, 0.0  ;;  %v2034_v59 = vmul.f32 %v7361_v55, %v1953_v4  ;;  %v7697_v26 = vsel %vm477_vm0, %v2658_v54, %v2659_v51  ;;  %v7700_v9 = vsel %vm590_vm1, %v2770_v38, %v2771_v15  ;;  %v4700_v5 = vpop.f32.mrb[60].mxu1 }
 0x319   : > { %8709 = vst [vmem:[#allocation47_spill] sm:$0xff] %v7693_v34  ;;  %8710 = vst [vmem:[#allocation48_spill] sm:$0xff] %v7697_v26  ;;  %v1732_v58 = vpop.f32.mrb[44].mxu0  ;;  %3169 = vmatprep.mubr.f32.mxu1 %v7697_v26  ;;  %4757 = vmatprep.mubr.f32.mxu0 %v7700_v9  ;;  %v7705_v45 = vsel %vm590_vm1, %v2771_v15, %v2773_v49  ;;  %v7713_v38 = vsel %vm477_vm0, %v2659_v51, %v2661_v14  ;;  %v7715_v4 = vld [vmem:[#allocation2 + $0xf0] sm:$0xff] }
 0x31a   : > { %2499 = vst [vmem:[#allocation2 + $0x109] sm:$0xff] %v2104_v57  ;;  %v2073_v17 = vadd.f32 %v7367_v40, %v2034_v59  ;;  %v1958_v54 = vadd.f32 %v7335_v20, %v1732_v58  ;;  %v1734_v30 = vpop.f32.mrb[45].mxu0  ;;  %3170 = vmatmul.mubr.f32.gmra.mrb[100].mxu1 %v7667_v13  ;;  %4758 = vmatmul.mubr.f32.gmra.mrb[78].mxu0 %v7705_v45  ;;  %8711 = vst [vmem:[#allocation49_spill] sm:$0xff] %v7713_v38  ;;  %v2338_v59 = vpop.f32.mrb[61].mxu1  ;;  %v2663_v14 = vrot.slane %v7715_v4, 1 }
 0x31b   : > { %3174 = vmatprep.mubr.f32.mxu1 %v7713_v38  ;;  %v7719_v49 = vadd.f32 %v7591_v19, %v2391_v24  ;;  %v2390_v15 = vmul.f32 %v7574_v8, %v2328_v52  ;;  %v2393_v58 = vmul.f32 %v4700_v5, %v7574_v8  ;;  %v2775_v51 = vrot.slane %v7715_v4, 2 }
 0x31c   : > { %v2105_v57 = vmax.f32 %v2073_v17, 0.0  ;;  %v2035_v20 = vmul.f32 %v7361_v55, %v1958_v54  ;;  %v2392_v52 = vmul.f32 %v7574_v8, %v2338_v59 }
 0x31d   : > { %8712 = vst [vmem:[#allocation50_spill] sm:$0xff] %v7719_v49  ;;  %v1737_v30 = vpop.f32.mrb[46].mxu0  ;;  %v7724_v62 = vld [vmem:[#allocation2 + $0xf8] sm:$0xff]  ;;  %v2543_v34 = vld [vmem:[#allocation2 + $0x100] sm:$0x3]  ;;  %v7729_v24 = vadd.f32 %v7591_v19, %v2390_v15  ;;  %v7738_v7 = vadd.f32 %v7591_v19, %v2393_v58 }
 0x31e   : > { %2500 = vst [vmem:[#allocation2 + $0x111] sm:$0xff] %v2105_v57  ;;  %v2074_v17 = vadd.f32 %v7367_v40, %v2035_v20  ;;  %v1963_v54 = vadd.f32 %v7333_v12, %v1737_v30  ;;  %v1739_v5 = vpop.f32.mrb[47].mxu0  ;;  %3175 = vmatmul.mubr.f32.gmra.mrb[102].mxu1 %v7676_v60  ;;  %v2664_v49 = vrot.slane %v7724_v62, 1  ;;  %v2776_v38 = vrot.slane %v7724_v62, 2  ;;  %v4703_v57 = vpop.f32.mrb[62].mxu1 }
 0x31f   : > { %8713 = vst [vmem:[#allocation51_spill] sm:$0xff] %v7729_v24  ;;  %v2778_v26 = vrot.slane %v2543_v34, 2  ;;  %v2666_v23 = vrot.slane %v2543_v34, 1  ;;  %8714 = vst [vmem:[#allocation52_spill] sm:$0xff] %v7738_v7  ;;  %v7741_v15 = vadd.f32 %v7591_v19, %v2392_v52  ;;  %v2348_v5 = vpop.f32.mrb[63].mxu1  ;;  %v2395_v58 = vmul.f32 %v4703_v57, %v7574_v8 }
 0x320   : > { %v2106_v59 = vmax.f32 %v2074_v17, 0.0  ;;  %v2036_v20 = vmul.f32 %v7361_v55, %v1963_v54  ;;  %v7745_v12 = vsel %vm477_vm0, %v2663_v14, %v2664_v49  ;;  %v7748_v30 = vsel %vm590_vm1, %v2775_v51, %v2776_v38 }
 0x321   : > { %8715 = vst [vmem:[#allocation53_spill] sm:$0xff] %v7741_v15  ;;  %8716 = vst [vmem:[#allocation54_spill] sm:$0xff] %v7745_v12  ;;  %v1742_v24 = vpop.f32.mrb[48].mxu0  ;;  %3179 = vmatprep.mubr.f32.mxu1 %v7745_v12  ;;  %4760 = vmatprep.mubr.f32.mxu0 %v7748_v30  ;;  %v7753_v34 = vsel %vm590_vm1, %v2776_v38, %v2778_v26  ;;  %v7761_v51 = vsel %vm477_vm0, %v2664_v49, %v2666_v23  ;;  %v7763_v54 = vld [vmem:[#allocation2 + $0x108] sm:$0xff] }
 0x322   : > { %2501 = vst [vmem:[#allocation2 + $0x121] sm:$0xff] %v2106_v59  ;;  %v2075_v52 = vadd.f32 %v7367_v40, %v2036_v20  ;;  %v1968_v14 = vadd.f32 %v7340_v44, %v1742_v24  ;;  %v1744_v17 = vpop.f32.mrb[49].mxu0  ;;  %3180 = vmatmul.mubr.f32.gmra.mrb[104].mxu1 %v7715_v4  ;;  %4761 = vmatmul.mubr.f32.gmra.mrb[80].mxu0 %v7753_v34  ;;  %8717 = vst [vmem:[#allocation55_spill] sm:$0xff] %v7761_v51  ;;  %v2668_v20 = vrot.slane %v7763_v54, 1 }
 0x323   : > { %3184 = vmatprep.mubr.f32.mxu1 %v7761_v51  ;;  %v7767_v26 = vadd.f32 %v7591_v19, %v2395_v58  ;;  %v2394_v38 = vmul.f32 %v7574_v8, %v2348_v5  ;;  %v2780_v23 = vrot.slane %v7763_v54, 2 }
 0x324   : > { %v2107_v57 = vmax.f32 %v2075_v52, 0.0  ;;  %v2037_v44 = vmul.f32 %v7361_v55, %v1968_v14 }
 0x325   : > { %8718 = vst [vmem:[#allocation56_spill] sm:$0xff] %v7767_v26  ;;  %v1747_v24 = vpop.f32.mrb[50].mxu0  ;;  %v7771_v59 = vld [vmem:[#allocation2 + $0x110] sm:$0xff]  ;;  %v2546_v49 = vld [vmem:[#allocation2 + $0x118] sm:$0x3]  ;;  %v7776_v17 = vadd.f32 %v7591_v19, %v2394_v38 }
 0x326   : > { %2502 = vst [vmem:[#allocation2 + $0x129] sm:$0xff] %v2107_v57  ;;  %v2076_v58 = vadd.f32 %v7367_v40, %v2037_v44  ;;  %v1973_v26 = vadd.f32 %v7338_v11, %v1747_v24  ;;  %v1749_v8 = vpop.f32.mrb[51].mxu0  ;;  %3185 = vmatmul.mubr.f32.gmra.mrb[106].mxu1 %v7724_v62  ;;  %v2669_v5 = vrot.slane %v7771_v59, 1  ;;  %v2781_v52 = vrot.slane %v7771_v59, 2 }
 0x327   : > { %8719 = vst [vmem:[#allocation57_spill] sm:$0xff] %v7776_v17  ;;  %v2783_v14 = vrot.slane %v2546_v49, 2  ;;  %v2671_v7 = vrot.slane %v2546_v49, 1 }
 0x328   : > { %v2108_v15 = vmax.f32 %v2076_v58, 0.0  ;;  %v2038_v51 = vmul.f32 %v7361_v55, %v1973_v26  ;;  %v7785_v19 = vsel %vm477_vm0, %v2668_v20, %v2669_v5  ;;  %v7788_v38 = vsel %vm590_vm1, %v2780_v23, %v2781_v52 }
 0x329   : > { %8720 = vst [vmem:[#allocation58_spill] sm:$0xff] %v7785_v19  ;;  %v1752_v57 = vpop.f32.mrb[52].mxu0  ;;  %3189 = vmatprep.mubr.f32.mxu1 %v7785_v19  ;;  %4763 = vmatprep.mubr.f32.mxu0 %v7788_v38  ;;  %v7793_v11 = vsel %vm590_vm1, %v2781_v52, %v2783_v14  ;;  %v7800_v20 = vsel %vm477_vm0, %v2669_v5, %v2671_v7  ;;  %v7802_v23 = vld [vmem:[#allocation2 + $0x120] sm:$0xff] }
 0x32a   : > { %2503 = vst [vmem:[#allocation2 + $0x139] sm:$0xff] %v2108_v15  ;;  %v2077_v44 = vadd.f32 %v7367_v40, %v2038_v51  ;;  %v1978_v24 = vadd.f32 %v7345_v25, %v1752_v57  ;;  %v1754_v26 = vpop.f32.mrb[53].mxu0  ;;  %3190 = vmatmul.mubr.f32.gmra.mrb[108].mxu1 %v7763_v54  ;;  %4764 = vmatmul.mubr.f32.gmra.mrb[82].mxu0 %v7793_v11  ;;  %8721 = vst [vmem:[#allocation59_spill] sm:$0xff] %v7800_v20  ;;  %v2673_v25 = vrot.slane %v7802_v23, 1 }
 0x32b   : > { %3194 = vmatprep.mubr.f32.mxu1 %v7800_v20  ;;  %v2785_v51 = vrot.slane %v7802_v23, 2 }
 0x32c   : > { %v2109_v49 = vmax.f32 %v2077_v44, 0.0  ;;  %v2039_v58 = vmul.f32 %v7361_v55, %v1978_v24 }
 0x32d   : > { %v1757_v15 = vpop.f32.mrb[54].mxu0  ;;  %v7806_v8 = vld [vmem:[#allocation2 + $0x128] sm:$0xff]  ;;  %v2549_v52 = vld [vmem:[#allocation2 + $0x130] sm:$0x3] }
 0x32e   : > { %2504 = vst [vmem:[#allocation2 + $0x141] sm:$0xff] %v2109_v49  ;;  %v2078_v14 = vadd.f32 %v7367_v40, %v2039_v58  ;;  %v1983_v7 = vadd.f32 %v7343_v6, %v1757_v15  ;;  %v1759_v5 = vpop.f32.mrb[55].mxu0  ;;  %3195 = vmatmul.mubr.f32.gmra.mrb[110].mxu1 %v7771_v59  ;;  %v2674_v57 = vrot.slane %v7806_v8, 1  ;;  %v2786_v44 = vrot.slane %v7806_v8, 2 }
 0x32f   : > { %v2788_v24 = vrot.slane %v2549_v52, 2  ;;  %v2676_v26 = vrot.slane %v2549_v52, 1 }
 0x330   : > { %v2110_v17 = vmax.f32 %v2078_v14, 0.0  ;;  %v2040_v20 = vmul.f32 %v7361_v55, %v1983_v7  ;;  %v7817_v19 = vsel %vm477_vm0, %v2673_v25, %v2674_v57  ;;  %v7820_v49 = vsel %vm590_vm1, %v2785_v51, %v2786_v44 }
 0x331   : > { %8722 = vst [vmem:[#allocation60_spill] sm:$0xff] %v7817_v19  ;;  %v1762_v58 = vpop.f32.mrb[56].mxu0  ;;  %3199 = vmatprep.mubr.f32.mxu1 %v7817_v19  ;;  %4766 = vmatprep.mubr.f32.mxu0 %v7820_v49  ;;  %v7825_v6 = vsel %vm590_vm1, %v2786_v44, %v2788_v24  ;;  %v7832_v25 = vsel %vm477_vm0, %v2674_v57, %v2676_v26  ;;  %v7834_v51 = vld [vmem:[#allocation2 + $0x138] sm:$0xff]  ;;  %v5702_v19 = vld [vmem:[%s8479_s4] ss:$0 sm:$0xff] }
 0x332   : > { %8723 = vst [vmem:[#allocation61_spill] sm:$0xff] %v7825_v6  ;;  %2505 = vst [vmem:[#allocation2 + $0x151] sm:$0xff] %v2110_v17  ;;  %v2079_v15 = vadd.f32 %v7367_v40, %v2040_v20  ;;  %v1988_v52 = vadd.f32 %v7350_v22, %v1762_v58  ;;  %v1764_v14 = vpop.f32.mrb[57].mxu0  ;;  %3200 = vmatmul.mubr.f32.gmra.mrb[112].mxu1 %v7802_v23  ;;  %4767 = vmatmul.mubr.f32.gmra.mrb[84].mxu0 %v7825_v6  ;;  %v2678_v22 = vrot.slane %v7834_v51, 1 }
 0x333   : > { %8724 = vst [vmem:[#allocation62_spill] sm:$0xff] %v7832_v25  ;;  %3204 = vmatprep.mubr.f32.mxu1 %v7832_v25  ;;  %v2790_v20 = vrot.slane %v7834_v51, 2 }
 0x334   : > { %v2111_v7 = vmax.f32 %v2079_v15, 0.0  ;;  %v2041_v5 = vmul.f32 %v7361_v55, %v1988_v52 }
 0x335   : > { %v1767_v17 = vpop.f32.mrb[58].mxu0  ;;  %v7838_v44 = vld [vmem:[#allocation2 + $0x140] sm:$0xff]  ;;  %v2552_v24 = vld [vmem:[#allocation2 + $0x148] sm:$0x3] }
 0x336   : > { %2506 = vst [vmem:[#allocation2 + $0x159] sm:$0xff] %v2111_v7  ;;  %v2080_v58 = vadd.f32 %v7367_v40, %v2041_v5  ;;  %v1993_v57 = vadd.f32 %v7348_v39, %v1767_v17  ;;  %v1769_v26 = vpop.f32.mrb[59].mxu0  ;;  %3205 = vmatmul.mubr.f32.gmra.mrb[114].mxu1 %v7806_v8  ;;  %v2679_v15 = vrot.slane %v7838_v44, 1  ;;  %v2791_v55 = vrot.slane %v7838_v44, 2  ;;  %v5703_v17 = vld [vmem:[%s8480_s5] ss:$0 sm:$0xff] }
 0x337   : > { %v2793_v52 = vrot.slane %v2552_v24, 2  ;;  %v2681_v14 = vrot.slane %v2552_v24, 1 }
 0x338   : > { %v2112_v25 = vmax.f32 %v2080_v58, 0.0  ;;  %v2042_v12 = vmul.f32 %v5702_v19, %v1993_v57  ;;  %v7851_v7 = vsel %vm477_vm0, %v2678_v22, %v2679_v15  ;;  %v7854_v39 = vsel %vm590_vm1, %v2790_v20, %v2791_v55 }
 0x339   : > { %8725 = vst [vmem:[#allocation63_spill] sm:$0xff] %v7851_v7  ;;  %8726 = vst [vmem:[#allocation64_spill] sm:$0xff] %v7854_v39  ;;  %v1772_v40 = vpop.f32.mrb[60].mxu0  ;;  %3209 = vmatprep.mubr.f32.mxu1 %v7851_v7  ;;  %4769 = vmatprep.mubr.f32.mxu0 %v7854_v39  ;;  %v7859_v5 = vsel %vm590_vm1, %v2791_v55, %v2793_v52  ;;  %v7868_v20 = vsel %vm477_vm0, %v2679_v15, %v2681_v14  ;;  %v7870_v57 = vld [vmem:[#allocation2 + $0x150] sm:$0xff] }
 0x33a   : > { %8727 = vst [vmem:[#allocation65_spill] sm:$0xff] %v7859_v5  ;;  %2507 = vst [vmem:[#allocation2 + $0x169] sm:$0xff] %v2112_v25  ;;  %v2081_v24 = vadd.f32 %v5703_v17, %v2042_v12  ;;  %v1998_v22 = vadd.f32 %v7355_v27, %v1772_v40  ;;  %v1774_v58 = vpop.f32.mrb[61].mxu0  ;;  %3210 = vmatmul.mubr.f32.gmra.mrb[116].mxu1 %v7834_v51  ;;  %4770 = vmatmul.mubr.f32.gmra.mrb[86].mxu0 %v7859_v5  ;;  %v2683_v12 = vrot.slane %v7870_v57, 1 }
 0x33b   : > { %8728 = vst [vmem:[#allocation66_spill] sm:$0xff] %v7868_v20  ;;  %3214 = vmatprep.mubr.f32.mxu1 %v7868_v20  ;;  %v2795_v27 = vrot.slane %v7870_v57, 2 }
 0x33c   : > { %v2113_v25 = vmax.f32 %v2081_v24, 0.0  ;;  %v2043_v26 = vmul.f32 %v5702_v19, %v1998_v22 }
 0x33d   : > { %v1777_v55 = vpop.f32.mrb[62].mxu0  ;;  %v7873_v52 = vld [vmem:[#allocation2 + $0x158] sm:$0xff]  ;;  %v2555_v40 = vld [vmem:[#allocation2 + $0x160] sm:$0x3] }
 0x33e   : > { %2508 = vst [vmem:[#allocation2 + $0x171] sm:$0xff] %v2113_v25  ;;  %v2082_v58 = vadd.f32 %v5703_v17, %v2043_v26  ;;  %v2003_v7 = vadd.f32 %v7353_v56, %v1777_v55  ;;  %v1779_v15 = vpop.f32.mrb[63].mxu0  ;;  %3215 = vmatmul.mubr.f32.gmra.mrb[118].mxu1 %v7838_v44  ;;  %v2684_v14 = vrot.slane %v7873_v52, 1  ;;  %v2796_v24 = vrot.slane %v7873_v52, 2 }
 0x33f   : > { %v2798_v22 = vrot.slane %v2555_v40, 2  ;;  %v2686_v20 = vrot.slane %v2555_v40, 1 }
 0x340   : > { %v2114_v32 = vmax.f32 %v2082_v58, 0.0  ;;  %v2044_v5 = vmul.f32 %v5702_v19, %v2003_v7  ;;  %v7882_v39 = vsel %vm477_vm0, %v2683_v12, %v2684_v14  ;;  %v7885_v6 = vsel %vm590_vm1, %v2795_v27, %v2796_v24 }
 0x341   : > { %8729 = vst [vmem:[#allocation67_spill] sm:$0xff] %v7882_v39  ;;  %3219 = vmatprep.mubr.f32.mxu1 %v7882_v39  ;;  %4772 = vmatprep.mubr.f32.mxu0 %v7885_v6  ;;  %v7890_v56 = vsel %vm590_vm1, %v2796_v24, %v2798_v22  ;;  %v7895_v19 = vsel %vm477_vm0, %v2684_v14, %v2686_v20  ;;  %v7897_v7 = vld [vmem:[#allocation2 + $0x168] sm:$0xff]  ;;  %v5707_v39 = vld [vmem:[#allocation2 + $0x10] sm:$0x3] }
 0x342   : > { %8730 = vst [vmem:[#allocation68_spill] sm:$0xff] %v7890_v56  ;;  %2509 = vst [vmem:[#allocation2 + $0x181] sm:$0xff] %v2114_v32  ;;  %v2083_v25 = vadd.f32 %v5703_v17, %v2044_v5  ;;  %3220 = vmatmul.mubr.f32.gmra.mrb[120].mxu1 %v7870_v57  ;;  %4773 = vmatmul.mubr.f32.gmra.mrb[88].mxu0 %v7890_v56  ;;  %v2688_v12 = vrot.slane %v7897_v7, 1  ;;  %v2800_v27 = vrot.slane %v7897_v7, 2 }
 0x343   : > { %8731 = vst [vmem:[#allocation69_spill] sm:$0xff] %v7895_v19  ;;  %3224 = vmatprep.mubr.f32.mxu1 %v7895_v19 }
 0x344   : > { %v2115_v26 = vmax.f32 %v2083_v25, 0.0  ;;  %v5704_v25 = vld [vmem:[#allocation2] sm:$0xff] }
 0x345   : > { %v7900_v55 = vld [vmem:[#allocation2 + $0x170] sm:$0xff]  ;;  %v2558_v32 = vld [vmem:[#allocation2 + $0x178] sm:$0x3] }
 0x346   : > { %8732 = vst [vmem:[#allocation70_spill] sm:$0xff] %v7900_v55  ;;  %2510 = vst [vmem:[#allocation2 + $0x189] sm:$0xff] %v2115_v26  ;;  %3225 = vmatmul.mubr.f32.gmra.mrb[122].mxu1 %v7873_v52  ;;  %v2689_v5 = vrot.slane %v7900_v55, 1  ;;  %v2801_v17 = vrot.slane %v7900_v55, 2  ;;  %v2803_v20 = vrot.slane %v2558_v32, 2  ;;  %v2691_v40 = vrot.slane %v2558_v32, 1 }
 0x347   : > { %v2725_v26 = vrot.slane %v5704_v25, 2  ;;  %v2935_v32 = vld [vmem:[#allocation3 + $0x200] sm:$0xff]  ;;  %v5706_v25 = vld [vmem:[#allocation2 + $0x18] sm:$0xff] }
 0x348   : > { %v7908_v58 = vsel %vm477_vm0, %v2688_v12, %v2689_v5  ;;  %v7911_v15 = vsel %vm590_vm1, %v2800_v27, %v2801_v17  ;;  %v7914_v14 = vsel %vm590_vm1, %v2801_v17, %v2803_v20  ;;  %v7921_v24 = vsel %vm477_vm0, %v2689_v5, %v2691_v40  ;;  %v7926_v12 = vld [vmem:[#allocation2 + $0x8] sm:$0xff]  ;;  %v2936_v17 = vld [vmem:[#allocation3 + $0x208] sm:$0xff] }
 0x349   : > { %8733 = vst [vmem:[#allocation71_spill] sm:$0xff] %v7908_v58  ;;  %8734 = vst [vmem:[#allocation72_spill] sm:$0xff] %v7911_v15  ;;  %3229 = vmatprep.mubr.f32.mxu1 %v7908_v58  ;;  %4775 = vmatprep.mubr.f32.mxu0 %v7911_v15  ;;  %v7924_v22 = vld [vmem:[#allocation2 + $0x180] sm:$0xff]  ;;  %v7929_v27 = vrot.slane %v7926_v12, 2  ;;  %v5137_v19 = vpack.c.bf16 %v2936_v17, %v2935_v32  ;;  %v2939_v32 = vld [vmem:[#allocation3 + $0x220] sm:$0xff] }
 0x34a   : > { %8735 = vst [vmem:[#allocation73_spill] sm:$0xff] %v7914_v14  ;;  %3230 = vmatmul.mubr.f32.gmra.mrb[124].mxu1 %v7897_v7  ;;  %4776 = vmatmul.mubr.f32.gmra.mrb[90].mxu0 %v7914_v14  ;;  %8736 = vst [vmem:[#allocation74_spill] sm:$0xff] %v7921_v24  ;;  %v2847_v5 = vrot.slane %v7924_v22, 2  ;;  %v2728_v14 = vrot.slane %v5707_v39, 2  ;;  %v2940_v17 = vld [vmem:[#allocation3 + $0x228] sm:$0xff] }
 0x34b   : > { %3234 = vmatprep.mubr.f32.mxu1 %v7921_v24  ;;  %8737 = vst [vmem:[#allocation75_spill] sm:$0xff] %v7924_v22  ;;  %8738 = vst [vmem:[#allocation76_spill] sm:$0xff] %v7926_v12  ;;  %v2727_v12 = vsel %vm590_vm1, %v2725_v26, %v7929_v27  ;;  %v2938_v22 = vld [vmem:[#allocation3 + $0x218] sm:$0xff] }
 0x34c   : > { %v2729_v26 = vsel %vm590_vm1, %v7929_v27, %v2728_v14 }
 0x34d   : > { %v7931_v20 = vld [vmem:[#allocation2 + $0x188] sm:$0xff]  ;;  %v7933_v58 = vld [vmem:[#allocation2 + $0x190] sm:$0x3] }
 0x34e   : > { %8739 = vst [vmem:[#allocation77_spill] sm:$0xff] %v7933_v58  ;;  %3235 = vmatmul.mubr.f32.gmra.mrb[126].mxu1 %v7900_v55  ;;  %v2848_v40 = vrot.slane %v7931_v20, 2  ;;  %v2850_v24 = vrot.slane %v7933_v58, 2  ;;  %v2937_v55 = vld [vmem:[#allocation3 + $0x210] sm:$0xff] }
 0x34f   : > { %3304 = vmatprep.mubr.f32.mxu1 %v5706_v25  ;;  %v5708_v58 = vld [vmem:[#allocation2 + $0x20] sm:$0xff]  ;;  %v5140_v39 = vpack.c.bf16 %v2938_v22, %v2937_v55  ;;  %v5710_v55 = vld [vmem:[#allocation2 + $0x28] sm:$0x3] }
 0x350   : > { %v7942_v15 = vsel %vm590_vm1, %v2847_v5, %v2848_v40  ;;  %v7945_v56 = vsel %vm590_vm1, %v2848_v40, %v2850_v24  ;;  %v2731_v24 = vrot.slane %v5708_v58, 2  ;;  %v7952_v5 = vld [vmem:[#allocation2 + $0x30] sm:$0xff]  ;;  %v5143_v40 = vpack.c.bf16 %v2940_v17, %v2939_v32  ;;  %v7968_v17 = vld [vmem:[#allocation2 + $0x48] sm:$0xff] }
 0x351   : > { %8740 = vst [vmem:[#allocation78_spill] sm:$0xff] %v7945_v56  ;;  %4778 = vmatprep.mubr.f32.mxu0 %v7942_v15  ;;  %v2733_v22 = vrot.slane %v5710_v55, 2  ;;  %v2945_v55 = vld [vmem:[#allocation3 + $0x250] sm:$0xff] }
 0x352   : > { %3305 = vmatmul.mubr.f32.vlgmr.msra.gmra.mrb[64].mxu1 %v2727_v12  ;;  %4779 = vmatmul.mubr.f32.gmra.mrb[92].mxu0 %v7945_v56  ;;  %v2730_v12 = vrot.slane %v5706_v25, 2  ;;  %v2942_v56 = vld [vmem:[#allocation3 + $0x238] sm:$0xff]  ;;  %v2943_v25 = vld [vmem:[#allocation3 + $0x240] sm:$0xff] }
 0x353   : > { %3309 = vmatprep.mubr.f32.mxu1 %v5708_v58  ;;  %5138 = vmatpush1.bf16.msra.mxu1 %v5137_v19  ;;  %v2941_v19 = vld [vmem:[#allocation3 + $0x230] sm:$0xff]  ;;  %v7960_v58 = vld [vmem:[#allocation2 + $0x38] sm:$0xff]  ;;  %v7965_v32 = vsel %vm590_vm1, %v2731_v24, %v2733_v22 }
 0x354   : > { %5139 = vmatprep.subr.bf16.mxu1 %v8643_v1  ;;  %v7957_v14 = vsel %vm590_vm1, %v2730_v12, %v2731_v24  ;;  %v2948_v22 = vld [vmem:[#allocation3 + $0x268] sm:$0xff] }
 0x356   : > { %3310 = vmatmul.mubr.f32.gmra.mrb[66].mxu1 %v2729_v26  ;;  %v5146_v26 = vpack.c.bf16 %v2942_v56, %v2941_v19  ;;  %v7973_v56 = vld [vmem:[#allocation2 + $0x50] sm:$0xff] }
 0x357   : > { %3314 = vmatprep.mubr.f32.mxu1 %v7952_v5  ;;  %5141 = vmatpush1.bf16.msra.mxu1 %v5140_v39  ;;  %v2944_v39 = vld [vmem:[#allocation3 + $0x248] sm:$0xff]  ;;  %v2947_v19 = vld [vmem:[#allocation3 + $0x260] sm:$0xff] }
 0x358   : > { %5142 = vmatprep.subr.bf16.mxu1 %v8643_v1  ;;  %v5149_v12 = vpack.c.bf16 %v2944_v39, %v2943_v25  ;;  %v2949_v25 = vld [vmem:[#allocation3 + $0x270] sm:$0xff]  ;;  %v2950_v39 = vld [vmem:[#allocation3 + $0x278] sm:$0xff] }
 0x35a   : > { %3315 = vmatmul.mubr.f32.gmra.mrb[68].mxu1 %v7957_v14 }
 0x35b   : > { %3319 = vmatprep.mubr.f32.mxu1 %v7960_v58  ;;  %5144 = vmatpush1.bf16.msra.mxu1 %v5143_v40  ;;  %v2946_v40 = vld [vmem:[#allocation3 + $0x258] sm:$0xff] }
 0x35c   : > { %5145 = vmatprep.subr.bf16.mxu1 %v8643_v1  ;;  %v5152_v24 = vpack.c.bf16 %v2946_v40, %v2945_v55  ;;  %v2951_v55 = vld [vmem:[#allocation3 + $0x280] sm:$0xff]  ;;  %v2952_v40 = vld [vmem:[#allocation3 + $0x288] sm:$0xff] }
 0x35e   : > { %3320 = vmatmul.mubr.f32.gmra.mrb[70].mxu1 %v7965_v32 }
 0x35f   : > { %3324 = vmatprep.mubr.f32.mxu1 %v7968_v17  ;;  %5147 = vmatpush1.bf16.msra.mxu1 %v5146_v26  ;;  %v5155_v26 = vpack.c.bf16 %v2948_v22, %v2947_v19  ;;  %v2954_v19 = vld [vmem:[#allocation3 + $0x298] sm:$0xff]  ;;  %v2955_v22 = vld [vmem:[#allocation3 + $0x2a0] sm:$0xff] }
 0x360   : > { %5148 = vmatprep.subr.bf16.mxu1 %v8643_v1 }
 0x362   : > { %3325 = vmatmul.mubr.f32.gmra.mrb[72].mxu1 %v7406_v61 }
 0x363   : > { %3329 = vmatprep.mubr.f32.mxu1 %v7973_v56  ;;  %5150 = vmatpush1.bf16.msra.mxu1 %v5149_v12  ;;  %v5158_v12 = vpack.c.bf16 %v2950_v39, %v2949_v25  ;;  %v2957_v25 = vld [vmem:[#allocation3 + $0x2b0] sm:$0xff]  ;;  %v2958_v39 = vld [vmem:[#allocation3 + $0x2b8] sm:$0xff] }
 0x364   : > { %5151 = vmatprep.subr.bf16.mxu1 %v8643_v1 }
 0x366   : > { %3330 = vmatmul.mubr.f32.gmra.mrb[74].mxu1 %v7411_v10 }
 0x367   : > { %3334 = vmatprep.mubr.f32.mxu1 %v7449_v46  ;;  %5153 = vmatpush1.bf16.msra.mxu1 %v5152_v24  ;;  %v5161_v46 = vpack.c.bf16 %v2952_v40, %v2951_v55  ;;  %v2953_v24 = vld [vmem:[#allocation3 + $0x290] sm:$0xff]  ;;  %v2960_v55 = vld [vmem:[#allocation3 + $0x2c8] sm:$0xff] }
 0x368   : > { %5154 = vmatprep.subr.bf16.mxu1 %v8643_v1  ;;  %v2961_v40 = vld [vmem:[#allocation3 + $0x2d0] sm:$0xff] }
 0x36a   : > { %3335 = vmatmul.mubr.f32.gmra.mrb[76].mxu1 %v7434_v31 }
 0x36b   : > { %3339 = vmatprep.mubr.f32.mxu1 %v7457_v41  ;;  %5156 = vmatpush1.bf16.msra.mxu1 %v5155_v26  ;;  %v5164_v41 = vpack.c.bf16 %v2954_v19, %v2953_v24  ;;  %v2956_v26 = vld [vmem:[#allocation3 + $0x2a8] sm:$0xff]  ;;  %v2963_v24 = vld [vmem:[#allocation3 + $0x2e0] sm:$0xff] }
 0x36c   : > { %5157 = vmatprep.subr.bf16.mxu1 %v8643_v1  ;;  %v2964_v19 = vld [vmem:[#allocation3 + $0x2e8] sm:$0xff] }
 0x36e   : > { %3340 = vmatmul.mubr.f32.gmra.mrb[78].mxu1 %v7441_v42 }
 0x36f   : > { %3344 = vmatprep.mubr.f32.mxu1 %v7488_v21  ;;  %5159 = vmatpush1.bf16.msra.mxu1 %v5158_v12  ;;  %v5167_v21 = vpack.c.bf16 %v2956_v26, %v2955_v22  ;;  %v2959_v12 = vld [vmem:[#allocation3 + $0x2c0] sm:$0xff]  ;;  %v2966_v22 = vld [vmem:[#allocation3 + $0x2f8] sm:$0xff] }
 0x370   : > { %5160 = vmatprep.subr.bf16.mxu1 %v8643_v1 }
 0x372   : > { %3345 = vmatmul.mubr.f32.gmra.mrb[80].mxu1 %v7472_v18 }
 0x373   : > { %3349 = vmatprep.mubr.f32.mxu1 %v7496_v3  ;;  %5162 = vmatpush1.bf16.msra.mxu1 %v5161_v46  ;;  %v5170_v3 = vpack.c.bf16 %v2958_v39, %v2957_v25  ;;  %v2962_v46 = vld [vmem:[#allocation3 + $0x2d8] sm:$0xff]  ;;  %v8747_v39 = vld [vmem:[#allocation75_spill] sm:$0xff] }
 0x374   : > { %5163 = vmatprep.subr.bf16.mxu1 %v8643_v1 }
 0x376   : > { %3350 = vmatmul.mubr.f32.gmra.mrb[82].mxu1 %v7479_v48 }
 0x377   : > { %3354 = vmatprep.mubr.f32.mxu1 %v7528_v63  ;;  %5165 = vmatpush1.bf16.msra.mxu1 %v5164_v41  ;;  %v5173_v63 = vpack.c.bf16 %v2960_v55, %v2959_v12  ;;  %v2965_v41 = vld [vmem:[#allocation3 + $0x2f0] sm:$0xff]  ;;  %v2967_v12 = vld [vmem:[#allocation3 + $0x300] sm:$0xff]  ;;  %v2968_v55 = vld [vmem:[#allocation3 + $0x308] sm:$0xff] }
 0x378   : > { %5166 = vmatprep.subr.bf16.mxu1 %v8643_v1 }
 0x37a   : > { %3355 = vmatmul.mubr.f32.gmra.mrb[84].mxu1 %v7512_v53 }
 0x37b   : > { %3359 = vmatprep.mubr.f32.mxu1 %v7536_v2  ;;  %5168 = vmatpush1.bf16.msra.mxu1 %v5167_v21  ;;  %v5176_v2 = vpack.c.bf16 %v2962_v46, %v2961_v40  ;;  %v8746_v21 = vld [vmem:[#allocation68_spill] sm:$0xff]  ;;  %v8750_v40 = vld [vmem:[#allocation73_spill] sm:$0xff] }
 0x37c   : > { %5169 = vmatprep.subr.bf16.mxu1 %v8643_v1 }
 0x37e   : > { %3360 = vmatmul.mubr.f32.gmra.mrb[86].mxu1 %v7519_v36 }
 0x37f   : > { %3364 = vmatprep.mubr.f32.mxu1 %v7568_v16  ;;  %5171 = vmatpush1.bf16.msra.mxu1 %v5170_v3  ;;  %v5179_v16 = vpack.c.bf16 %v2964_v19, %v2963_v24  ;;  %v8748_v3 = vld [vmem:[#allocation72_spill] sm:$0xff]  ;;  %v2970_v19 = vld [vmem:[#allocation3 + $0x318] sm:$0xff] }
 0x380   : > { %5172 = vmatprep.subr.bf16.mxu1 %v8643_v1  ;;  %v2969_v24 = vld [vmem:[#allocation3 + $0x310] sm:$0xff] }
 0x382   : > { %3365 = vmatmul.mubr.f32.gmra.mrb[88].mxu1 %v7552_v43 }
 0x383   : > { %3369 = vmatprep.mubr.f32.mxu1 %v7578_v35  ;;  %5174 = vmatpush1.bf16.msra.mxu1 %v5173_v63  ;;  %v5182_v35 = vpack.c.bf16 %v2966_v22, %v2965_v41  ;;  %v5188_v41 = vpack.c.bf16 %v2970_v19, %v2969_v24  ;;  %v2971_v22 = vld [vmem:[#allocation3 + $0x320] sm:$0xff] }
 0x384   : > { %5175 = vmatprep.subr.bf16.mxu1 %v8643_v1  ;;  %v2975_v24 = vld [vmem:[#allocation3 + $0x340] sm:$0xff] }
 0x386   : > { %3370 = vmatmul.mubr.f32.gmra.mrb[90].mxu1 %v7559_v47 }
 0x387   : > { %3374 = vmatprep.mubr.f32.mxu1 %v7619_v33  ;;  %5177 = vmatpush1.bf16.msra.mxu1 %v5176_v2  ;;  %v8742_v33 = vld [vmem:[#allocation64_spill] sm:$0xff]  ;;  %v5185_v2 = vpack.c.bf16 %v2968_v55, %v2967_v12 }
 0x388   : > { %5178 = vmatprep.subr.bf16.mxu1 %v8643_v1  ;;  %v2973_v12 = vld [vmem:[#allocation3 + $0x330] sm:$0xff] }
 0x389   : > { %v8754_v55 = vld [vmem:[#allocation8_spill] sm:$0xff] }
 0x38a   : > { %3375 = vmatmul.mubr.f32.gmra.mrb[92].mxu1 %v7604_v50 }
 0x38b   : > { %3379 = vmatprep.mubr.f32.mxu1 %v7628_v29  ;;  %5180 = vmatpush1.bf16.msra.mxu1 %v5179_v16  ;;  %v8752_v16 = vld [vmem:[#allocation6_spill] sm:$0xff] }
 0x38c   : > { %5181 = vmatprep.subr.bf16.mxu1 %v8643_v1 }
 0x38e   : > { %3380 = vmatmul.mubr.f32.gmra.mrb[94].mxu1 %v7609_v28 }
 0x38f   : > { %3384 = vmatprep.mubr.f32.mxu1 %v7667_v13  ;;  %5183 = vmatpush1.bf16.msra.mxu1 %v5182_v35  ;;  %v2972_v35 = vld [vmem:[#allocation3 + $0x328] sm:$0xff] }
 0x390   : > { %5184 = vmatprep.subr.bf16.mxu1 %v8643_v1 }
 0x392   : > { %3385 = vmatmul.mubr.f32.gmra.mrb[96].mxu1 %v7652_v37 }
 0x393   : > { %3389 = vmatprep.mubr.f32.mxu1 %v7676_v60  ;;  %v8741_v60 = vld [vmem:[#allocation61_spill] sm:$0xff] }
 0x396   : > { %3390 = vmatmul.mubr.f32.gmra.mrb[98].mxu1 %v7657_v0 }
 0x397   : > { %3394 = vmatprep.mubr.f32.mxu1 %v7715_v4  ;;  %v8743_v4 = vld [vmem:[#allocation65_spill] sm:$0xff] }
 0x39a   : > { %3395 = vmatmul.mubr.f32.gmra.mrb[100].mxu1 %v7700_v9 }
 0x39b   : > { %3399 = vmatprep.mubr.f32.mxu1 %v7724_v62 }
 0x39e   : > { %3400 = vmatmul.mubr.f32.gmra.mrb[102].mxu1 %v7705_v45 }
 0x39f   : > { %3404 = vmatprep.mubr.f32.mxu1 %v7763_v54 }
 0x3a2   : > { %3405 = vmatmul.mubr.f32.gmra.mrb[104].mxu1 %v7748_v30 }
 0x3a3   : > { %3409 = vmatprep.mubr.f32.mxu1 %v7771_v59  ;;  %v8744_v59 = vld [vmem:[#allocation70_spill] sm:$0xff] }
 0x3a6   : > { %3410 = vmatmul.mubr.f32.gmra.mrb[106].mxu1 %v7753_v34 }
 0x3a7   : > { %3414 = vmatprep.mubr.f32.mxu1 %v7802_v23 }
 0x3aa   : > { %3415 = vmatmul.mubr.f32.gmra.mrb[108].mxu1 %v7788_v38 }
 0x3ab   : > { %3419 = vmatprep.mubr.f32.mxu1 %v7806_v8 }
 0x3ae   : > { %3420 = vmatmul.mubr.f32.gmra.mrb[110].mxu1 %v7793_v11 }
 0x3af   : > { %3424 = vmatprep.mubr.f32.mxu1 %v7834_v51 }
 0x3b2   : > { %3425 = vmatmul.mubr.f32.gmra.mrb[112].mxu1 %v7820_v49 }
 0x3b3   : > { %3429 = vmatprep.mubr.f32.mxu1 %v7838_v44 }
 0x3b5   : > { %v8028_v62 = vpop.f32.mrb[64].mxu0 }
 0x3b6   : > { %3430 = vmatmul.mubr.f32.gmra.mrb[114].mxu1 %v8741_v60  ;;  %v8031_v29 = vpop.f32.mrb[65].mxu0 }
 0x3b7   : > { %3434 = vmatprep.mubr.f32.mxu1 %v7870_v57 }
 0x3ba   : > { %3435 = vmatmul.mubr.f32.gmra.mrb[116].mxu1 %v8742_v33 }
 0x3bb   : > { %3439 = vmatprep.mubr.f32.mxu1 %v7873_v52 }
 0x3bd   : > { %v8036_v13 = vpop.f32.mrb[66].mxu0 }
 0x3be   : > { %3440 = vmatmul.mubr.f32.gmra.mrb[118].mxu1 %v8743_v4  ;;  %v8039_v54 = vpop.f32.mrb[67].mxu0 }
 0x3bf   : > { %3444 = vmatprep.mubr.f32.mxu1 %v7897_v7 }
 0x3c2   : > { %3445 = vmatmul.mubr.f32.gmra.mrb[120].mxu1 %v7885_v6 }
 0x3c3   : > { %3449 = vmatprep.mubr.f32.mxu1 %v8744_v59 }
 0x3c5   : > { %v8044_v26 = vpop.f32.mrb[68].mxu0 }
 0x3c6   : > { %8745 = vst [vmem:[#allocation61_spill] sm:$0xff] %v8044_v26  ;;  %3450 = vmatmul.mubr.f32.gmra.mrb[122].mxu1 %v8746_v21  ;;  %v8047_v25 = vpop.f32.mrb[69].mxu0  ;;  %v8753_v26 = vld [vmem:[#allocation7_spill] sm:$0xff] }
 0x3c7   : > { %3454 = vmatprep.mubr.f32.mxu1 %v8747_v39 }
 0x3ca   : > { %3455 = vmatmul.mubr.f32.gmra.mrb[124].mxu1 %v8748_v3 }
 0x3cb   : > { %3459 = vmatprep.mubr.f32.mxu1 %v7931_v20 }
 0x3cd   : > { %v8052_v63 = vpop.f32.mrb[70].mxu0 }
 0x3ce   : > { %8749 = vst [vmem:[#allocation64_spill] sm:$0xff] %v8052_v63  ;;  %3460 = vmatmul.mubr.f32.gmra.mrb[126].mxu1 %v8750_v40  ;;  %v8055_v46 = vpop.f32.mrb[71].mxu0 }
 0x3cf   : > { %8751 = vst [vmem:[#allocation65_spill] sm:$0xff] %v8055_v46  ;;  %3529 = vmatprep.mubr.f32.mxu1 %v7957_v14  ;;  %v5191_v14 = vpack.c.bf16 %v2972_v35, %v2971_v22  ;;  %v2977_v22 = vld [vmem:[#allocation3 + $0x350] sm:$0xff]  ;;  %v8758_v35 = vld [vmem:[#allocation13_spill] sm:$0xff] }
 0x3d2   : > { %3530 = vmatmul.mubr.f32.vlgmr.msra.gmra.mrb[64].mxu1 %v8752_v16  ;;  %v8756_v16 = vld [vmem:[#allocation9_spill] sm:$0xff] }
 0x3d3   : > { %3534 = vmatprep.mubr.f32.mxu1 %v7965_v32  ;;  %5186 = vmatpush1.bf16.msra.mxu1 %v5185_v2  ;;  %v2974_v32 = vld [vmem:[#allocation3 + $0x338] sm:$0xff] }
 0x3d4   : > { %5187 = vmatprep.subr.bf16.mxu1 %v8643_v1  ;;  %v5194_v2 = vpack.c.bf16 %v2974_v32, %v2973_v12  ;;  %v2979_v12 = vld [vmem:[#allocation3 + $0x360] sm:$0xff]  ;;  %v2980_v32 = vld [vmem:[#allocation3 + $0x368] sm:$0xff] }
 0x3d5   : > { %v8061_v63 = vpop.f32.mrb[72].mxu0 }
 0x3d6   : > { %3535 = vmatmul.mubr.f32.gmra.mrb[66].mxu1 %v8753_v26  ;;  %v8064_v46 = vpop.f32.mrb[73].mxu0  ;;  %v2976_v26 = vld [vmem:[#allocation3 + $0x348] sm:$0xff] }
 0x3d7   : > { %3539 = vmatprep.mubr.f32.mxu1 %v7406_v61  ;;  %5189 = vmatpush1.bf16.msra.mxu1 %v5188_v41  ;;  %v5197_v41 = vpack.c.bf16 %v2976_v26, %v2975_v24  ;;  %v2981_v24 = vld [vmem:[#allocation3 + $0x370] sm:$0xff]  ;;  %v8762_v26 = vld [vmem:[#allocation19_spill] sm:$0xff] }
 0x3d8   : > { %5190 = vmatprep.subr.bf16.mxu1 %v8643_v1 }
 0x3da   : > { %3540 = vmatmul.mubr.f32.gmra.mrb[68].mxu1 %v8754_v55 }
 0x3db   : > { %3544 = vmatprep.mubr.f32.mxu1 %v7411_v10  ;;  %5192 = vmatpush1.bf16.msra.mxu1 %v5191_v14  ;;  %v2978_v10 = vld [vmem:[#allocation3 + $0x358] sm:$0xff] }
 0x3dc   : > { %5193 = vmatprep.subr.bf16.mxu1 %v8643_v1  ;;  %v5200_v14 = vpack.c.bf16 %v2978_v10, %v2977_v22  ;;  %v2983_v22 = vld [vmem:[#allocation3 + $0x380] sm:$0xff]  ;;  %v2984_v10 = vld [vmem:[#allocation3 + $0x388] sm:$0xff] }
 0x3dd   : > { %v8071_v19 = vpop.f32.mrb[74].mxu0 }
 0x3de   : > { %8755 = vst [vmem:[#allocation70_spill] sm:$0xff] %v8071_v19  ;;  %3545 = vmatmul.mubr.f32.gmra.mrb[70].mxu1 %v8756_v16  ;;  %v8074_v61 = vpop.f32.mrb[75].mxu0 }
 0x3df   : > { %8757 = vst [vmem:[#allocation68_spill] sm:$0xff] %v8074_v61  ;;  %3549 = vmatprep.mubr.f32.mxu1 %v7434_v31  ;;  %5195 = vmatpush1.bf16.msra.mxu1 %v5194_v2  ;;  %v8760_v61 = vld [vmem:[#allocation15_spill] sm:$0xff]  ;;  %v5203_v2 = vpack.c.bf16 %v2980_v32, %v2979_v12  ;;  %v2985_v12 = vld [vmem:[#allocation3 + $0x390] sm:$0xff]  ;;  %v8766_v32 = vld [vmem:[#allocation25_spill] sm:$0xff] }
 0x3e0   : > { %5196 = vmatprep.subr.bf16.mxu1 %v8643_v1 }
 0x3e2   : > { %3550 = vmatmul.mubr.f32.gmra.mrb[72].mxu1 %v8758_v35 }
 0x3e3   : > { %3554 = vmatprep.mubr.f32.mxu1 %v7441_v42  ;;  %5198 = vmatpush1.bf16.msra.mxu1 %v5197_v41  ;;  %v2982_v42 = vld [vmem:[#allocation3 + $0x378] sm:$0xff] }
 0x3e4   : > { %5199 = vmatprep.subr.bf16.mxu1 %v8643_v1  ;;  %v5206_v41 = vpack.c.bf16 %v2982_v42, %v2981_v24  ;;  %v2987_v24 = vld [vmem:[#allocation3 + $0x3a0] sm:$0xff]  ;;  %v2988_v42 = vld [vmem:[#allocation3 + $0x3a8] sm:$0xff] }
 0x3e5   : > { %v8081_v19 = vpop.f32.mrb[76].mxu0 }
 0x3e6   : > { %8759 = vst [vmem:[#allocation75_spill] sm:$0xff] %v8081_v19  ;;  %3555 = vmatmul.mubr.f32.gmra.mrb[74].mxu1 %v8760_v61  ;;  %v8084_v31 = vpop.f32.mrb[77].mxu0 }
 0x3e7   : > { %8761 = vst [vmem:[#allocation72_spill] sm:$0xff] %v8084_v31  ;;  %3559 = vmatprep.mubr.f32.mxu1 %v7472_v18  ;;  %5201 = vmatpush1.bf16.msra.mxu1 %v5200_v14  ;;  %v8764_v31 = vld [vmem:[#allocation21_spill] sm:$0xff]  ;;  %v5209_v14 = vpack.c.bf16 %v2984_v10, %v2983_v22  ;;  %v2989_v22 = vld [vmem:[#allocation3 + $0x3b0] sm:$0xff]  ;;  %v8770_v10 = vld [vmem:[#allocation31_spill] sm:$0xff] }
 0x3e8   : > { %5202 = vmatprep.subr.bf16.mxu1 %v8643_v1 }
 0x3ea   : > { %3560 = vmatmul.mubr.f32.gmra.mrb[76].mxu1 %v8762_v26 }
 0x3eb   : > { %3564 = vmatprep.mubr.f32.mxu1 %v7479_v48  ;;  %5204 = vmatpush1.bf16.msra.mxu1 %v5203_v2  ;;  %v2986_v48 = vld [vmem:[#allocation3 + $0x398] sm:$0xff] }
 0x3ec   : > { %5205 = vmatprep.subr.bf16.mxu1 %v8643_v1  ;;  %v5212_v2 = vpack.c.bf16 %v2986_v48, %v2985_v12  ;;  %v2991_v12 = vld [vmem:[#allocation3 + $0x3c0] sm:$0xff]  ;;  %v2992_v48 = vld [vmem:[#allocation3 + $0x3c8] sm:$0xff] }
 0x3ed   : > { %v8091_v19 = vpop.f32.mrb[78].mxu0 }
 0x3ee   : > { %8763 = vst [vmem:[#allocation73_spill] sm:$0xff] %v8091_v19  ;;  %3565 = vmatmul.mubr.f32.gmra.mrb[78].mxu1 %v8764_v31  ;;  %v8094_v18 = vpop.f32.mrb[79].mxu0 }
 0x3ef   : > { %8765 = vst [vmem:[#allocation6_spill] sm:$0xff] %v8094_v18  ;;  %3569 = vmatprep.mubr.f32.mxu1 %v7512_v53  ;;  %5207 = vmatpush1.bf16.msra.mxu1 %v5206_v41  ;;  %v8768_v18 = vld [vmem:[#allocation27_spill] sm:$0xff]  ;;  %v5215_v41 = vpack.c.bf16 %v2988_v42, %v2987_v24  ;;  %v2993_v24 = vld [vmem:[#allocation3 + $0x3d0] sm:$0xff] }
 0x3f0   : > { %5208 = vmatprep.subr.bf16.mxu1 %v8643_v1  ;;  %v8774_v42 = vld [vmem:[#allocation36_spill] sm:$0xff] }
 0x3f2   : > { %3570 = vmatmul.mubr.f32.gmra.mrb[80].mxu1 %v8766_v32 }
 0x3f3   : > { %3574 = vmatprep.mubr.f32.mxu1 %v7519_v36  ;;  %5210 = vmatpush1.bf16.msra.mxu1 %v5209_v14  ;;  %v2990_v36 = vld [vmem:[#allocation3 + $0x3b8] sm:$0xff] }
 0x3f4   : > { %5211 = vmatprep.subr.bf16.mxu1 %v8643_v1  ;;  %v5218_v14 = vpack.c.bf16 %v2990_v36, %v2989_v22  ;;  %v2995_v22 = vld [vmem:[#allocation3 + $0x3e0] sm:$0xff]  ;;  %v2996_v36 = vld [vmem:[#allocation3 + $0x3e8] sm:$0xff] }
 0x3f5   : > { %v8101_v19 = vpop.f32.mrb[80].mxu0 }
 0x3f6   : > { %8767 = vst [vmem:[#allocation7_spill] sm:$0xff] %v8101_v19  ;;  %3575 = vmatmul.mubr.f32.gmra.mrb[82].mxu1 %v8768_v18  ;;  %v8104_v53 = vpop.f32.mrb[81].mxu0 }
 0x3f7   : > { %8769 = vst [vmem:[#allocation8_spill] sm:$0xff] %v8104_v53  ;;  %3579 = vmatprep.mubr.f32.mxu1 %v7552_v43  ;;  %5213 = vmatpush1.bf16.msra.mxu1 %v5212_v2  ;;  %v8772_v53 = vld [vmem:[#allocation33_spill] sm:$0xff]  ;;  %v5221_v2 = vpack.c.bf16 %v2992_v48, %v2991_v12  ;;  %v2997_v12 = vld [vmem:[#allocation3 + $0x3f0] sm:$0xff]  ;;  %v8777_v48 = vld [vmem:[#allocation42_spill] sm:$0xff] }
 0x3f8   : > { %5214 = vmatprep.subr.bf16.mxu1 %v8643_v1 }
 0x3fa   : > { %3580 = vmatmul.mubr.f32.gmra.mrb[84].mxu1 %v8770_v10 }
 0x3fb   : > { %3584 = vmatprep.mubr.f32.mxu1 %v7559_v47  ;;  %5216 = vmatpush1.bf16.msra.mxu1 %v5215_v41  ;;  %v2994_v47 = vld [vmem:[#allocation3 + $0x3d8] sm:$0xff] }
 0x3fc   : > { %5217 = vmatprep.subr.bf16.mxu1 %v8643_v1  ;;  %v5224_v41 = vpack.c.bf16 %v2994_v47, %v2993_v24  ;;  %v8779_v47 = vld [vmem:[#allocation43_spill] sm:$0xff] }
 0x3fd   : > { %v8111_v19 = vpop.f32.mrb[82].mxu0 }
 0x3fe   : > { %8771 = vst [vmem:[#allocation9_spill] sm:$0xff] %v8111_v19  ;;  %3585 = vmatmul.mubr.f32.gmra.mrb[86].mxu1 %v8772_v53  ;;  %v8114_v43 = vpop.f32.mrb[83].mxu0 }
 0x3ff   : > { %8773 = vst [vmem:[#allocation13_spill] sm:$0xff] %v8114_v43  ;;  %3589 = vmatprep.mubr.f32.mxu1 %v7604_v50  ;;  %5219 = vmatpush1.bf16.msra.mxu1 %v5218_v14  ;;  %v8776_v43 = vld [vmem:[#allocation37_spill] sm:$0xff]  ;;  %v5227_v14 = vpack.c.bf16 %v2996_v36, %v2995_v22 }
 0x400   : > { %5220 = vmatprep.subr.bf16.mxu1 %v8643_v1 }
 0x402   : > { %3590 = vmatmul.mubr.f32.gmra.mrb[88].mxu1 %v8774_v42 }
 0x403   : > { %3594 = vmatprep.mubr.f32.mxu1 %v7609_v28  ;;  %5222 = vmatpush1.bf16.msra.mxu1 %v5221_v2  ;;  %v2998_v28 = vld [vmem:[#allocation3 + $0x3f8] sm:$0xff] }
 0x404   : > { %5223 = vmatprep.subr.bf16.mxu1 %v8643_v1  ;;  %v5230_v2 = vpack.c.bf16 %v2998_v28, %v2997_v12  ;;  %v8791_v28 = vld [vmem:[#allocation59_spill] sm:$0xff] }
 0x405   : > { %v8121_v19 = vpop.f32.mrb[84].mxu0 }
 0x406   : > { %8775 = vst [vmem:[#allocation15_spill] sm:$0xff] %v8121_v19  ;;  %3595 = vmatmul.mubr.f32.gmra.mrb[90].mxu1 %v8776_v43  ;;  %v8124_v50 = vpop.f32.mrb[85].mxu0 }
 0x407   : > { %3599 = vmatprep.mubr.f32.mxu1 %v7652_v37  ;;  %5225 = vmatpush1.bf16.msra.mxu1 %v5224_v41  ;;  %v8781_v37 = vld [vmem:[#allocation48_spill] sm:$0xff] }
 0x408   : > { %5226 = vmatprep.subr.bf16.mxu1 %v8643_v1 }
 0x40a   : > { %3600 = vmatmul.mubr.f32.gmra.mrb[92].mxu1 %v8777_v48 }
 0x40b   : > { %3604 = vmatprep.mubr.f32.mxu1 %v7657_v0  ;;  %5228 = vmatpush1.bf16.msra.mxu1 %v5227_v14  ;;  %v8783_v0 = vld [vmem:[#allocation49_spill] sm:$0xff] }
 0x40c   : > { %5229 = vmatprep.subr.bf16.mxu1 %v8643_v1  ;;  %v8785_v1 = vld [vmem:[#allocation54_spill] sm:$0xff] }
 0x40d   : > { %v8131_v24 = vpop.f32.mrb[86].mxu0 }
 0x40e   : > { %8778 = vst [vmem:[#allocation19_spill] sm:$0xff] %v8131_v24  ;;  %3605 = vmatmul.mubr.f32.gmra.mrb[94].mxu1 %v8779_v47  ;;  %v8134_v19 = vpop.f32.mrb[87].mxu0 }
 0x40f   : > { %8780 = vst [vmem:[#allocation21_spill] sm:$0xff] %v8134_v19  ;;  %3609 = vmatprep.mubr.f32.mxu1 %v7700_v9  ;;  %5231 = vmatpush1.bf16.msra.mxu1 %v5230_v2  ;;  %v8787_v9 = vld [vmem:[#allocation55_spill] sm:$0xff]  ;;  %v8794_v2 = vld [vmem:[#allocation62_spill] sm:$0xff] }
 0x412   : > { %3610 = vmatmul.mubr.f32.gmra.mrb[96].mxu1 %v8781_v37 }
 0x413   : > { %3614 = vmatprep.mubr.f32.mxu1 %v7705_v45  ;;  %v8789_v45 = vld [vmem:[#allocation58_spill] sm:$0xff] }
 0x415   : > { %v8139_v41 = vpop.f32.mrb[88].mxu0 }
 0x416   : > { %8782 = vst [vmem:[#allocation25_spill] sm:$0xff] %v8139_v41  ;;  %3615 = vmatmul.mubr.f32.gmra.mrb[98].mxu1 %v8783_v0  ;;  %v8142_v22 = vpop.f32.mrb[89].mxu0  ;;  %v8801_v41 = vld [vmem:[#allocation77_spill] sm:$0xff] }
 0x417   : > { %8784 = vst [vmem:[#allocation27_spill] sm:$0xff] %v8142_v22  ;;  %3619 = vmatprep.mubr.f32.mxu1 %v7748_v30  ;;  %v2843_v22 = vrot.slane %v8801_v41, 1 }
 0x41a   : > { %3620 = vmatmul.mubr.f32.gmra.mrb[100].mxu1 %v8785_v1 }
 0x41b   : > { %3624 = vmatprep.mubr.f32.mxu1 %v7753_v34  ;;  %v8793_v34 = vld [vmem:[#allocation60_spill] sm:$0xff] }
 0x41d   : > { %v8147_v36 = vpop.f32.mrb[90].mxu0 }
 0x41e   : > { %8786 = vst [vmem:[#allocation31_spill] sm:$0xff] %v8147_v36  ;;  %3625 = vmatmul.mubr.f32.gmra.mrb[102].mxu1 %v8787_v9  ;;  %v8150_v14 = vpop.f32.mrb[91].mxu0  ;;  %v8180_v36 = vld [vmem:[#allocation2 + $0x1a8] sm:$0x3] }
 0x41f   : > { %8788 = vst [vmem:[#allocation33_spill] sm:$0xff] %v8150_v14  ;;  %3629 = vmatprep.mubr.f32.mxu1 %v7788_v38  ;;  %v8795_v38 = vld [vmem:[#allocation63_spill] sm:$0xff] }
 0x422   : > { %3630 = vmatmul.mubr.f32.gmra.mrb[104].mxu1 %v8789_v45 }
 0x423   : > { %3634 = vmatprep.mubr.f32.mxu1 %v7793_v11  ;;  %v8796_v11 = vld [vmem:[#allocation66_spill] sm:$0xff] }
 0x425   : > { %v8155_v12 = vpop.f32.mrb[92].mxu0 }
 0x426   : > { %8790 = vst [vmem:[#allocation36_spill] sm:$0xff] %v8155_v12  ;;  %3635 = vmatmul.mubr.f32.gmra.mrb[106].mxu1 %v8791_v28  ;;  %v8158_v30 = vpop.f32.mrb[93].mxu0  ;;  %v8797_v12 = vld [vmem:[#allocation67_spill] sm:$0xff] }
 0x427   : > { %8792 = vst [vmem:[#allocation37_spill] sm:$0xff] %v8158_v30  ;;  %3639 = vmatprep.mubr.f32.mxu1 %v7820_v49  ;;  %v8798_v49 = vld [vmem:[#allocation69_spill] sm:$0xff]  ;;  %v8176_v30 = vld [vmem:[#allocation2 + $0x198] sm:$0xff] }
 0x42a   : > { %3640 = vmatmul.mubr.f32.gmra.mrb[108].mxu1 %v8793_v34 }
 0x42b   : > { %3644 = vmatprep.mubr.f32.mxu1 %v8741_v60  ;;  %v8799_v60 = vld [vmem:[#allocation71_spill] sm:$0xff] }
 0x42e   : > { %3645 = vmatmul.mubr.f32.gmra.mrb[110].mxu1 %v8794_v2 }
 0x42f   : > { %3649 = vmatprep.mubr.f32.mxu1 %v8742_v33  ;;  %v2841_v33 = vrot.slane %v7931_v20, 1 }
 0x431   : > { %v8196_v19 = vsel %vm477_vm0, %v2841_v33, %v2843_v22 }
 0x432   : > { %3650 = vmatmul.mubr.f32.gmra.mrb[112].mxu1 %v8795_v38 }
 0x433   : > { %3654 = vmatprep.mubr.f32.mxu1 %v8743_v4  ;;  %v8800_v4 = vld [vmem:[#allocation74_spill] sm:$0xff] }
 0x436   : > { %3655 = vmatmul.mubr.f32.gmra.mrb[114].mxu1 %v8796_v11 }
 0x437   : > { %3659 = vmatprep.mubr.f32.mxu1 %v7885_v6  ;;  %v2864_v6 = vrot.slane %v8176_v30, 2 }
 0x439   : > { %v2866_v14 = vsel %vm590_vm1, %v2864_v6, %v7929_v27  ;;  %v8807_v6 = vld [vmem:[#allocation12_spill] sm:$0xff] }
 0x43a   : > { %3660 = vmatmul.mubr.f32.gmra.mrb[116].mxu1 %v8797_v12  ;;  %4781 = vmatprep.mubr.f32.mxu0 %v2866_v14 }
 0x43b   : > { %3664 = vmatprep.mubr.f32.mxu1 %v8746_v21  ;;  %v2840_v21 = vrot.slane %v8747_v39, 1 }
 0x43e   : > { %3665 = vmatmul.mubr.f32.gmra.mrb[118].mxu1 %v8798_v49 }
 0x43f   : > { %3669 = vmatprep.mubr.f32.mxu1 %v8748_v3  ;;  %v2867_v3 = vrot.slane %v8180_v36, 2 }
 0x441   : > { %v2868_v24 = vsel %vm590_vm1, %v7929_v27, %v2867_v3  ;;  %v5714_v27 = vld [vmem:[#allocation2 + $0x60] sm:$0xff] }
 0x442   : > { %3670 = vmatmul.mubr.f32.gmra.mrb[120].mxu1 %v8799_v60  ;;  %4782 = vmatmul.mubr.f32.gmra.mrb[94].mxu0 %v2868_v24 }
 0x443   : > { %3674 = vmatprep.mubr.f32.mxu1 %v8750_v40  ;;  %v8188_v40 = vsel %vm477_vm0, %v2840_v21, %v2841_v33 }
 0x446   : > { %3675 = vmatmul.mubr.f32.gmra.mrb[122].mxu1 %v8800_v4 }
 0x447   : > { %3679 = vmatprep.mubr.f32.mxu1 %v7942_v15  ;;  %v8802_v15 = vld [vmem:[#allocation78_spill] sm:$0xff] }
 0x44a   : > { %3680 = vmatmul.mubr.f32.gmra.mrb[124].mxu1 %v8188_v40 }
 0x44b   : > { %3684 = vmatprep.mubr.f32.mxu1 %v8802_v15 }
 0x44e   : > { %3685 = vmatmul.mubr.f32.gmra.mrb[126].mxu1 %v8196_v19 }
 0x44f   : > { %3754 = vmatprep.mubr.f32.mxu1 %v8754_v55  ;;  %v5715_v55 = vld [vmem:[#allocation2 + $0x68] sm:$0xff] }
 0x452   : > { %3755 = vmatmul.mubr.f32.vlgmr.msra.gmra.mrb[64].mxu1 %v7952_v5  ;;  %v5716_v5 = vld [vmem:[#allocation2 + $0x78] sm:$0xff] }
 0x453   : > { %3759 = vmatprep.mubr.f32.mxu1 %v8756_v16  ;;  %v5720_v16 = vld [vmem:[#allocation2 + $0xa8] sm:$0xff] }
 0x456   : > { %3760 = vmatmul.mubr.f32.gmra.mrb[66].mxu1 %v7960_v58  ;;  %v5717_v58 = vld [vmem:[#allocation2 + $0x80] sm:$0xff] }
 0x457   : > { %3764 = vmatprep.mubr.f32.mxu1 %v8758_v35  ;;  %v5722_v35 = vld [vmem:[#allocation2 + $0xc0] sm:$0xff] }
 0x45a   : > { %3765 = vmatmul.mubr.f32.gmra.mrb[68].mxu1 %v7968_v17  ;;  %v5718_v17 = vld [vmem:[#allocation2 + $0x90] sm:$0xff] }
 0x45b   : > { %3769 = vmatprep.mubr.f32.mxu1 %v8760_v61  ;;  %v5721_v61 = vld [vmem:[#allocation2 + $0xb0] sm:$0xff] }
 0x45e   : > { %3770 = vmatmul.mubr.f32.gmra.mrb[70].mxu1 %v7973_v56  ;;  %v5719_v56 = vld [vmem:[#allocation2 + $0x98] sm:$0xff] }
 0x45f   : > { %3774 = vmatprep.mubr.f32.mxu1 %v8762_v26  ;;  %v5724_v26 = vld [vmem:[#allocation2 + $0xd8] sm:$0xff] }
 0x462   : > { %3775 = vmatmul.mubr.f32.gmra.mrb[72].mxu1 %v5714_v27 }
 0x463   : > { %3779 = vmatprep.mubr.f32.mxu1 %v8764_v31  ;;  %v5723_v31 = vld [vmem:[#allocation2 + $0xc8] sm:$0xff] }
 0x466   : > { %3780 = vmatmul.mubr.f32.gmra.mrb[74].mxu1 %v5715_v55 }
 0x467   : > { %3784 = vmatprep.mubr.f32.mxu1 %v8766_v32  ;;  %v5726_v32 = vld [vmem:[#allocation2 + $0xf0] sm:$0xff] }
 0x46a   : > { %3785 = vmatmul.mubr.f32.gmra.mrb[76].mxu1 %v5716_v5 }
 0x46b   : > { %3789 = vmatprep.mubr.f32.mxu1 %v8768_v18  ;;  %v5725_v18 = vld [vmem:[#allocation2 + $0xe0] sm:$0xff] }
 0x46e   : > { %3790 = vmatmul.mubr.f32.gmra.mrb[78].mxu1 %v5717_v58 }
 0x46f   : > { %3794 = vmatprep.mubr.f32.mxu1 %v8770_v10  ;;  %v5728_v10 = vld [vmem:[#allocation2 + $0x108] sm:$0xff] }
 0x472   : > { %3795 = vmatmul.mubr.f32.gmra.mrb[80].mxu1 %v5718_v17 }
 0x473   : > { %3799 = vmatprep.mubr.f32.mxu1 %v8772_v53  ;;  %v5727_v53 = vld [vmem:[#allocation2 + $0xf8] sm:$0xff] }
 0x476   : > { %3800 = vmatmul.mubr.f32.gmra.mrb[82].mxu1 %v5719_v56 }
 0x477   : > { %3804 = vmatprep.mubr.f32.mxu1 %v8774_v42  ;;  %v8804_v42 = vld [vmem:[#allocation11_spill] sm:$0xff] }
 0x47a   : > { %3805 = vmatmul.mubr.f32.gmra.mrb[84].mxu1 %v5720_v16  ;;  %v8808_v16 = vld [vmem:[#allocation17_spill] sm:$0xff] }
 0x47b   : > { %3809 = vmatprep.mubr.f32.mxu1 %v8776_v43  ;;  %v5729_v43 = vld [vmem:[#allocation2 + $0x110] sm:$0xff] }
 0x47e   : > { %3810 = vmatmul.mubr.f32.gmra.mrb[86].mxu1 %v5721_v61 }
 0x47f   : > { %3814 = vmatprep.mubr.f32.mxu1 %v8777_v48 }
 0x482   : > { %3815 = vmatmul.mubr.f32.gmra.mrb[88].mxu1 %v5722_v35 }
 0x483   : > { %3819 = vmatprep.mubr.f32.mxu1 %v8779_v47 }
 0x486   : > { %3820 = vmatmul.mubr.f32.gmra.mrb[90].mxu1 %v5723_v31 }
 0x487   : > { %3824 = vmatprep.mubr.f32.mxu1 %v8781_v37  ;;  %v8270_v37 = vld [vmem:[%s8484_s9] ss:$0 sm:$0xff] }
 0x48a   : > { %3825 = vmatmul.mubr.f32.gmra.mrb[92].mxu1 %v5724_v26 }
 0x48b   : > { %3829 = vmatprep.mubr.f32.mxu1 %v8783_v0  ;;  %v8805_v0 = vld [vmem:[#allocation10_spill] sm:$0xff] }
 0x48e   : > { %3830 = vmatmul.mubr.f32.gmra.mrb[94].mxu1 %v5725_v18 }
 0x48f   : > { %3834 = vmatprep.mubr.f32.mxu1 %v8785_v1 }
 0x492   : > { %3835 = vmatmul.mubr.f32.gmra.mrb[96].mxu1 %v5726_v32 }
 0x493   : > { %3839 = vmatprep.mubr.f32.mxu1 %v8787_v9 }
 0x496   : > { %3840 = vmatmul.mubr.f32.gmra.mrb[98].mxu1 %v5727_v53  ;;  %v8809_v53 = vld [vmem:[#allocation16_spill] sm:$0xff] }
 0x497   : > { %3844 = vmatprep.mubr.f32.mxu1 %v8789_v45 }
 0x49a   : > { %3845 = vmatmul.mubr.f32.gmra.mrb[100].mxu1 %v5728_v10 }
 0x49b   : > { %3849 = vmatprep.mubr.f32.mxu1 %v8791_v28 }
 0x49e   : > { %3850 = vmatmul.mubr.f32.gmra.mrb[102].mxu1 %v5729_v43 }
 0x49f   : > { %3854 = vmatprep.mubr.f32.mxu1 %v8793_v34 }
 0x4a2   : > { %3855 = vmatmul.mubr.f32.gmra.mrb[104].mxu1 %v7802_v23  ;;  %v2857_v23 = vrot.slane %v8176_v30, 1 }
 0x4a3   : > { %3859 = vmatprep.mubr.f32.mxu1 %v8794_v2  ;;  %v8806_v2 = vld [vmem:[#allocation14_spill] sm:$0xff] }
 0x4a6   : > { %3860 = vmatmul.mubr.f32.gmra.mrb[106].mxu1 %v7806_v8  ;;  %v8803_v8 = vld [vmem:[#allocation76_spill] sm:$0xff] }
 0x4a7   : > { %3864 = vmatprep.mubr.f32.mxu1 %v8795_v38 }
 0x4aa   : > { %3865 = vmatmul.mubr.f32.gmra.mrb[108].mxu1 %v7834_v51  ;;  %v2858_v51 = vrot.slane %v8803_v8, 1 }
 0x4ab   : > { %3869 = vmatprep.mubr.f32.mxu1 %v8796_v11 }
 0x4ae   : > { %3870 = vmatmul.mubr.f32.gmra.mrb[110].mxu1 %v7838_v44  ;;  %v2859_v44 = vsel %vm477_vm0, %v2857_v23, %v2858_v51 }
 0x4af   : > { %3874 = vmatprep.mubr.f32.mxu1 %v8797_v12 }
 0x4b2   : > { %3875 = vmatmul.mubr.f32.gmra.mrb[112].mxu1 %v7870_v57  ;;  %v2860_v57 = vrot.slane %v8180_v36, 1  ;;  %v8278_v36 = vld [vmem:[%s8482_s7] ss:$0 sm:$0xff] }
 0x4b3   : > { %3879 = vmatprep.mubr.f32.mxu1 %v8798_v49 }
 0x4b6   : > { %3880 = vmatmul.mubr.f32.gmra.mrb[114].mxu1 %v7873_v52  ;;  %v2861_v52 = vsel %vm477_vm0, %v2858_v51, %v2860_v57 }
 0x4b7   : > { %3884 = vmatprep.mubr.f32.mxu1 %v8799_v60 }
 0x4ba   : > { %3885 = vmatmul.mubr.f32.gmra.mrb[116].mxu1 %v7897_v7 }
 0x4bb   : > { %3889 = vmatprep.mubr.f32.mxu1 %v8800_v4 }
 0x4be   : > { %3890 = vmatmul.mubr.f32.gmra.mrb[118].mxu1 %v8744_v59 }
 0x4bf   : > { %3894 = vmatprep.mubr.f32.mxu1 %v8188_v40 }
 0x4c2   : > { %3895 = vmatmul.mubr.f32.gmra.mrb[120].mxu1 %v8747_v39 }
 0x4c3   : > { %3899 = vmatprep.mubr.f32.mxu1 %v8196_v19  ;;  %v8257_v19 = vld [vmem:[%s8483_s8] ss:$0 sm:$0xff] }
 0x4c6   : > { %3900 = vmatmul.mubr.f32.gmra.mrb[122].mxu1 %v7931_v20  ;;  %v8262_v20 = vld [vmem:[%s8481_s6] ss:$0 sm:$0xff] }
 0x4c7   : > { %3904 = vmatprep.mubr.f32.mxu1 %v2859_v44  ;;  %v2364_v48 = vmul.f32 %v8262_v20, %v8804_v42  ;;  %v2365_v22 = vmul.f32 %v8262_v20, %v8805_v0  ;;  %v2366_v38 = vmul.f32 %v8262_v20, %v8806_v2  ;;  %v2367_v21 = vmul.f32 %v8262_v20, %v8807_v6  ;;  %v8810_v44 = vld [vmem:[#allocation61_spill] sm:$0xff]  ;;  %v8815_v6 = vld [vmem:[#allocation23_spill] sm:$0xff] }
 0x4c8   : > { %v2368_v61 = vmul.f32 %v8262_v20, %v8808_v16  ;;  %v2369_v10 = vmul.f32 %v8262_v20, %v8809_v53 }
 0x4c9   : > { %v2403_v9 = vadd.f32 %v8278_v36, %v2364_v48  ;;  %v2405_v40 = vadd.f32 %v8278_v36, %v2366_v38  ;;  %v2406_v17 = vadd.f32 %v8278_v36, %v2367_v21  ;;  %v8814_v38 = vld [vmem:[#allocation64_spill] sm:$0xff]  ;;  %v2372_v21 = vmul.f32 %v8262_v20, %v8815_v6  ;;  %v8824_v6 = vld [vmem:[#allocation75_spill] sm:$0xff] }
 0x4ca   : > { %3905 = vmatmul.mubr.f32.gmra.mrb[124].mxu1 %v8176_v30  ;;  %v2404_v30 = vadd.f32 %v8278_v36, %v2365_v22  ;;  %v2407_v23 = vadd.f32 %v8278_v36, %v2368_v61  ;;  %v2408_v42 = vadd.f32 %v8278_v36, %v2369_v10  ;;  %v8812_v22 = vld [vmem:[#allocation65_spill] sm:$0xff] }
 0x4cb   : > { %3909 = vmatprep.mubr.f32.mxu1 %v2861_v52 }
 0x4ce   : > { %3910 = vmatmul.mubr.f32.gmra.mrb[126].mxu1 %v8803_v8 }
 0x515   : > { %v8250_v7 = vpop.f32.mrb[94].mxu0 }
 0x516   : > { %v8252_v59 = vpop.f32.mrb[95].mxu0 }
 0x525   : > { %v3756_v39 = vpop.f32.mrb[64].mxu1 }
 0x526   : > { %v3982_v24 = vadd.f32 %v8031_v29, %v3756_v39  ;;  %v3758_v47 = vpop.f32.mrb[65].mxu1 }
 0x528   : > { %v4147_v41 = vmul.f32 %v8257_v19, %v3982_v24  ;;  %v8811_v24 = vld [vmem:[#allocation20_spill] sm:$0xff] }
 0x529   : > { %v3761_v1 = vpop.f32.mrb[66].mxu1  ;;  %v2370_v47 = vmul.f32 %v8262_v20, %v8811_v24  ;;  %v8820_v24 = vld [vmem:[#allocation70_spill] sm:$0xff] }
 0x52a   : > { %v4186_v29 = vadd.f32 %v8270_v37, %v4147_v41  ;;  %v3987_v14 = vadd.f32 %v8028_v62, %v3761_v1  ;;  %v3763_v45 = vpop.f32.mrb[67].mxu1 }
 0x52b   : > { %v8813_v45 = vld [vmem:[#allocation18_spill] sm:$0xff] }
 0x52c   : > { %v4218_v12 = vadd.f32 %v4186_v29, %v2403_v9  ;;  %v4148_v28 = vmul.f32 %v8257_v19, %v3987_v14 }
 0x52d   : > { %v3766_v34 = vpop.f32.mrb[68].mxu1 }
 0x52e   : > { %v4250_v11 = vmax.f32 %v4218_v12, 0.0  ;;  %v4187_v62 = vadd.f32 %v8270_v37, %v4148_v28  ;;  %v3992_v49 = vadd.f32 %v8039_v54, %v3766_v34  ;;  %v3768_v60 = vpop.f32.mrb[69].mxu1  ;;  %v2371_v12 = vmul.f32 %v8262_v20, %v8813_v45 }
 0x530   : > { %4282 = vst [vmem:[%s8289_s17] sm:$0xff] %v4250_v11  ;;  %v4219_v33 = vadd.f32 %v4187_v62, %v2404_v30  ;;  %v4149_v4 = vmul.f32 %v8257_v19, %v3992_v49  ;;  %v2409_v30 = vadd.f32 %v8278_v36, %v2370_v47 }
 0x531   : > { %v3771_v3 = vpop.f32.mrb[70].mxu1 }
 0x532   : > { %v4251_v15 = vmax.f32 %v4219_v33, 0.0  ;;  %v4188_v27 = vadd.f32 %v8270_v37, %v4149_v4  ;;  %v3997_v55 = vadd.f32 %v8036_v13, %v3771_v3  ;;  %v3773_v5 = vpop.f32.mrb[71].mxu1  ;;  %v2410_v33 = vadd.f32 %v8278_v36, %v2371_v12 }
 0x534   : > { %4283 = vst [vmem:[%s8289_s17 + $0x8] sm:$0xff] %v4251_v15  ;;  %v4220_v54 = vadd.f32 %v4188_v27, %v2405_v40  ;;  %v4150_v58 = vmul.f32 %v8257_v19, %v3997_v55 }
 0x535   : > { %v3776_v56 = vpop.f32.mrb[72].mxu1 }
 0x536   : > { %v4252_v35 = vmax.f32 %v4220_v54, 0.0  ;;  %v4189_v31 = vadd.f32 %v8270_v37, %v4150_v58  ;;  %v4002_v26 = vadd.f32 %v8047_v25, %v3776_v56  ;;  %v3778_v18 = vpop.f32.mrb[73].mxu1  ;;  %v8816_v54 = vld [vmem:[#allocation22_spill] sm:$0xff]  ;;  %v2411_v56 = vadd.f32 %v8278_v36, %v2372_v21 }
 0x537   : > { %v2373_v58 = vmul.f32 %v8262_v20, %v8816_v54 }
 0x538   : > { %4284 = vst [vmem:[%s8289_s17 + $0x10] sm:$0xff] %v4252_v35  ;;  %v4221_v13 = vadd.f32 %v4189_v31, %v2406_v17  ;;  %v4151_v32 = vmul.f32 %v8257_v19, %v4002_v26 }
 0x539   : > { %v3781_v43 = vpop.f32.mrb[74].mxu1  ;;  %v2412_v18 = vadd.f32 %v8278_v36, %v2373_v58 }
 0x53a   : > { %v4253_v8 = vmax.f32 %v4221_v13, 0.0  ;;  %v4190_v51 = vadd.f32 %v8270_v37, %v4151_v32  ;;  %v4007_v57 = vadd.f32 %v8810_v44, %v3781_v43  ;;  %v3783_v52 = vpop.f32.mrb[75].mxu1  ;;  %v8817_v32 = vld [vmem:[#allocation26_spill] sm:$0xff] }
 0x53b   : > { %v2374_v53 = vmul.f32 %v8262_v20, %v8817_v32 }
 0x53c   : > { %4285 = vst [vmem:[%s8289_s17 + $0x18] sm:$0xff] %v4253_v8  ;;  %v4222_v25 = vadd.f32 %v4190_v51, %v2407_v23  ;;  %v4152_v39 = vmul.f32 %v8257_v19, %v4007_v57  ;;  %v8818_v23 = vld [vmem:[#allocation68_spill] sm:$0xff] }
 0x53d   : > { %v3786_v48 = vpop.f32.mrb[76].mxu1  ;;  %v8819_v57 = vld [vmem:[#allocation24_spill] sm:$0xff] }
 0x53e   : > { %v4254_v41 = vmax.f32 %v4222_v25, 0.0  ;;  %v4191_v0 = vadd.f32 %v8270_v37, %v4152_v39  ;;  %v4012_v1 = vadd.f32 %v8812_v22, %v3786_v48  ;;  %v3788_v9 = vpop.f32.mrb[77].mxu1  ;;  %v2375_v52 = vmul.f32 %v8262_v20, %v8819_v57 }
 0x53f   : > { %v2413_v39 = vadd.f32 %v8278_v36, %v2374_v53 }
 0x540   : > { %4286 = vst [vmem:[%s8289_s17 + $0x20] sm:$0xff] %v4254_v41  ;;  %v4223_v29 = vadd.f32 %v4191_v0, %v2408_v42  ;;  %v4153_v14 = vmul.f32 %v8257_v19, %v4012_v1  ;;  %v2414_v1 = vadd.f32 %v8278_v36, %v2375_v52  ;;  %v8829_v52 = vld [vmem:[#allocation8_spill] sm:$0xff] }
 0x541   : > { %v3791_v28 = vpop.f32.mrb[78].mxu1 }
 0x542   : > { %v4255_v34 = vmax.f32 %v4223_v29, 0.0  ;;  %v4192_v2 = vadd.f32 %v8270_v37, %v4153_v14  ;;  %v4017_v11 = vadd.f32 %v8814_v38, %v3791_v28  ;;  %v3793_v62 = vpop.f32.mrb[79].mxu1  ;;  %v8821_v29 = vld [vmem:[#allocation29_spill] sm:$0xff]  ;;  %v8822_v28 = vld [vmem:[#allocation72_spill] sm:$0xff] }
 0x543   : > { %v2376_v14 = vmul.f32 %v8262_v20, %v8821_v29 }
 0x544   : > { %4287 = vst [vmem:[%s8289_s17 + $0x28] sm:$0xff] %v4255_v34  ;;  %v4224_v49 = vadd.f32 %v4192_v2, %v2409_v30  ;;  %v4154_v60 = vmul.f32 %v8257_v19, %v4017_v11  ;;  %v8823_v11 = vld [vmem:[#allocation28_spill] sm:$0xff] }
 0x545   : > { %v3796_v4 = vpop.f32.mrb[80].mxu1  ;;  %v2377_v62 = vmul.f32 %v8262_v20, %v8823_v11 }
 0x546   : > { %v4256_v3 = vmax.f32 %v4224_v49, 0.0  ;;  %v4193_v40 = vadd.f32 %v8270_v37, %v4154_v60  ;;  %v4022_v15 = vadd.f32 %v8064_v46, %v3796_v4  ;;  %v3798_v27 = vpop.f32.mrb[81].mxu1  ;;  %v2415_v60 = vadd.f32 %v8278_v36, %v2376_v14 }
 0x547   : > { %v2416_v27 = vadd.f32 %v8278_v36, %v2377_v62 }
 0x548   : > { %4288 = vst [vmem:[%s8289_s17 + $0x30] sm:$0xff] %v4256_v3  ;;  %v4225_v55 = vadd.f32 %v4193_v40, %v2410_v33  ;;  %v4155_v5 = vmul.f32 %v8257_v19, %v4022_v15 }
 0x549   : > { %v3801_v17 = vpop.f32.mrb[82].mxu1 }
 0x54a   : > { %v4257_v16 = vmax.f32 %v4225_v55, 0.0  ;;  %v4194_v61 = vadd.f32 %v8270_v37, %v4155_v5  ;;  %v4027_v35 = vadd.f32 %v8061_v63, %v3801_v17  ;;  %v3803_v31 = vpop.f32.mrb[83].mxu1  ;;  %v8825_v5 = vld [vmem:[#allocation32_spill] sm:$0xff] }
 0x54b   : > { %v2378_v54 = vmul.f32 %v8262_v20, %v8825_v5 }
 0x54c   : > { %4289 = vst [vmem:[%s8289_s17 + $0x38] sm:$0xff] %v4257_v16  ;;  %v4226_v46 = vadd.f32 %v4194_v61, %v2411_v56  ;;  %v4156_v26 = vmul.f32 %v8257_v19, %v4027_v35  ;;  %v8826_v56 = vld [vmem:[#allocation6_spill] sm:$0xff] }
 0x54d   : > { %v3806_v13 = vpop.f32.mrb[84].mxu1 }
 0x54e   : > { %v4258_v10 = vmax.f32 %v4226_v46, 0.0  ;;  %v4195_v43 = vadd.f32 %v8270_v37, %v4156_v26  ;;  %v4032_v8 = vadd.f32 %v8818_v23, %v3806_v13  ;;  %v3808_v51 = vpop.f32.mrb[85].mxu1  ;;  %v8827_v46 = vld [vmem:[#allocation30_spill] sm:$0xff]  ;;  %v2417_v13 = vadd.f32 %v8278_v36, %v2378_v54 }
 0x54f   : > { %v2379_v26 = vmul.f32 %v8262_v20, %v8827_v46 }
 0x550   : > { %4290 = vst [vmem:[%s8289_s17 + $0x40] sm:$0xff] %v4258_v10  ;;  %v4227_v63 = vadd.f32 %v4195_v43, %v2412_v18  ;;  %v4157_v44 = vmul.f32 %v8257_v19, %v4032_v8  ;;  %v8828_v10 = vld [vmem:[#allocation73_spill] sm:$0xff] }
 0x551   : > { %v3811_v25 = vpop.f32.mrb[86].mxu1 }
 0x552   : > { %v4259_v42 = vmax.f32 %v4227_v63, 0.0  ;;  %v4196_v48 = vadd.f32 %v8270_v37, %v4157_v44  ;;  %v4037_v47 = vadd.f32 %v8820_v24, %v3811_v25  ;;  %v3813_v41 = vpop.f32.mrb[87].mxu1  ;;  %v2418_v44 = vadd.f32 %v8278_v36, %v2379_v26  ;;  %v8831_v36 = vld [vmem:[#allocation35_spill] sm:$0xff] }
 0x554   : > { %4291 = vst [vmem:[%s8289_s17 + $0x48] sm:$0xff] %v4259_v42  ;;  %v4228_v0 = vadd.f32 %v4196_v48, %v2413_v39  ;;  %v4158_v22 = vmul.f32 %v8257_v19, %v4037_v47 }
 0x555   : > { %v3816_v9 = vpop.f32.mrb[88].mxu1 }
 0x556   : > { %v4260_v45 = vmax.f32 %v4228_v0, 0.0  ;;  %v4197_v12 = vadd.f32 %v8270_v37, %v4158_v22  ;;  %v4042_v30 = vadd.f32 %v8822_v28, %v3816_v9  ;;  %v3818_v34 = vpop.f32.mrb[89].mxu1  ;;  %v8830_v0 = vld [vmem:[#allocation7_spill] sm:$0xff]  ;;  %v8832_v28 = vld [vmem:[#allocation13_spill] sm:$0xff] }
 0x558   : > { %4292 = vst [vmem:[%s8289_s17 + $0x50] sm:$0xff] %v4260_v45  ;;  %v4229_v2 = vadd.f32 %v4197_v12, %v2414_v1  ;;  %v4159_v38 = vmul.f32 %v8257_v19, %v4042_v30 }
 0x559   : > { %v3821_v49 = vpop.f32.mrb[90].mxu1 }
 0x55a   : > { %v4261_v33 = vmax.f32 %v4229_v2, 0.0  ;;  %v4198_v4 = vadd.f32 %v8270_v37, %v4159_v38  ;;  %v4047_v21 = vadd.f32 %v8824_v6, %v3821_v49  ;;  %v3823_v3 = vpop.f32.mrb[91].mxu1  ;;  %v8833_v2 = vld [vmem:[#allocation34_spill] sm:$0xff] }
 0x55c   : > { %4293 = vst [vmem:[%s8289_s17 + $0x58] sm:$0xff] %v4261_v33  ;;  %v4230_v40 = vadd.f32 %v4198_v4, %v2415_v60  ;;  %v4160_v15 = vmul.f32 %v8257_v19, %v4047_v21  ;;  %v8834_v33 = vld [vmem:[#allocation9_spill] sm:$0xff]  ;;  %v8835_v21 = vld [vmem:[#allocation39_spill] sm:$0xff] }
 0x55d   : > { %v3826_v55 = vpop.f32.mrb[92].mxu1 }
 0x55e   : > { %v4262_v58 = vmax.f32 %v4230_v40, 0.0  ;;  %v4199_v17 = vadd.f32 %v8270_v37, %v4160_v15  ;;  %v4052_v16 = vadd.f32 %v8826_v56, %v3826_v55  ;;  %v3828_v61 = vpop.f32.mrb[93].mxu1 }
 0x560   : > { %4294 = vst [vmem:[%s8289_s17 + $0x60] sm:$0xff] %v4262_v58  ;;  %v4231_v35 = vadd.f32 %v4199_v17, %v2416_v27  ;;  %v4161_v31 = vmul.f32 %v8257_v19, %v4052_v16  ;;  %v8836_v58 = vld [vmem:[#allocation38_spill] sm:$0xff] }
 0x561   : > { %v3831_v18 = vpop.f32.mrb[94].mxu1 }
 0x562   : > { %v4263_v32 = vmax.f32 %v4231_v35, 0.0  ;;  %v4200_v53 = vadd.f32 %v8270_v37, %v4161_v31  ;;  %v4057_v43 = vadd.f32 %v8828_v10, %v3831_v18  ;;  %v3833_v23 = vpop.f32.mrb[95].mxu1  ;;  %v8837_v31 = vld [vmem:[#allocation15_spill] sm:$0xff]  ;;  %v8838_v18 = vld [vmem:[#allocation41_spill] sm:$0xff] }
 0x564   : > { %4295 = vst [vmem:[%s8289_s17 + $0x68] sm:$0xff] %v4263_v32  ;;  %v4232_v8 = vadd.f32 %v4200_v53, %v2417_v13  ;;  %v4162_v51 = vmul.f32 %v8257_v19, %v4057_v43  ;;  %v8839_v43 = vld [vmem:[#allocation21_spill] sm:$0xff] }
 0x565   : > { %v3836_v63 = vpop.f32.mrb[96].mxu1 }
 0x566   : > { %v4264_v57 = vmax.f32 %v4232_v8, 0.0  ;;  %v4201_v20 = vadd.f32 %v8270_v37, %v4162_v51  ;;  %v4062_v25 = vadd.f32 %v8829_v52, %v3836_v63  ;;  %v3838_v39 = vpop.f32.mrb[97].mxu1  ;;  %v8840_v51 = vld [vmem:[#allocation40_spill] sm:$0xff] }
 0x568   : > { %4296 = vst [vmem:[%s8289_s17 + $0x70] sm:$0xff] %v4264_v57  ;;  %v4233_v42 = vadd.f32 %v4201_v20, %v2418_v44  ;;  %v4163_v48 = vmul.f32 %v8257_v19, %v4062_v25  ;;  %v8841_v25 = vld [vmem:[#allocation19_spill] sm:$0xff] }
 0x569   : > { %v3841_v24 = vpop.f32.mrb[98].mxu1 }
 0x56a   : > { %v4265_v47 = vmax.f32 %v4233_v42, 0.0  ;;  %v4202_v41 = vadd.f32 %v8270_v37, %v4163_v48  ;;  %v4067_v22 = vadd.f32 %v8830_v0, %v3841_v24  ;;  %v3843_v1 = vpop.f32.mrb[99].mxu1  ;;  %v8842_v48 = vld [vmem:[#allocation45_spill] sm:$0xff] }
 0x56b   : > { %v8843_v1 = vld [vmem:[#allocation27_spill] sm:$0xff] }
 0x56c   : > { %4297 = vst [vmem:[%s8289_s17 + $0x78] sm:$0xff] %v4265_v47  ;;  %v4234_v9 = vadd.f32 %v4202_v41, %v8831_v36  ;;  %v4164_v29 = vmul.f32 %v8257_v19, %v4067_v22 }
 0x56d   : > { %v3846_v14 = vpop.f32.mrb[100].mxu1 }
 0x56e   : > { %v4266_v45 = vmax.f32 %v4234_v9, 0.0  ;;  %v4203_v12 = vadd.f32 %v8270_v37, %v4164_v29  ;;  %v4072_v30 = vadd.f32 %v8832_v28, %v3846_v14  ;;  %v3848_v34 = vpop.f32.mrb[101].mxu1  ;;  %v8844_v29 = vld [vmem:[#allocation44_spill] sm:$0xff] }
 0x56f   : > { %v8845_v34 = vld [vmem:[#allocation25_spill] sm:$0xff] }
 0x570   : > { %4298 = vst [vmem:[%s8289_s17 + $0x80] sm:$0xff] %v4266_v45  ;;  %v4235_v38 = vadd.f32 %v4203_v12, %v8833_v2  ;;  %v4165_v11 = vmul.f32 %v8257_v19, %v4072_v30 }
 0x571   : > { %v3851_v62 = vpop.f32.mrb[102].mxu1 }
 0x572   : > { %v4267_v49 = vmax.f32 %v4235_v38, 0.0  ;;  %v4204_v60 = vadd.f32 %v8270_v37, %v4165_v11  ;;  %v4077_v4 = vadd.f32 %v8834_v33, %v3851_v62  ;;  %v3853_v6 = vpop.f32.mrb[103].mxu1  ;;  %v8846_v11 = vld [vmem:[#allocation47_spill] sm:$0xff] }
 0x573   : > { %v8847_v6 = vld [vmem:[#allocation33_spill] sm:$0xff] }
 0x574   : > { %4299 = vst [vmem:[%s8289_s17 + $0x88] sm:$0xff] %v4267_v49  ;;  %v4236_v3 = vadd.f32 %v4204_v60, %v8835_v21  ;;  %v4166_v40 = vmul.f32 %v8257_v19, %v4077_v4 }
 0x575   : > { %v3856_v15 = vpop.f32.mrb[104].mxu1 }
 0x576   : > { %v4268_v27 = vmax.f32 %v4236_v3, 0.0  ;;  %v4205_v55 = vadd.f32 %v8270_v37, %v4166_v40  ;;  %v4082_v5 = vadd.f32 %v8124_v50, %v3856_v15  ;;  %v3858_v54 = vpop.f32.mrb[105].mxu1  ;;  %v8848_v40 = vld [vmem:[#allocation46_spill] sm:$0xff] }
 0x578   : > { %4300 = vst [vmem:[%s8289_s17 + $0x90] sm:$0xff] %v4268_v27  ;;  %v4237_v17 = vadd.f32 %v4205_v55, %v8836_v58  ;;  %v4167_v56 = vmul.f32 %v8257_v19, %v4082_v5  ;;  %v8849_v58 = vld [vmem:[#allocation31_spill] sm:$0xff] }
 0x579   : > { %v3861_v16 = vpop.f32.mrb[106].mxu1 }
 0x57a   : > { %v4269_v61 = vmax.f32 %v4237_v17, 0.0  ;;  %v4206_v35 = vadd.f32 %v8270_v37, %v4167_v56  ;;  %v4087_v46 = vadd.f32 %v8837_v31, %v3861_v16  ;;  %v3863_v26 = vpop.f32.mrb[107].mxu1  ;;  %v8850_v16 = vld [vmem:[#allocation51_spill] sm:$0xff] }
 0x57c   : > { %4301 = vst [vmem:[%s8289_s17 + $0x98] sm:$0xff] %v4269_v61  ;;  %v4238_v13 = vadd.f32 %v4206_v35, %v8838_v18  ;;  %v4168_v50 = vmul.f32 %v8257_v19, %v4087_v46  ;;  %v8851_v18 = vld [vmem:[#allocation37_spill] sm:$0xff] }
 0x57d   : > { %v3866_v32 = vpop.f32.mrb[108].mxu1 }
 0x57e   : > { %v4270_v53 = vmax.f32 %v4238_v13, 0.0  ;;  %v4207_v10 = vadd.f32 %v8270_v37, %v4168_v50  ;;  %v4092_v23 = vadd.f32 %v8839_v43, %v3866_v32  ;;  %v3868_v8 = vpop.f32.mrb[109].mxu1  ;;  %v8852_v32 = vld [vmem:[#allocation50_spill] sm:$0xff] }
 0x580   : > { %4302 = vst [vmem:[%s8289_s17 + $0xa0] sm:$0xff] %v4270_v53  ;;  %v4239_v63 = vadd.f32 %v4207_v10, %v8840_v51  ;;  %v4169_v44 = vmul.f32 %v8257_v19, %v4092_v23  ;;  %v8853_v51 = vld [vmem:[#allocation36_spill] sm:$0xff] }
 0x581   : > { %v3871_v57 = vpop.f32.mrb[110].mxu1 }
 0x582   : > { %v4271_v20 = vmax.f32 %v4239_v63, 0.0  ;;  %v4208_v52 = vadd.f32 %v8270_v37, %v4169_v44  ;;  %v4097_v39 = vadd.f32 %v8841_v25, %v3871_v57  ;;  %v3873_v42 = vpop.f32.mrb[111].mxu1  ;;  %v8854_v57 = vld [vmem:[#allocation53_spill] sm:$0xff] }
 0x584   : > { %4303 = vst [vmem:[%s8289_s17 + $0xa8] sm:$0xff] %v4271_v20  ;;  %v4240_v24 = vadd.f32 %v4208_v52, %v8842_v48  ;;  %v4170_v47 = vmul.f32 %v8257_v19, %v4097_v39 }
 0x585   : > { %v3876_v41 = vpop.f32.mrb[112].mxu1 }
 0x586   : > { %v4272_v0 = vmax.f32 %v4240_v24, 0.0  ;;  %v4209_v22 = vadd.f32 %v8270_v37, %v4170_v47  ;;  %v4102_v36 = vadd.f32 %v8843_v1, %v3876_v41  ;;  %v3878_v9 = vpop.f32.mrb[113].mxu1  ;;  %v8855_v47 = vld [vmem:[#allocation52_spill] sm:$0xff] }
 0x588   : > { %4304 = vst [vmem:[%s8289_s17 + $0xb0] sm:$0xff] %v4272_v0  ;;  %v4241_v14 = vadd.f32 %v4209_v22, %v8844_v29  ;;  %v4171_v45 = vmul.f32 %v8257_v19, %v4102_v36 }
 0x589   : > { %v3881_v12 = vpop.f32.mrb[114].mxu1 }
 0x58a   : > { %v4273_v28 = vmax.f32 %v4241_v14, 0.0  ;;  %v4210_v30 = vadd.f32 %v8270_v37, %v4171_v45  ;;  %v4107_v2 = vadd.f32 %v8845_v34, %v3881_v12  ;;  %v3883_v38 = vpop.f32.mrb[115].mxu1  ;;  %v8856_v14 = vld [vmem:[#allocation57_spill] sm:$0xff] }
 0x58c   : > { %4305 = vst [vmem:[%s8289_s17 + $0xb8] sm:$0xff] %v4273_v28  ;;  %v4242_v62 = vadd.f32 %v4210_v30, %v8846_v11  ;;  %v4172_v49 = vmul.f32 %v8257_v19, %v4107_v2  ;;  %v8857_v30 = vld [vmem:[#allocation56_spill] sm:$0xff] }
 0x58d   : > { %v3886_v60 = vpop.f32.mrb[116].mxu1 }
 0x58e   : > { %v4274_v33 = vmax.f32 %v4242_v62, 0.0  ;;  %v4211_v4 = vadd.f32 %v8270_v37, %v4172_v49  ;;  %v4112_v21 = vadd.f32 %v8847_v6, %v3886_v60  ;;  %v3888_v3 = vpop.f32.mrb[117].mxu1 }
 0x590   : > { %4306 = vst [vmem:[%s8289_s17 + $0xc0] sm:$0xff] %v4274_v33  ;;  %v4243_v15 = vadd.f32 %v4211_v4, %v8848_v40  ;;  %v4173_v27 = vmul.f32 %v8257_v19, %v4112_v21 }
 0x591   : > { %v3891_v55 = vpop.f32.mrb[118].mxu1 }
 0x592   : > { %v4275_v5 = vmax.f32 %v4243_v15, 0.0  ;;  %v4212_v54 = vadd.f32 %v8270_v37, %v4173_v27  ;;  %v4117_v17 = vadd.f32 %v8849_v58, %v3891_v55  ;;  %v3893_v56 = vpop.f32.mrb[119].mxu1 }
 0x594   : > { %4307 = vst [vmem:[%s8289_s17 + $0xc8] sm:$0xff] %v4275_v5  ;;  %v4244_v61 = vadd.f32 %v4212_v54, %v8850_v16  ;;  %v4174_v35 = vmul.f32 %v8257_v19, %v4117_v17 }
 0x595   : > { %v3896_v31 = vpop.f32.mrb[120].mxu1 }
 0x596   : > { %v4276_v46 = vmax.f32 %v4244_v61, 0.0  ;;  %v4213_v26 = vadd.f32 %v8270_v37, %v4174_v35  ;;  %v4122_v13 = vadd.f32 %v8851_v18, %v3896_v31  ;;  %v3898_v50 = vpop.f32.mrb[121].mxu1 }
 0x598   : > { %4308 = vst [vmem:[%s8289_s17 + $0xd0] sm:$0xff] %v4276_v46  ;;  %v4245_v53 = vadd.f32 %v4213_v26, %v8852_v32  ;;  %v4175_v10 = vmul.f32 %v8257_v19, %v4122_v13 }
 0x599   : > { %v3901_v43 = vpop.f32.mrb[122].mxu1 }
 0x59a   : > { %v4277_v23 = vmax.f32 %v4245_v53, 0.0  ;;  %v4214_v8 = vadd.f32 %v8270_v37, %v4175_v10  ;;  %v4127_v63 = vadd.f32 %v8853_v51, %v3901_v43  ;;  %v3903_v44 = vpop.f32.mrb[123].mxu1 }
 0x59c   : > { %4309 = vst [vmem:[%s8289_s17 + $0xd8] sm:$0xff] %v4277_v23  ;;  %v4246_v20 = vadd.f32 %v4214_v8, %v8854_v57  ;;  %v4176_v52 = vmul.f32 %v8257_v19, %v4127_v63 }
 0x59d   : > { %v3906_v25 = vpop.f32.mrb[124].mxu1 }
 0x59e   : > { %v4278_v39 = vmax.f32 %v4246_v20, 0.0  ;;  %v4215_v42 = vadd.f32 %v8270_v37, %v4176_v52  ;;  %v4132_v48 = vadd.f32 %v8252_v59, %v3906_v25  ;;  %v3908_v24 = vpop.f32.mrb[125].mxu1 }
 0x5a0   : > { %4310 = vst [vmem:[%s8289_s17 + $0xe0] sm:$0xff] %v4278_v39  ;;  %v4247_v41 = vadd.f32 %v4215_v42, %v8855_v47  ;;  %v4177_v0 = vmul.f32 %v8257_v19, %v4132_v48 }
 0x5a1   : > { %v3911_v22 = vpop.f32.mrb[126].mxu1 }
 0x5a2   : > { %v4279_v1 = vmax.f32 %v4247_v41, 0.0  ;;  %v4216_v36 = vadd.f32 %v8270_v37, %v4177_v0  ;;  %v4137_v9 = vadd.f32 %v8250_v7, %v3911_v22  ;;  %v3913_v29 = vpop.f32.mrb[127].mxu1 }
 0x5a4   : > { %4311 = vst [vmem:[%s8289_s17 + $0xe8] sm:$0xff] %v4279_v1  ;;  %v4248_v45 = vadd.f32 %v4216_v36, %v8856_v14  ;;  %v4178_v12 = vmul.f32 %v8257_v19, %v4137_v9 }
 0x5a6   : > { %v4280_v59 = vmax.f32 %v4248_v45, 0.0  ;;  %v4217_v28 = vadd.f32 %v8270_v37, %v4178_v12 }
 0x5a8   : > { %4312 = vst [vmem:[%s8289_s17 + $0xf0] sm:$0xff] %v4280_v59  ;;  %v4249_v34 = vadd.f32 %v4217_v28, %v8857_v30 }
 0x5aa   : > { %v4281_v2 = vmax.f32 %v4249_v34, 0.0 }
 0x5ac   : > { %4313 = vst [vmem:[%s8289_s17 + $0xf8] sm:$0xff] %v4281_v2 }
 0x5ad PF: > { %s21_s13 = sadd.s32 1, %s5770_s13  }
 0x5ae   : > { %p18_p3 = scmp.ge.s32.totalorder %s21_s13, 4  }
 0x5b0   :  { %20 = sbr.rel (!%p18_p3) target bundleno = 1 (0x1), region = 97 }
 0x5b7   :  { %4335 = vsyncpa [#allocation4], 1 }
 0x5b8   :  { %4337 = vsyncpa [#allocation4 + $0x1], 1 }

</bundles_post_ra>
